<compile_context>
chip_gen: v7x
topology: tpu7x:2x2x1
jax: 0.10.0
libtpu: 0.0.40
codegen_flags: <defaults>
</compile_context>

<pallas_src>
import functools

import jax
import jax.numpy as jnp
from jax.experimental import pallas as pl
from jax.experimental.pallas import tpu as pltpu


# --------------------------------------------------------------------------- #
# Hardware introspection helpers (all failures fall back to safe defaults).    #
# --------------------------------------------------------------------------- #
def _device_kind():
    try:
        return jax.devices()[0].device_kind.lower()
    except Exception:
        return ""


def _tpu_vmem_capacity_bytes(device_kind):
    """Per-TensorCore VMEM capacity, with per-generation fallbacks."""
    cap = 0
    try:
        cap = int(getattr(pltpu.get_tpu_info(), "vmem_capacity_bytes", 0))
    except Exception:
        cap = 0
    if cap <= 0:
        # v4 / v5e / v5p / v6e parts have 128 MiB; v7x has 64 MiB per TensorCore.
        cap = (64 << 20) if ("v7" in device_kind or "7x" in device_kind) else (128 << 20)
    if "v7" in device_kind or "7x" in device_kind:
        cap = min(cap, 64 << 20)          # never assume more than v7x per-TC VMEM
    return cap


def _tensorcores_per_chip(device_kind):
    """2 on megacore (v4/v5p) and v7x parts, 1 on v5e/v6e (single TC)."""
    if "v7" in device_kind or "7x" in device_kind:
        return 2
    if "v4" in device_kind or "v5p" in device_kind:
        return 2
    return 1


def _choose_tiling(bc, num_classes, use_hier, vmem_cap):
    """Pick the per-core batch tile tb from a VMEM byte budget; return (tb, nt)."""
    row_bytes = num_classes * 4
    # VMEM per batch-row of tile: logits+targets double-buffered (4x) plus the
    # probs scratch (1x) on the hierarchy path.
    per_row = row_bytes * (4 + (1 if use_hier else 0))
    fixed = 8 * num_classes * 4 + (2 * num_classes * num_classes * 4 if use_hier else 0)
    fixed += 4 << 20                                   # out blocks / compiler slack
    budget = max(vmem_cap - (16 << 20) - fixed, 2 << 20)
    # BCE-only is HBM-bound: target ~4 MiB input tiles (amortizes the ~0.35 us
    # fixed per-step overhead) but never exceed the per-generation VMEM budget.
    tb_cap = min(budget // per_row, (4 << 20) // row_bytes)
    tb_cap = max(8, int(tb_cap) - int(tb_cap) % 8)
    if bc <= tb_cap:
        return bc, 1
    d = tb_cap
    while d >= 8:                                      # largest multiple-of-8 divisor
        if bc % d == 0:
            return d, bc // d
        d -= 8
    for d in range(min(tb_cap, bc), 0, -1):            # fallback: any divisor
        if bc % d == 0:
            return d, bc // d
    return bc, 1


# --------------------------------------------------------------------------- #
# Kernel                                                                        #
# --------------------------------------------------------------------------- #
def _spoticell_loss_kernel(*refs, total_batch, num_classes, hier_coef,
                           use_hierarchy, fold_bce, group):
    if use_hierarchy:
        (logits_ref, targets_ref, weight_ref, h_hbm_ref, out_ref,
         bce_acc_ref, probs_ref, v_acc_ref, h_vmem_ref, h_sem) = refs
    else:
        (logits_ref, targets_ref, weight_ref, out_ref, bce_acc_ref) = refs

    C = num_classes
    t_idx = pl.program_id(1)                  # "arbitrary" accumulation axis

    @pl.when(t_idx == 0)
    def _init():
        bce_acc_ref[...] = jnp.zeros_like(bce_acc_ref)
        if use_hierarchy:
            v_acc_ref[...] = jnp.zeros_like(v_acc_ref)
            # H is only consumed at finalize: start its single-buffered DMA now
            # so it overlaps the whole accumulation phase.
            pltpu.make_async_copy(h_hbm_ref, h_vmem_ref, h_sem).start()

    x = logits_ref[...].astype(jnp.float32)       # (TB, C)
    tgt = targets_ref[...].astype(jnp.float32)    # (TB, C)

    # Shared transcendental: e = exp(-|x|) feeds both softplus (BCE) and sigmoid.
    e = jnp.exp(-jnp.abs(x))

    # Numerically stable BCE-with-logits (== torch.nn.BCEWithLogitsLoss); the
    # per-class weight is applied once at finalize on the folded accumulator.
    bce = jnp.maximum(x, 0.0) - x * tgt + jnp.log1p(e)              # (TB, C)
    if fold_bce:
        bce_acc_ref[...] += jnp.sum(bce.reshape(-1, 8, C), axis=0)  # (8, C)
    else:
        bce_acc_ref[...] += bce

    if use_hierarchy:
        # sigmoid(x) from the shared exp(-|x|); exact divide kept for tolerance.
        probs_ref[...] = jnp.where(x >= 0.0, 1.0, e) / (1.0 + e)    # (TB, C)

        tb = x.shape[0]
        n_groups = tb // group
        unroll = min(max(2, 8 // group), n_groups)

        # V[i, j] += sum_b relu(p[b, j] - p[b, i]); the H multiply and the
        # reductions are deferred to finalize. Rows are processed in groups:
        # ONE small (G, C) -> (C, G) XLU transpose per group replaces the old
        # per-row one-hot MXU matmuls; the statically unrolled inner loop gives
        # the scheduler a G-row window to overlap loads / transposes with the
        # sub/max/add VALU chain.
        def body(g, v):
            start = pl.multiple_of(g * group, group)
            blk = probs_ref[pl.ds(start, group), :]        # (G, C)
            blk_t = blk.T                                  # (C, G)
            for r in range(group):                         # static unroll
                row = blk[r:r + 1, :]                      # (1, C): child  p_b[j]
                col = blk_t[:, r:r + 1]                    # (C, 1): parent p_b[i]
                v = v + jnp.maximum(row - col, 0.0)        # (C, C), VPU only
            return v

        # V carried in registers across the tile (16 vregs at C=128); one VMEM
        # load + one store per grid step instead of 3*16 VMEM ops per row.
        v_acc_ref[...] = jax.lax.fori_loop(0, n_groups, body, v_acc_ref[...],
                                           unroll=unroll)

    @pl.when(t_idx == pl.num_programs(1) - 1)
    def _finalize():
        w = weight_ref[...].astype(jnp.float32)            # (1, C)
        total = jnp.sum(bce_acc_ref[...] * w) / jnp.float32(total_batch * num_classes)
        if use_hierarchy:
            pltpu.make_async_copy(h_hbm_ref, h_vmem_ref, h_sem).wait()
            hier_sum = jnp.sum(v_acc_ref[...] * h_vmem_ref[...].astype(jnp.float32))
            total = total + jnp.float32(hier_coef) * (hier_sum / jnp.float32(total_batch))
        # Lane-dense (8, 128) per-core partial; the wrapper sums element [0] of
        # each block over the parallel axis.
        out_ref[...] = jnp.broadcast_to(total, out_ref.shape).astype(jnp.float32)


# --------------------------------------------------------------------------- #
# Wrapper                                                                       #
# --------------------------------------------------------------------------- #
def spoticell_loss(logits, targets, hierarchy_matrix=None, weight=None,
                   hier_coef=0.1):
    """Pallas implementation of SpoticellLoss.forward (reduction='mean')."""
    B, C = logits.shape
    use_hier = hierarchy_matrix is not None

    if weight is None:
        weight2d = jnp.ones((1, C), dtype=jnp.float32)
    else:
        weight2d = jnp.asarray(weight, dtype=jnp.float32).reshape(1, C)

    kind = _device_kind()
    vmem_cap = _tpu_vmem_capacity_bytes(kind)
    nc = _tensorcores_per_chip(kind)
    if nc > 1 and (B % nc != 0 or B < 16):
        nc = 1                                             # split not worth it / impossible
    tb, nt = _choose_tiling(B // nc, C, use_hier, vmem_cap)

    fold_bce = (tb % 8 == 0)
    bce_rows = 8 if fold_bce else tb
    group = 8 if tb % 8 == 0 else (4 if tb % 4 == 0 else (2 if tb % 2 == 0 else 1))

    kernel = functools.partial(
        _spoticell_loss_kernel,
        total_batch=B, num_classes=C, hier_coef=float(hier_coef),
        use_hierarchy=use_hier, fold_bce=fold_bce, group=group)

    in_specs = [
        pl.BlockSpec((tb, C), lambda c, t: (c * nt + t, 0)),   # logits tile
        pl.BlockSpec((tb, C), lambda c, t: (c * nt + t, 0)),   # targets tile
        pl.BlockSpec((1, C), lambda c, t: (0, 0)),             # per-class weight
    ]
    inputs = [logits, targets, weight2d]
    scratch = [pltpu.VMEM((bce_rows, C), jnp.float32)]         # folded BCE accumulator
    if use_hier:
        in_specs.append(pl.BlockSpec(memory_space=pl.ANY))     # H stays in HBM
        inputs.append(jnp.asarray(hierarchy_matrix, dtype=jnp.float32))
        scratch += [
            pltpu.VMEM((tb, C), jnp.float32),                  # probs scratch
            pltpu.VMEM((C, C), jnp.float32),                   # V accumulator
            pltpu.VMEM((C, C), jnp.float32),                   # H landing buffer
            pltpu.SemaphoreType.DMA(()),                       # H DMA semaphore
        ]

    # VMEM budget from the actual allocations (per-generation cap, with headroom).
    tile_bytes = tb * C * 4
    needed = 2 * 2 * tile_bytes + 2 * C * 4 + bce_rows * C * 4 + 2 * 8 * 128 * 4
    if use_hier:
        needed += tile_bytes + 2 * C * C * 4
    cap = max(vmem_cap - (12 << 20), 32 << 20)
    vmem_limit = int(min(max(needed + (8 << 20), 32 << 20), cap))

    out_padded = pl.pallas_call(
        kernel,
        out_shape=jax.ShapeDtypeStruct((nc * 8, 128), jnp.float32),
        grid_spec=pltpu.PrefetchScalarGridSpec(
            num_scalar_prefetch=0,
            grid=(nc, nt),
            in_specs=in_specs,
            out_specs=pl.BlockSpec((8, 128), lambda c, t: (c, 0)),
            scratch_shapes=scratch,
        ),
        compiler_params=pltpu.CompilerParams(
            dimension_semantics=("parallel", "arbitrary"),
            vmem_limit_bytes=vmem_limit),
    )(*inputs)

    # One scalar partial per parallel (core) split; sum them.
    return jnp.sum(out_padded[::8, 0])


# --------------------------------------------------------------------------- #
# Pure-JAX reference mirroring the PyTorch module                               #
# --------------------------------------------------------------------------- #
def _reference_loss(logits, targets, hierarchy_matrix=None, weight=None,
                    hier_coef=0.1):
    x = logits.astype(jnp.float32)
    t = targets.astype(jnp.float32)
    bce = jnp.maximum(x, 0.0) - x * t + jnp.log1p(jnp.exp(-jnp.abs(x)))
    if weight is not None:
        bce = bce * jnp.asarray(weight, jnp.float32)
    bce_loss = jnp.mean(bce)
    if hierarchy_matrix is None:
        return bce_loss
    probs = jax.nn.sigmoid(x)
    child = probs[:, None, :]     # (B, 1, C)
    parent = probs[:, :, None]    # (B, C, 1)
    viol = jnp.maximum(child - parent, 0.0) * hierarchy_matrix[None, :, :]
    hier_loss = jnp.mean(jnp.sum(viol, axis=(1, 2)))
    return bce_loss + hier_coef * hier_loss


if __name__ == "__main__":
    key = jax.random.PRNGKey(0)
    k_logit, k_tgt, k_h, k_w = jax.random.split(key, 4)

    B, C = 16, 128  # small multi-label problem: 16 cells, 128 cell-type labels
    logits = jax.random.normal(k_logit, (B, C), dtype=jnp.float32) * 2.0
    targets = (jax.random.uniform(k_tgt, (B, C)) < 0.3).astype(jnp.float32)
    hierarchy = (jax.random.uniform(k_h, (C, C)) < 0.05).astype(jnp.float32)
    class_w = jax.random.uniform(k_w, (C,), minval=0.5, maxval=1.5).astype(jnp.float32)

    # With hierarchy penalty.
    loss = jax.block_until_ready(spoticell_loss(logits, targets, hierarchy))
    ref = jax.block_until_ready(_reference_loss(logits, targets, hierarchy))
    assert jnp.allclose(loss, ref, rtol=1e-4, atol=1e-5), (loss, ref)

    # BCE-only path (hierarchy_matrix=None) with per-class weights.
    loss2 = jax.block_until_ready(spoticell_loss(logits, targets, None, weight=class_w))
    ref2 = jax.block_until_ready(_reference_loss(logits, targets, None, weight=class_w))
    assert jnp.allclose(loss2, ref2, rtol=1e-4, atol=1e-5), (loss2, ref2)

    print("KERNEL_OK")
</pallas_src>

<mosaic_0001>
module attributes {stable_mosaic.version = 11 : i64} {
  func.func @_spoticell_loss_kernel(%arg0: i32, %arg1: i32, %arg2: memref<16x128xf32, #tpu.memory_space<vmem>>, %arg3: memref<16x128xf32, #tpu.memory_space<vmem>>, %arg4: memref<1x128xf32, #tpu.memory_space<vmem>>, %arg5: memref<128x128xf32, #tpu.memory_space<any>>, %arg6: memref<8x128xf32, #tpu.memory_space<vmem>>, %arg7: memref<8x128xf32, #tpu.memory_space<vmem>>, %arg8: memref<16x128xf32, #tpu.memory_space<vmem>>, %arg9: memref<128x128xf32, #tpu.memory_space<vmem>>, %arg10: memref<128x128xf32, #tpu.memory_space<vmem>>, %arg11: memref<!tpu.dma_semaphore, #tpu.memory_space<semaphore_mem>>) attributes {dimension_semantics = [#tpu.dimension_semantics<parallel>, #tpu.dimension_semantics<arbitrary>], iteration_bounds = array<i64: 1, 1>, scalar_prefetch = 0 : i64, scratch_operands = 5 : i64, tpu.core_type = #tpu.core_type<tc>, window_params = [{transform_indices = @transform_0, window_bounds = array<i64: 16, 128>}, {transform_indices = @transform_1, window_bounds = array<i64: 16, 128>}, {pipeline_mode = #tpu.pipeline_mode<synchronous>, transform_indices = @transform_2, window_bounds = array<i64: 1, 128>}, {}, {transform_indices = @transform_4, window_bounds = array<i64: 8, 128>}]} {
    %c0_i32 = arith.constant 0 : i32
    %0 = arith.cmpi eq, %arg1, %c0_i32 : i32
    %1 = arith.extui %0 : i1 to i32
    %c0_i32_0 = arith.constant 0 : i32
    %2 = arith.cmpi ne, %1, %c0_i32_0 : i32
    scf.if %2 {
      %cst_41 = arith.constant 0.000000e+00 : f32
      %171 = vector.broadcast %cst_41 : f32 to vector<8x128xf32>
      %c0_42 = arith.constant 0 : index
      %c0_43 = arith.constant 0 : index
      %172 = vector.load %arg7[%c0_42, %c0_43] : memref<8x128xf32, #tpu.memory_space<vmem>>, vector<8x128xf32>
      tpu.vector_store %arg7[%c0_42, %c0_43], %171 {strides = array<i32>} : memref<8x128xf32, #tpu.memory_space<vmem>>, vector<8x128xf32>,
      %cst_44 = arith.constant 0.000000e+00 : f32
      %173 = vector.broadcast %cst_44 : f32 to vector<128x128xf32>
      %c0_45 = arith.constant 0 : index
      %c0_46 = arith.constant 0 : index
      %174 = vector.load %arg9[%c0_45, %c0_46] : memref<128x128xf32, #tpu.memory_space<vmem>>, vector<128x128xf32>
      tpu.vector_store %arg9[%c0_45, %c0_46], %173 {strides = array<i32>} : memref<128x128xf32, #tpu.memory_space<vmem>>, vector<128x128xf32>,
      tpu.enqueue_dma source(%arg5 : memref<128x128xf32, #tpu.memory_space<any>>) target(%arg10 : memref<128x128xf32, #tpu.memory_space<vmem>>) target_semaphore(%arg11 : memref<!tpu.dma_semaphore, #tpu.memory_space<semaphore_mem>>)
    } else {
    }
    %c0 = arith.constant 0 : index
    %c0_1 = arith.constant 0 : index
    %3 = vector.load %arg2[%c0, %c0_1] : memref<16x128xf32, #tpu.memory_space<vmem>>, vector<16x128xf32>
    %c0_2 = arith.constant 0 : index
    %c0_3 = arith.constant 0 : index
    %4 = vector.load %arg3[%c0_2, %c0_3] : memref<16x128xf32, #tpu.memory_space<vmem>>, vector<16x128xf32>
    %5 = math.absf %3 : vector<16x128xf32>
    %cst = arith.constant 0.000000e+00 : f32
    %6 = vector.broadcast %cst : f32 to vector<16x128xf32>
    %7 = arith.subf %6, %5 : vector<16x128xf32>
    %8 = math.exp %7 : vector<16x128xf32>
    %cst_4 = arith.constant 0.000000e+00 : f32
    %9 = vector.broadcast %cst_4 : f32 to vector<16x128xf32>
    %10 = arith.maximumf %3, %9 : vector<16x128xf32>
    %11 = arith.mulf %3, %4 : vector<16x128xf32>
    %12 = arith.subf %10, %11 : vector<16x128xf32>
    %13 = math.log1p %8 : vector<16x128xf32>
    %14 = arith.addf %12, %13 : vector<16x128xf32>
    %c0_5 = arith.constant 0 : index
    %c0_6 = arith.constant 0 : index
    %15 = vector.load %arg7[%c0_5, %c0_6] : memref<8x128xf32, #tpu.memory_space<vmem>>, vector<8x128xf32>
    %16 = vector.shape_cast %14 : vector<16x128xf32> to vector<2x8x128xf32>
    %cst_7 = arith.constant dense<0.000000e+00> : vector<8x128xf32>
    %17 = vector.multi_reduction <add>, %16, %cst_7 [0] : vector<2x8x128xf32> to vector<8x128xf32>
    %18 = arith.addf %15, %17 : vector<8x128xf32>
    %c0_8 = arith.constant 0 : index
    %c0_9 = arith.constant 0 : index
    %19 = vector.load %arg7[%c0_8, %c0_9] : memref<8x128xf32, #tpu.memory_space<vmem>>, vector<8x128xf32>
    tpu.vector_store %arg7[%c0_8, %c0_9], %18 {strides = array<i32>} : memref<8x128xf32, #tpu.memory_space<vmem>>, vector<8x128xf32>,
    %cst_10 = arith.constant 0.000000e+00 : f32
    %20 = vector.broadcast %cst_10 : f32 to vector<16x128xf32>
    %21 = arith.cmpf oge, %3, %20 : vector<16x128xf32>
    %cst_11 = arith.constant 1.000000e+00 : f32
    %22 = vector.broadcast %cst_11 : f32 to vector<16x128xf32>
    %23 = arith.select %21, %22, %8 : vector<16x128xi1>, vector<16x128xf32>
    %cst_12 = arith.constant 1.000000e+00 : f32
    %24 = vector.broadcast %cst_12 : f32 to vector<16x128xf32>
    %25 = arith.addf %24, %8 : vector<16x128xf32>
    %26 = arith.divf %23, %25 : vector<16x128xf32>
    %c0_13 = arith.constant 0 : index
    %c0_14 = arith.constant 0 : index
    %27 = vector.load %arg8[%c0_13, %c0_14] : memref<16x128xf32, #tpu.memory_space<vmem>>, vector<16x128xf32>
    tpu.vector_store %arg8[%c0_13, %c0_14], %26 {strides = array<i32>} : memref<16x128xf32, #tpu.memory_space<vmem>>, vector<16x128xf32>,
    %c0_15 = arith.constant 0 : index
    %c0_16 = arith.constant 0 : index
    %28 = vector.load %arg9[%c0_15, %c0_16] : memref<128x128xf32, #tpu.memory_space<vmem>>, vector<128x128xf32>
    %c0_i32_17 = arith.constant 0 : i32
    %c8_i32 = arith.constant 8 : i32
    %29 = arith.muli %c0_i32_17, %c8_i32 : i32
    %30 = tpu.assume_multiple %29, 8 : i32
    %31 = arith.index_cast %30 : i32 to index
    %c0_18 = arith.constant 0 : index
    %32 = vector.load %arg8[%31, %c0_18] : memref<16x128xf32, #tpu.memory_space<vmem>>, vector<8x128xf32>
    %33 = tpu.transpose %32, [1, 0] : vector<8x128xf32> -> vector<128x8xf32>
    %34 = vector.extract_strided_slice %32 {offsets = [0, 0], sizes = [1, 128], strides = [1, 1]} : vector<8x128xf32> to vector<1x128xf32>
    %35 = vector.extract_strided_slice %33 {offsets = [0, 0], sizes = [128, 1], strides = [1, 1]} : vector<128x8xf32> to vector<128x1xf32>
    %36 = vector.broadcast %34 : vector<1x128xf32> to vector<128x128xf32>
    %37 = vector.broadcast %35 : vector<128x1xf32> to vector<128x128xf32>
    %38 = arith.subf %36, %37 : vector<128x128xf32>
    %cst_19 = arith.constant 0.000000e+00 : f32
    %39 = vector.broadcast %cst_19 : f32 to vector<128x128xf32>
    %40 = arith.maximumf %38, %39 : vector<128x128xf32>
    %41 = arith.addf %28, %40 : vector<128x128xf32>
    %42 = vector.extract_strided_slice %32 {offsets = [1, 0], sizes = [1, 128], strides = [1, 1]} : vector<8x128xf32> to vector<1x128xf32>
    %43 = vector.extract_strided_slice %33 {offsets = [0, 1], sizes = [128, 1], strides = [1, 1]} : vector<128x8xf32> to vector<128x1xf32>
    %44 = vector.broadcast %42 : vector<1x128xf32> to vector<128x128xf32>
    %45 = vector.broadcast %43 : vector<128x1xf32> to vector<128x128xf32>
    %46 = arith.subf %44, %45 : vector<128x128xf32>
    %cst_20 = arith.constant 0.000000e+00 : f32
    %47 = vector.broadcast %cst_20 : f32 to vector<128x128xf32>
    %48 = arith.maximumf %46, %47 : vector<128x128xf32>
    %49 = arith.addf %41, %48 : vector<128x128xf32>
    %50 = vector.extract_strided_slice %32 {offsets = [2, 0], sizes = [1, 128], strides = [1, 1]} : vector<8x128xf32> to vector<1x128xf32>
    %51 = vector.extract_strided_slice %33 {offsets = [0, 2], sizes = [128, 1], strides = [1, 1]} : vector<128x8xf32> to vector<128x1xf32>
    %52 = vector.broadcast %50 : vector<1x128xf32> to vector<128x128xf32>
    %53 = vector.broadcast %51 : vector<128x1xf32> to vector<128x128xf32>
    %54 = arith.subf %52, %53 : vector<128x128xf32>
    %cst_21 = arith.constant 0.000000e+00 : f32
    %55 = vector.broadcast %cst_21 : f32 to vector<128x128xf32>
    %56 = arith.maximumf %54, %55 : vector<128x128xf32>
    %57 = arith.addf %49, %56 : vector<128x128xf32>
    %58 = vector.extract_strided_slice %32 {offsets = [3, 0], sizes = [1, 128], strides = [1, 1]} : vector<8x128xf32> to vector<1x128xf32>
    %59 = vector.extract_strided_slice %33 {offsets = [0, 3], sizes = [128, 1], strides = [1, 1]} : vector<128x8xf32> to vector<128x1xf32>
    %60 = vector.broadcast %58 : vector<1x128xf32> to vector<128x128xf32>
    %61 = vector.broadcast %59 : vector<128x1xf32> to vector<128x128xf32>
    %62 = arith.subf %60, %61 : vector<128x128xf32>
    %cst_22 = arith.constant 0.000000e+00 : f32
    %63 = vector.broadcast %cst_22 : f32 to vector<128x128xf32>
    %64 = arith.maximumf %62, %63 : vector<128x128xf32>
    %65 = arith.addf %57, %64 : vector<128x128xf32>
    %66 = vector.extract_strided_slice %32 {offsets = [4, 0], sizes = [1, 128], strides = [1, 1]} : vector<8x128xf32> to vector<1x128xf32>
    %67 = vector.extract_strided_slice %33 {offsets = [0, 4], sizes = [128, 1], strides = [1, 1]} : vector<128x8xf32> to vector<128x1xf32>
    %68 = vector.broadcast %66 : vector<1x128xf32> to vector<128x128xf32>
    %69 = vector.broadcast %67 : vector<128x1xf32> to vector<128x128xf32>
    %70 = arith.subf %68, %69 : vector<128x128xf32>
    %cst_23 = arith.constant 0.000000e+00 : f32
    %71 = vector.broadcast %cst_23 : f32 to vector<128x128xf32>
    %72 = arith.maximumf %70, %71 : vector<128x128xf32>
    %73 = arith.addf %65, %72 : vector<128x128xf32>
    %74 = vector.extract_strided_slice %32 {offsets = [5, 0], sizes = [1, 128], strides = [1, 1]} : vector<8x128xf32> to vector<1x128xf32>
    %75 = vector.extract_strided_slice %33 {offsets = [0, 5], sizes = [128, 1], strides = [1, 1]} : vector<128x8xf32> to vector<128x1xf32>
    %76 = vector.broadcast %74 : vector<1x128xf32> to vector<128x128xf32>
    %77 = vector.broadcast %75 : vector<128x1xf32> to vector<128x128xf32>
    %78 = arith.subf %76, %77 : vector<128x128xf32>
    %cst_24 = arith.constant 0.000000e+00 : f32
    %79 = vector.broadcast %cst_24 : f32 to vector<128x128xf32>
    %80 = arith.maximumf %78, %79 : vector<128x128xf32>
    %81 = arith.addf %73, %80 : vector<128x128xf32>
    %82 = vector.extract_strided_slice %32 {offsets = [6, 0], sizes = [1, 128], strides = [1, 1]} : vector<8x128xf32> to vector<1x128xf32>
    %83 = vector.extract_strided_slice %33 {offsets = [0, 6], sizes = [128, 1], strides = [1, 1]} : vector<128x8xf32> to vector<128x1xf32>
    %84 = vector.broadcast %82 : vector<1x128xf32> to vector<128x128xf32>
    %85 = vector.broadcast %83 : vector<128x1xf32> to vector<128x128xf32>
    %86 = arith.subf %84, %85 : vector<128x128xf32>
    %cst_25 = arith.constant 0.000000e+00 : f32
    %87 = vector.broadcast %cst_25 : f32 to vector<128x128xf32>
    %88 = arith.maximumf %86, %87 : vector<128x128xf32>
    %89 = arith.addf %81, %88 : vector<128x128xf32>
    %90 = vector.extract_strided_slice %32 {offsets = [7, 0], sizes = [1, 128], strides = [1, 1]} : vector<8x128xf32> to vector<1x128xf32>
    %91 = vector.extract_strided_slice %33 {offsets = [0, 7], sizes = [128, 1], strides = [1, 1]} : vector<128x8xf32> to vector<128x1xf32>
    %92 = vector.broadcast %90 : vector<1x128xf32> to vector<128x128xf32>
    %93 = vector.broadcast %91 : vector<128x1xf32> to vector<128x128xf32>
    %94 = arith.subf %92, %93 : vector<128x128xf32>
    %cst_26 = arith.constant 0.000000e+00 : f32
    %95 = vector.broadcast %cst_26 : f32 to vector<128x128xf32>
    %96 = arith.maximumf %94, %95 : vector<128x128xf32>
    %97 = arith.addf %89, %96 : vector<128x128xf32>
    %c1_i32 = arith.constant 1 : i32
    %c8_i32_27 = arith.constant 8 : i32
    %98 = arith.muli %c1_i32, %c8_i32_27 : i32
    %99 = tpu.assume_multiple %98, 8 : i32
    %100 = arith.index_cast %99 : i32 to index
    %c0_28 = arith.constant 0 : index
    %101 = vector.load %arg8[%100, %c0_28] : memref<16x128xf32, #tpu.memory_space<vmem>>, vector<8x128xf32>
    %102 = tpu.transpose %101, [1, 0] : vector<8x128xf32> -> vector<128x8xf32>
    %103 = vector.extract_strided_slice %101 {offsets = [0, 0], sizes = [1, 128], strides = [1, 1]} : vector<8x128xf32> to vector<1x128xf32>
    %104 = vector.extract_strided_slice %102 {offsets = [0, 0], sizes = [128, 1], strides = [1, 1]} : vector<128x8xf32> to vector<128x1xf32>
    %105 = vector.broadcast %103 : vector<1x128xf32> to vector<128x128xf32>
    %106 = vector.broadcast %104 : vector<128x1xf32> to vector<128x128xf32>
    %107 = arith.subf %105, %106 : vector<128x128xf32>
    %cst_29 = arith.constant 0.000000e+00 : f32
    %108 = vector.broadcast %cst_29 : f32 to vector<128x128xf32>
    %109 = arith.maximumf %107, %108 : vector<128x128xf32>
    %110 = arith.addf %97, %109 : vector<128x128xf32>
    %111 = vector.extract_strided_slice %101 {offsets = [1, 0], sizes = [1, 128], strides = [1, 1]} : vector<8x128xf32> to vector<1x128xf32>
    %112 = vector.extract_strided_slice %102 {offsets = [0, 1], sizes = [128, 1], strides = [1, 1]} : vector<128x8xf32> to vector<128x1xf32>
    %113 = vector.broadcast %111 : vector<1x128xf32> to vector<128x128xf32>
    %114 = vector.broadcast %112 : vector<128x1xf32> to vector<128x128xf32>
    %115 = arith.subf %113, %114 : vector<128x128xf32>
    %cst_30 = arith.constant 0.000000e+00 : f32
    %116 = vector.broadcast %cst_30 : f32 to vector<128x128xf32>
    %117 = arith.maximumf %115, %116 : vector<128x128xf32>
    %118 = arith.addf %110, %117 : vector<128x128xf32>
    %119 = vector.extract_strided_slice %101 {offsets = [2, 0], sizes = [1, 128], strides = [1, 1]} : vector<8x128xf32> to vector<1x128xf32>
    %120 = vector.extract_strided_slice %102 {offsets = [0, 2], sizes = [128, 1], strides = [1, 1]} : vector<128x8xf32> to vector<128x1xf32>
    %121 = vector.broadcast %119 : vector<1x128xf32> to vector<128x128xf32>
    %122 = vector.broadcast %120 : vector<128x1xf32> to vector<128x128xf32>
    %123 = arith.subf %121, %122 : vector<128x128xf32>
    %cst_31 = arith.constant 0.000000e+00 : f32
    %124 = vector.broadcast %cst_31 : f32 to vector<128x128xf32>
    %125 = arith.maximumf %123, %124 : vector<128x128xf32>
    %126 = arith.addf %118, %125 : vector<128x128xf32>
    %127 = vector.extract_strided_slice %101 {offsets = [3, 0], sizes = [1, 128], strides = [1, 1]} : vector<8x128xf32> to vector<1x128xf32>
    %128 = vector.extract_strided_slice %102 {offsets = [0, 3], sizes = [128, 1], strides = [1, 1]} : vector<128x8xf32> to vector<128x1xf32>
    %129 = vector.broadcast %127 : vector<1x128xf32> to vector<128x128xf32>
    %130 = vector.broadcast %128 : vector<128x1xf32> to vector<128x128xf32>
    %131 = arith.subf %129, %130 : vector<128x128xf32>
    %cst_32 = arith.constant 0.000000e+00 : f32
    %132 = vector.broadcast %cst_32 : f32 to vector<128x128xf32>
    %133 = arith.maximumf %131, %132 : vector<128x128xf32>
    %134 = arith.addf %126, %133 : vector<128x128xf32>
    %135 = vector.extract_strided_slice %101 {offsets = [4, 0], sizes = [1, 128], strides = [1, 1]} : vector<8x128xf32> to vector<1x128xf32>
    %136 = vector.extract_strided_slice %102 {offsets = [0, 4], sizes = [128, 1], strides = [1, 1]} : vector<128x8xf32> to vector<128x1xf32>
    %137 = vector.broadcast %135 : vector<1x128xf32> to vector<128x128xf32>
    %138 = vector.broadcast %136 : vector<128x1xf32> to vector<128x128xf32>
    %139 = arith.subf %137, %138 : vector<128x128xf32>
    %cst_33 = arith.constant 0.000000e+00 : f32
    %140 = vector.broadcast %cst_33 : f32 to vector<128x128xf32>
    %141 = arith.maximumf %139, %140 : vector<128x128xf32>
    %142 = arith.addf %134, %141 : vector<128x128xf32>
    %143 = vector.extract_strided_slice %101 {offsets = [5, 0], sizes = [1, 128], strides = [1, 1]} : vector<8x128xf32> to vector<1x128xf32>
    %144 = vector.extract_strided_slice %102 {offsets = [0, 5], sizes = [128, 1], strides = [1, 1]} : vector<128x8xf32> to vector<128x1xf32>
    %145 = vector.broadcast %143 : vector<1x128xf32> to vector<128x128xf32>
    %146 = vector.broadcast %144 : vector<128x1xf32> to vector<128x128xf32>
    %147 = arith.subf %145, %146 : vector<128x128xf32>
    %cst_34 = arith.constant 0.000000e+00 : f32
    %148 = vector.broadcast %cst_34 : f32 to vector<128x128xf32>
    %149 = arith.maximumf %147, %148 : vector<128x128xf32>
    %150 = arith.addf %142, %149 : vector<128x128xf32>
    %151 = vector.extract_strided_slice %101 {offsets = [6, 0], sizes = [1, 128], strides = [1, 1]} : vector<8x128xf32> to vector<1x128xf32>
    %152 = vector.extract_strided_slice %102 {offsets = [0, 6], sizes = [128, 1], strides = [1, 1]} : vector<128x8xf32> to vector<128x1xf32>
    %153 = vector.broadcast %151 : vector<1x128xf32> to vector<128x128xf32>
    %154 = vector.broadcast %152 : vector<128x1xf32> to vector<128x128xf32>
    %155 = arith.subf %153, %154 : vector<128x128xf32>
    %cst_35 = arith.constant 0.000000e+00 : f32
    %156 = vector.broadcast %cst_35 : f32 to vector<128x128xf32>
    %157 = arith.maximumf %155, %156 : vector<128x128xf32>
    %158 = arith.addf %150, %157 : vector<128x128xf32>
    %159 = vector.extract_strided_slice %101 {offsets = [7, 0], sizes = [1, 128], strides = [1, 1]} : vector<8x128xf32> to vector<1x128xf32>
    %160 = vector.extract_strided_slice %102 {offsets = [0, 7], sizes = [128, 1], strides = [1, 1]} : vector<128x8xf32> to vector<128x1xf32>
    %161 = vector.broadcast %159 : vector<1x128xf32> to vector<128x128xf32>
    %162 = vector.broadcast %160 : vector<128x1xf32> to vector<128x128xf32>
    %163 = arith.subf %161, %162 : vector<128x128xf32>
    %cst_36 = arith.constant 0.000000e+00 : f32
    %164 = vector.broadcast %cst_36 : f32 to vector<128x128xf32>
    %165 = arith.maximumf %163, %164 : vector<128x128xf32>
    %166 = arith.addf %158, %165 : vector<128x128xf32>
    %c2_i32 = arith.constant 2 : i32
    %c0_37 = arith.constant 0 : index
    %c0_38 = arith.constant 0 : index
    %167 = vector.load %arg9[%c0_37, %c0_38] : memref<128x128xf32, #tpu.memory_space<vmem>>, vector<128x128xf32>
    tpu.vector_store %arg9[%c0_37, %c0_38], %166 {strides = array<i32>} : memref<128x128xf32, #tpu.memory_space<vmem>>, vector<128x128xf32>,
    %c0_i32_39 = arith.constant 0 : i32
    %168 = arith.cmpi eq, %arg1, %c0_i32_39 : i32
    %169 = arith.extui %168 : i1 to i32
    %c0_i32_40 = arith.constant 0 : i32
    %170 = arith.cmpi ne, %169, %c0_i32_40 : i32
    scf.if %170 {
      %c0_41 = arith.constant 0 : index
      %c0_42 = arith.constant 0 : index
      %171 = vector.load %arg4[%c0_41, %c0_42] : memref<1x128xf32, #tpu.memory_space<vmem>>, vector<1x128xf32>
      %c0_43 = arith.constant 0 : index
      %c0_44 = arith.constant 0 : index
      %172 = vector.load %arg7[%c0_43, %c0_44] : memref<8x128xf32, #tpu.memory_space<vmem>>, vector<8x128xf32>
      %173 = vector.broadcast %171 : vector<1x128xf32> to vector<8x128xf32>
      %174 = arith.mulf %172, %173 : vector<8x128xf32>
      %175 = vector.shape_cast %174 : vector<8x128xf32> to vector<1x8x128xf32>
      %cst_45 = arith.constant dense<0.000000e+00> : vector<1xf32>
      %176 = vector.multi_reduction <add>, %175, %cst_45 [1, 2] : vector<1x8x128xf32> to vector<1xf32>
      %177 = vector.shape_cast %176 : vector<1xf32> to vector<1x1x1xf32>
      %178 = vector.extract %177[0, 0, 0] : f32 from vector<1x1x1xf32>
      %cst_46 = arith.constant 2.048000e+03 : f32
      %179 = arith.divf %178, %cst_46 : f32
      tpu.wait_dma2 semaphore(%arg11 : memref<!tpu.dma_semaphore, #tpu.memory_space<semaphore_mem>>) src(%arg5 : memref<128x128xf32, #tpu.memory_space<any>>) dst(%arg10 : memref<128x128xf32, #tpu.memory_space<vmem>>)
      %c0_47 = arith.constant 0 : index
      %c0_48 = arith.constant 0 : index
      %180 = vector.load %arg9[%c0_47, %c0_48] : memref<128x128xf32, #tpu.memory_space<vmem>>, vector<128x128xf32>
      %c0_49 = arith.constant 0 : index
      %c0_50 = arith.constant 0 : index
      %181 = vector.load %arg10[%c0_49, %c0_50] : memref<128x128xf32, #tpu.memory_space<vmem>>, vector<128x128xf32>
      %182 = arith.mulf %180, %181 : vector<128x128xf32>
      %183 = vector.shape_cast %182 : vector<128x128xf32> to vector<1x128x128xf32>
      %cst_51 = arith.constant dense<0.000000e+00> : vector<1xf32>
      %184 = vector.multi_reduction <add>, %183, %cst_51 [1, 2] : vector<1x128x128xf32> to vector<1xf32>
      %185 = vector.shape_cast %184 : vector<1xf32> to vector<1x1x1xf32>
      %186 = vector.extract %185[0, 0, 0] : f32 from vector<1x1x1xf32>
      %cst_52 = arith.constant 1.600000e+01 : f32
      %187 = arith.divf %186, %cst_52 : f32
      %cst_53 = arith.constant 1.000000e-01 : f32
      %188 = arith.mulf %cst_53, %187 : f32
      %189 = arith.addf %179, %188 : f32
      %190 = vector.broadcast %189 : f32 to vector<8x128xf32>
      %c0_54 = arith.constant 0 : index
      %c0_55 = arith.constant 0 : index
      %191 = vector.load %arg6[%c0_54, %c0_55] : memref<8x128xf32, #tpu.memory_space<vmem>>, vector<8x128xf32>
      tpu.vector_store %arg6[%c0_54, %c0_55], %190 {strides = array<i32>} : memref<8x128xf32, #tpu.memory_space<vmem>>, vector<8x128xf32>,
    } else {
    }
    return
  }
  func.func @transform_0(%arg0: i32, %arg1: i32) -> (i32, i32) {
    %c1_i32 = arith.constant 1 : i32
    %0 = arith.muli %arg0, %c1_i32 : i32
    %1 = arith.addi %0, %arg1 : i32
    %c0_i32 = arith.constant 0 : i32
    %c0_i32_0 = arith.constant 0 : i32
    return %1, %c0_i32 : i32, i32
  }
  func.func @transform_1(%arg0: i32, %arg1: i32) -> (i32, i32) {
    %c1_i32 = arith.constant 1 : i32
    %0 = arith.muli %arg0, %c1_i32 : i32
    %1 = arith.addi %0, %arg1 : i32
    %c0_i32 = arith.constant 0 : i32
    %c0_i32_0 = arith.constant 0 : i32
    return %1, %c0_i32 : i32, i32
  }
  func.func @transform_2(%arg0: i32, %arg1: i32) -> (i32, i32) {
    %c0_i32 = arith.constant 0 : i32
    %c0_i32_0 = arith.constant 0 : i32
    %c0_i32_1 = arith.constant 0 : i32
    return %c0_i32, %c0_i32_0 : i32, i32
  }
  func.func @transform_4(%arg0: i32, %arg1: i32) -> (i32, i32) {
    %c0_i32 = arith.constant 0 : i32
    %c0_i32_0 = arith.constant 0 : i32
    return %arg0, %c0_i32 : i32, i32
  }
}

</mosaic_0001>

<bundles_post_ra>
// kernel: tpu_custom_call.1
= control target key start
LH: loop header
LB: loop body
LE: loop exit
PB: predicated region body
PF: predicated region fallthrough
CT: control target
= control target key end

     0   :  { %9 = vsyncpa [#allocation8], 0  ;;  %s4270_s0 = inlined_call_operand.hbm [shape: f32[16,128], index: 0, kind: input, shape index: {}]   ;;  %s4271_s1 = inlined_call_operand.hbm [shape: f32[16,128], index: 1, kind: input, shape index: {}]   ;;  %s4272_s2 = inlined_call_operand.vmem [shape: f32[1,128], index: 2, kind: input, shape index: {}]   ;;  %s4273_s3 = inlined_call_operand.hbm [shape: f32[128,128], index: 3, kind: input, shape index: {}]   ;;  %s4274_s4 = inlined_call_operand.hbm [shape: f32[8,128], index: 4, kind: output, shape index: {}]  }
   0x1   :  { %10 = vsyncpa [#allocation11], 0 }
   0x2   :  { %11 = vsyncpa [#allocation9], 0  ;;  %s2440_s15 = smov [#allocation7]   ;;  %s2344_s19 = scalar_lea.hbm %s4270_s0, 256 }
   0x3   :  { %s21_s16 = sshll.u32 %s2440_s15, 4  ;;  %p2345_p0 = scmp.ne.s32.totalorder %s4270_s0, %s2344_s19  ;;  %s22_s16 = int_to_ptr.vmem [resolvable:$true] %s21_s16 }
   0x4   :  { %p2348_p1 = scmp.lt.u32.totalorder %s2344_s19, %s4270_s0 }
   0x6   :  { %p2350_p2 = pnand %p2348_p1, %p2345_p0 }
   0x8   :  { %2353 = shalt.err (!%p2350_p2)
}
   0x9   :  { %s2354_s24 = scalar_lea.vmem %s22_s16, 256  ;;  %p2359_p4 = scmp.lt.s32.totalorder %s22_s16, %s22_s16 }
   0xa   :  { %p2355_p3 = scmp.ne.s32.totalorder %s22_s16, %s2354_s24  ;;  %p2360_p5 = scmp.lt.s32.totalorder %s2354_s24, %s2354_s24 }
   0xc   :  { %p2361_p6 = por %p2360_p5, %p2359_p4 }
   0xe   :  { %p2362_p7 = pnand %p2361_p6, %p2355_p3 }
  0x10   :  { %2365 = shalt.err (!%p2362_p7)
}
  0x11   :  { %s2441_s25 = smov 128   ;;  %s2442_s26 = smov 8  }
  0x12   :  { %27 = dma.hbm_to_vmem [thread:$0]  %s4270_s0, 256, %s22_s16, [#allocation8], %s2441_s25, %s2441_s25, %s2442_s26  }
  0x13   :  { %s2443_s29 = smov [#allocation10]   ;;  %s2366_s7 = scalar_lea.hbm %s4271_s1, 256 }
  0x14   :  { %s37_s30 = sshll.u32 %s2443_s29, 4  ;;  %p2367_p8 = scmp.ne.s32.totalorder %s4271_s1, %s2366_s7  ;;  %s38_s30 = int_to_ptr.vmem [resolvable:$true] %s37_s30 }
  0x15   :  { %p2370_p9 = scmp.lt.u32.totalorder %s2366_s7, %s4271_s1 }
  0x17   :  { %p2372_p10 = pnand %p2370_p9, %p2367_p8 }
  0x19   :  { %2375 = shalt.err (!%p2372_p10)
}
  0x1a   :  { %s2376_s12 = scalar_lea.vmem %s38_s30, 256  ;;  %p2381_p12 = scmp.lt.s32.totalorder %s38_s30, %s38_s30 }
  0x1b   :  { %p2377_p11 = scmp.ne.s32.totalorder %s38_s30, %s2376_s12  ;;  %p2382_p13 = scmp.lt.s32.totalorder %s2376_s12, %s2376_s12 }
  0x1d   :  { %p2383_p0 = por %p2382_p13, %p2381_p12 }
  0x1f   :  { %p2384_p1 = pnand %p2383_p0, %p2377_p11 }
  0x21   :  { %2387 = shalt.err (!%p2384_p1)
}
  0x22   :  { %43 = dma.hbm_to_vmem [thread:$0]  %s4271_s1, 256, %s38_s30, [#allocation11], %s2441_s25, %s2441_s25, %s2442_s26  }
  0x23   :  { %2432 = dma.done.wait [#allocation8], 256  }
  0x24   :  { %2433 = vsyncadd [#allocation8], 4294967040 }
  0x25   :  { %2434 = dma.done.wait [#allocation11], 256  }
  0x26   :  { %2435 = vsyncadd [#allocation11], 4294967040  ;;  %v88_v0 = vld [vmem:[#allocation7] sm:$0xff]  ;;  %v89_v1 = vld [vmem:[#allocation7 + $0x8] sm:$0xff]  ;;  %v2444_v18 = vmov 1   ;;  %v4276_v19 = vmov 0  }
  0x27   :  { %v92_v2 = vand.u32 2147483647, %v88_v0  ;;  %v93_v3 = vand.u32 2147483647, %v89_v1  ;;  %vm130_vm0 = vcmp.ge.f32.partialorder %v88_v0, 0.0  ;;  %vm131_vm1 = vcmp.ge.f32.partialorder %v89_v1, 0.0 }
  0x28   :  { %v4275_v24 = vmov 2   ;;  %s2388_s18 = scalar_lea.hbm %s4273_s3, 2048 }
  0x29   :  { %v94_v4 = vsub.f32 0.0, %v92_v2  ;;  %v95_v5 = vsub.f32 0.0, %v93_v3  ;;  %p2389_p2 = scmp.ne.s32.totalorder %s4273_s3, %s2388_s18  ;;  %p2392_p3 = scmp.lt.u32.totalorder %s2388_s18, %s4273_s3 }
  0x2b   :  { %v96_v6 = vmul.f32 1.442695, %v94_v4  ;;  %v98_v7 = vmul.f32 1.442695, %v95_v5  ;;  %p2394_p4 = pnand %p2392_p3, %p2389_p2 }
  0x2d   :  { %2330 = vpow2.f32 %v96_v6 }
  0x2e   :  { %2332 = vpow2.f32 %v98_v7 }
  0x37   :  { %v2503_v8 = vpop.eup %2330 }
  0x38   :  { %4359 = vst [vmem:[#allocation21_spill] sm:$0xff] %v2503_v8  ;;  %v2505_v9 = vpop.eup %2332  ;;  %v2508_v10 = vadd.f32 1.0, %v2503_v8  ;;  %v132_v12 = vsel %vm130_vm0, 1.0, %v2503_v8 }
  0x39   :  { %4360 = vst [vmem:[#allocation22_spill] sm:$0xff] %v2505_v9  ;;  %v2511_v11 = vadd.f32 1.0, %v2505_v9  ;;  %v133_v13 = vsel %vm131_vm1, 1.0, %v2505_v9 }
  0x3a   :  { %2334 = vrcp.f32 %v2508_v10 }
  0x3b   :  { %4361 = vst [vmem:[#allocation23_spill] sm:$0xff] %v2511_v11  ;;  %2336 = vrcp.f32 %v2511_v11  ;;  %v4452_v11 = vmov 0  }
  0x3c   :  { %2338 = vlog2.f32 %v2508_v10 }
  0x44   :  { %v2335_v14 = vpop.eup %2334 }
  0x45   :  { %v2337_v15 = vpop.eup %2336  ;;  %v2517_v16 = vmul.f32 %v2335_v14, %v132_v12 }
  0x46   :  { %v2519_v17 = vmul.f32 %v2337_v15, %v133_v13 }
  0x47   :  { %159 = vxpose.xlu0.b32.start.end [1/1] (short) %v2517_v16, 128 }
  0x48   :  { %4362 = vst [vmem:[#allocation24_spill] sm:$0xff] %v2519_v17  ;;  %1137 = vxpose.xlu1.b32.start.end [1/1] (short) %v2519_v17, 128 }
  0x66   :  { %2279 = vset.pattern.permute.xlu1 %v2444_v18 }
  0x70   :  { %2278 = vset.pattern.permute.xlu0 %v4276_v19 }
  0xc7   :  { %v2525_v20 = vpop.trf.xlu0 }
  0xc8   :  { %v2527_v21 = vpop.trf.xlu1  ;;  %328 = vperm.xlu1 %2279, %v2525_v20   ;;  %197 = vperm.xlu0 %2278, %v2525_v20  }
  0xc9   :  { %4363 = vst [vmem:[#allocation25_spill] sm:$0xff] %v2527_v21 }
  0xcb   :  { %v2531_v22 = vpop.trf.xlu0 }
  0xcc   :  { %v2533_v23 = vpop.trf.xlu1  ;;  %2280 = vset.pattern.permute.xlu1 %v4275_v24  ;;  %1175 = vperm.xlu0 %2278, %v2527_v21  }
  0xcd   :  { %4364 = vst [vmem:[#allocation26_spill] sm:$0xff] %v2533_v23  ;;  %444 = vperm.xlu1 %2280, %v2525_v20  }
  0xcf   :  { %v2538_v25 = vpop.trf.xlu0 }
  0xd0   :  { %4365 = vst [vmem:[#allocation27_spill] sm:$0xff] %v2538_v25  ;;  %v2540_v26 = vpop.trf.xlu1  ;;  %1180 = vperm.xlu0 %2278, %v2533_v23  }
  0xd1   :  { %4366 = vst [vmem:[#allocation28_spill] sm:$0xff] %v2540_v26  ;;  %2281 = vset.pattern.permute.xlu1 %v4276_v19 }
  0xd2   :  { %202 = vperm.xlu1 %2281, %v2531_v22  }
  0xd3   :  { %v2545_v27 = vpop.trf.xlu0 }
  0xd4   :  { %4367 = vst [vmem:[#allocation29_spill] sm:$0xff] %v2545_v27  ;;  %v2547_v28 = vpop.trf.xlu1  ;;  %1185 = vperm.xlu0 %2278, %v2540_v26  }
  0xd6   :  { %2282 = vset.pattern.permute.xlu1 %v2444_v18 }
  0xd7   :  { %332 = vperm.xlu1 %2282, %v2531_v22   ;;  %v2552_v29 = vpop.trf.xlu0 }
  0xd8   :  { %v2554_v30 = vpop.trf.xlu1  ;;  %1190 = vperm.xlu0 %2278, %v2547_v28  }
  0xd9   :  { %4368 = vst [vmem:[#allocation30_spill] sm:$0xff] %v2554_v30 }
  0xdb   :  { %2283 = vset.pattern.permute.xlu1 %v4276_v19  ;;  %v2558_v31 = vpop.trf.xlu0 }
  0xdc   :  { %4369 = vst [vmem:[#allocation31_spill] sm:$0xff] %v2558_v31  ;;  %v2560_v32 = vpop.trf.xlu1  ;;  %1195 = vperm.xlu0 %2278, %v2554_v30   ;;  %207 = vperm.xlu1 %2283, %v2538_v25  }
  0xdd   :  { %4370 = vst [vmem:[#allocation32_spill] sm:$0xff] %v2560_v32 }
  0xdf   :  { %v2564_v33 = vpop.trf.xlu0 }
  0xe0   :  { %v2566_v34 = vpop.trf.xlu1  ;;  %1200 = vperm.xlu0 %2278, %v2560_v32   ;;  %2284 = vset.pattern.permute.xlu1 %v2444_v18 }
  0xe1   :  { %4371 = vst [vmem:[#allocation33_spill] sm:$0xff] %v2566_v34  ;;  %336 = vperm.xlu1 %2284, %v2538_v25  }
  0xe3   :  { %v2571_v35 = vpop.trf.xlu0 }
  0xe4   :  { %4372 = vst [vmem:[#allocation34_spill] sm:$0xff] %v2571_v35  ;;  %v2573_v36 = vpop.trf.xlu1  ;;  %1205 = vperm.xlu0 %2278, %v2566_v34  }
  0xe5   :  { %4373 = vst [vmem:[#allocation35_spill] sm:$0xff] %v2573_v36  ;;  %2285 = vset.pattern.permute.xlu1 %v4275_v24 }
  0xe6   :  { %452 = vperm.xlu1 %2285, %v2538_v25  }
  0xe7   :  { %v2578_v37 = vpop.trf.xlu0 }
  0xe8   :  { %v2580_v38 = vpop.trf.xlu1  ;;  %1210 = vperm.xlu0 %2278, %v2573_v36  }
  0xe9   :  { %4374 = vst [vmem:[#allocation36_spill] sm:$0xff] %v2580_v38 }
  0xea   :  { %2286 = vset.pattern.permute.xlu1 %v4276_v19 }
  0xeb   :  { %212 = vperm.xlu1 %2286, %v2545_v27   ;;  %v2585_v39 = vpop.trf.xlu0 }
  0xec   :  { %4375 = vst [vmem:[#allocation37_spill] sm:$0xff] %v2585_v39  ;;  %v2587_v40 = vpop.trf.xlu1  ;;  %1215 = vperm.xlu0 %2278, %v2580_v38  }
  0xed   :  { %4376 = vst [vmem:[#allocation38_spill] sm:$0xff] %v2587_v40 }
  0xef   :  { %2287 = vset.pattern.permute.xlu1 %v2444_v18  ;;  %v2591_v41 = vpop.trf.xlu0 }
  0xf0   :  { %v2593_v42 = vpop.trf.xlu1  ;;  %1220 = vperm.xlu0 %2278, %v2587_v40   ;;  %340 = vperm.xlu1 %2287, %v2545_v27  }
  0xf1   :  { %4377 = vst [vmem:[#allocation39_spill] sm:$0xff] %v2593_v42 }
  0xf3   :  { %v2597_v43 = vpop.trf.xlu0 }
  0xf4   :  { %4378 = vst [vmem:[#allocation40_spill] sm:$0xff] %v2597_v43  ;;  %v2599_v44 = vpop.trf.xlu1  ;;  %2288 = vset.pattern.permute.xlu1 %v4275_v24 }
  0xf5   :  { %1230 = vperm.xlu0 %2278, %v2599_v44   ;;  %456 = vperm.xlu1 %2288, %v2545_v27  }
  0xf7   :  { %v2608_v46 = vpop.trf.xlu0 }
  0xf8   :  { %v2604_v45 = vpop.trf.xlu1 }
  0xf9   :  { %4379 = vst [vmem:[#allocation41_spill] sm:$0xff] %v2604_v45  ;;  %1235 = vperm.xlu0 %2278, %v2604_v45   ;;  %2289 = vset.pattern.permute.xlu1 %v4276_v19 }
  0xfa   :  { %217 = vperm.xlu1 %2289, %v2552_v29  }
  0xfb   :  { %v2616_v48 = vpop.trf.xlu0 }
  0xfc   :  { %v2611_v47 = vpop.trf.xlu1  ;;  %4380 = vst [vmem:[#allocation42_spill] sm:$0xff] %v2616_v48 }
  0xfd   :  { %1240 = vperm.xlu0 %2278, %v2611_v47  }
  0xfe   :  { %2290 = vset.pattern.permute.xlu1 %v2444_v18 }
  0xff   :  { %344 = vperm.xlu1 %2290, %v2552_v29   ;;  %v2626_v51 = vpop.trf.xlu0 }
 0x100   :  { %v2618_v49 = vpop.trf.xlu1 }
 0x101   :  { %4381 = vst [vmem:[#allocation43_spill] sm:$0xff] %v2618_v49  ;;  %1245 = vperm.xlu0 %2278, %v2618_v49  }
 0x103   :  { %2291 = vset.pattern.permute.xlu1 %v4276_v19  ;;  %v2632_v52 = vpop.trf.xlu0 }
 0x104   :  { %v2622_v50 = vpop.trf.xlu1  ;;  %222 = vperm.xlu1 %2291, %v2558_v31   ;;  %4382 = vst [vmem:[#allocation44_spill] sm:$0xff] %v2632_v52 }
 0x105   :  { %1250 = vperm.xlu0 %2278, %v2622_v50  }
 0x108   :  { %2292 = vset.pattern.permute.xlu1 %v2444_v18 }
 0x109   :  { %2317 = vset.pattern.permute.xlu0 %v2444_v18  ;;  %348 = vperm.xlu1 %2292, %v2558_v31  }
 0x10a   :  { %376 = vperm.xlu0 %2317, %v2608_v46  }
 0x10d   :  { %2293 = vset.pattern.permute.xlu1 %v4275_v24 }
 0x10e   :  { %388 = vperm.xlu0 %2317, %v2632_v52   ;;  %464 = vperm.xlu1 %2293, %v2558_v31  }
 0x112   :  { %1306 = vperm.xlu0 %2317, %v2527_v21   ;;  %2294 = vset.pattern.permute.xlu1 %v4276_v19 }
 0x113   :  { %227 = vperm.xlu1 %2294, %v2564_v33  }
 0x116   :  { %1310 = vperm.xlu0 %2317, %v2533_v23  }
 0x117   :  { %2295 = vset.pattern.permute.xlu1 %v2444_v18 }
 0x118   :  { %352 = vperm.xlu1 %2295, %v2564_v33  }
 0x11a   :  { %1314 = vperm.xlu0 %2317, %v2540_v26  }
 0x11c   :  { %2296 = vset.pattern.permute.xlu1 %v4276_v19 }
 0x11d   :  { %232 = vperm.xlu1 %2296, %v2571_v35  }
 0x11e   :  { %1318 = vperm.xlu0 %2317, %v2547_v28  }
 0x121   :  { %2297 = vset.pattern.permute.xlu1 %v2444_v18 }
 0x122   :  { %1322 = vperm.xlu0 %2317, %v2554_v30   ;;  %356 = vperm.xlu1 %2297, %v2571_v35  }
 0x126   :  { %1326 = vperm.xlu0 %2317, %v2560_v32   ;;  %2298 = vset.pattern.permute.xlu1 %v4276_v19 }
 0x127   :  { %237 = vperm.xlu1 %2298, %v2578_v37  }
 0x12a   :  { %1330 = vperm.xlu0 %2317, %v2566_v34  }
 0x12b   :  { %2299 = vset.pattern.permute.xlu1 %v2444_v18 }
 0x12c   :  { %360 = vperm.xlu1 %2299, %v2578_v37  }
 0x12e   :  { %1334 = vperm.xlu0 %2317, %v2573_v36  }
 0x130   :  { %2300 = vset.pattern.permute.xlu1 %v4276_v19 }
 0x131   :  { %242 = vperm.xlu1 %2300, %v2585_v39  }
 0x132   :  { %1338 = vperm.xlu0 %2317, %v2580_v38  }
 0x135   :  { %2301 = vset.pattern.permute.xlu1 %v2444_v18 }
 0x136   :  { %1342 = vperm.xlu0 %2317, %v2587_v40   ;;  %364 = vperm.xlu1 %2301, %v2585_v39  }
 0x13a   :  { %1346 = vperm.xlu0 %2317, %v2593_v42   ;;  %2302 = vset.pattern.permute.xlu1 %v4276_v19 }
 0x13b   :  { %247 = vperm.xlu1 %2302, %v2591_v41  }
 0x13e   :  { %1350 = vperm.xlu0 %2317, %v2599_v44  }
 0x13f   :  { %2303 = vset.pattern.permute.xlu1 %v2444_v18 }
 0x140   :  { %368 = vperm.xlu1 %2303, %v2591_v41  }
 0x142   :  { %1354 = vperm.xlu0 %2317, %v2604_v45  }
 0x144   :  { %2304 = vset.pattern.permute.xlu1 %v4276_v19 }
 0x145   :  { %252 = vperm.xlu1 %2304, %v2597_v43  }
 0x146   :  { %1358 = vperm.xlu0 %2317, %v2611_v47  }
 0x147   :  { %v2673_v53 = vpop.permute.xlu1 %328  ;;  %v2675_v54 = vpop.permute.xlu0 %197 }
 0x148   :  { %4383 = vst [vmem:[#allocation45_spill] sm:$0xff] %v2673_v53  ;;  %4384 = vst [vmem:[#allocation46_spill] sm:$0xff] %v2675_v54 }
 0x149   :  { %2305 = vset.pattern.permute.xlu1 %v2444_v18 }
 0x14a   :  { %1362 = vperm.xlu0 %2317, %v2618_v49   ;;  %372 = vperm.xlu1 %2305, %v2597_v43  }
 0x14b   :  { %v2680_v55 = vpop.permute.xlu0 %1175 }
 0x14c   :  { %4385 = vst [vmem:[#allocation47_spill] sm:$0xff] %v2680_v55  ;;  %v2682_v56 = vpop.permute.xlu1 %444 }
 0x14d   :  { %4386 = vst [vmem:[#allocation48_spill] sm:$0xff] %v2682_v56 }
 0x14e   :  { %1366 = vperm.xlu0 %2317, %v2622_v50   ;;  %2306 = vset.pattern.permute.xlu1 %v4276_v19 }
 0x14f   :  { %257 = vperm.xlu1 %2306, %v2608_v46   ;;  %v2687_v57 = vpop.permute.xlu0 %1180 }
 0x151   :  { %v2689_v58 = vpop.permute.xlu1 %202 }
 0x152   :  { %2318 = vset.pattern.permute.xlu0 %v4275_v24 }
 0x153   :  { %448 = vperm.xlu0 %2318, %v2531_v22   ;;  %262 = vperm.xlu1 %2306, %v2616_v48   ;;  %v2694_v59 = vpop.permute.xlu0 %1185 }
 0x154   :  { %4387 = vst [vmem:[#allocation49_spill] sm:$0xff] %v2694_v59 }
 0x156   :  { %v2696_v60 = vpop.permute.xlu1 %332 }
 0x157   :  { %460 = vperm.xlu0 %2318, %v2552_v29   ;;  %2307 = vset.pattern.permute.xlu1 %v2444_v18  ;;  %v2700_v61 = vpop.permute.xlu0 %1190 }
 0x158   :  { %4388 = vst [vmem:[#allocation50_spill] sm:$0xff] %v2700_v61  ;;  %380 = vperm.xlu1 %2307, %v2616_v48  }
 0x15b   :  { %468 = vperm.xlu0 %2318, %v2564_v33   ;;  %v2704_v62 = vpop.permute.xlu1 %207  ;;  %v2706_v63 = vpop.permute.xlu0 %1195 }
 0x15c   :  { %4389 = vst [vmem:[#allocation51_spill] sm:$0xff] %v2704_v62  ;;  %2308 = vset.pattern.permute.xlu1 %v4276_v19  ;;  %v4278_v62 = vmov 4  }
 0x15d   :  { %267 = vperm.xlu1 %2308, %v2626_v51  }
 0x15f   :  { %476 = vperm.xlu0 %2318, %v2578_v37   ;;  %v2711_v0 = vpop.permute.xlu0 %1200 }
 0x160   :  { %4390 = vst [vmem:[#allocation52_spill] sm:$0xff] %v2711_v0  ;;  %v2713_v1 = vpop.permute.xlu1 %336 }
 0x161   :  { %4391 = vst [vmem:[#allocation53_spill] sm:$0xff] %v2713_v1  ;;  %2309 = vset.pattern.permute.xlu1 %v2444_v18 }
 0x162   :  { %384 = vperm.xlu1 %2309, %v2626_v51  }
 0x163   :  { %484 = vperm.xlu0 %2318, %v2591_v41   ;;  %v2718_v2 = vpop.permute.xlu0 %1205 }
 0x165   :  { %v2720_v3 = vpop.permute.xlu1 %452 }
 0x166   :  { %4392 = vst [vmem:[#allocation54_spill] sm:$0xff] %v2720_v3  ;;  %2310 = vset.pattern.permute.xlu1 %v4276_v19 }
 0x167   :  { %492 = vperm.xlu0 %2318, %v2608_v46   ;;  %272 = vperm.xlu1 %2310, %v2632_v52   ;;  %v2725_v4 = vpop.permute.xlu0 %1210 }
 0x168   :  { %4393 = vst [vmem:[#allocation55_spill] sm:$0xff] %v2725_v4 }
 0x16a   :  { %v2727_v5 = vpop.permute.xlu1 %212 }
 0x16b   :  { %4394 = vst [vmem:[#allocation56_spill] sm:$0xff] %v2727_v5  ;;  %500 = vperm.xlu0 %2318, %v2626_v51   ;;  %2311 = vset.pattern.permute.xlu1 %v4275_v24  ;;  %v2731_v6 = vpop.permute.xlu0 %1215 }
 0x16c   :  { %472 = vperm.xlu1 %2311, %v2571_v35  }
 0x16f   :  { %1426 = vperm.xlu0 %2318, %v2533_v23   ;;  %v2735_v7 = vpop.permute.xlu1 %340  ;;  %v2737_v12 = vpop.permute.xlu0 %1220 }
 0x170   :  { %4395 = vst [vmem:[#allocation57_spill] sm:$0xff] %v2735_v7  ;;  %4396 = vst [vmem:[#allocation58_spill] sm:$0xff] %v2737_v12  ;;  %480 = vperm.xlu1 %2311, %v2585_v39   ;;  %v4277_v12 = vmov 3  }
 0x173   :  { %1438 = vperm.xlu0 %2318, %v2554_v30  }
 0x174   :  { %v2741_v13 = vpop.permute.xlu1 %456  ;;  %488 = vperm.xlu1 %2311, %v2597_v43   ;;  %v2744_v14 = vpop.permute.xlu0 %1230 }
 0x175   :  { %4397 = vst [vmem:[#allocation59_spill] sm:$0xff] %v2741_v13  ;;  %4398 = vst [vmem:[#allocation60_spill] sm:$0xff] %v2744_v14 }
 0x177   :  { %1446 = vperm.xlu0 %2318, %v2566_v34  }
 0x178   :  { %496 = vperm.xlu1 %2311, %v2616_v48   ;;  %v2748_v15 = vpop.permute.xlu0 %1235 }
 0x179   :  { %v2750_v18 = vpop.permute.xlu1 %217 }
 0x17a   :  { %4399 = vst [vmem:[#allocation61_spill] sm:$0xff] %v2750_v18 }
 0x17b   :  { %1454 = vperm.xlu0 %2318, %v2580_v38  }
 0x17c   :  { %504 = vperm.xlu1 %2311, %v2632_v52   ;;  %v2754_v24 = vpop.permute.xlu0 %1240 }
 0x17d   :  { %4400 = vst [vmem:[#allocation62_spill] sm:$0xff] %v2754_v24 }
 0x17e   :  { %v2756_v19 = vpop.permute.xlu1 %344 }
 0x17f   :  { %4401 = vst [vmem:[#allocation63_spill] sm:$0xff] %v2756_v19  ;;  %1462 = vperm.xlu0 %2318, %v2593_v42  }
 0x180   :  { %2312 = vset.pattern.permute.xlu1 %v4277_v12  ;;  %v2760_v14 = vpop.permute.xlu0 %1245 }
 0x181   :  { %4402 = vst [vmem:[#allocation64_spill] sm:$0xff] %v2760_v14  ;;  %564 = vperm.xlu1 %2312, %v2531_v22  }
 0x183   :  { %1470 = vperm.xlu0 %2318, %v2604_v45   ;;  %v2764_v4 = vpop.permute.xlu1 %222 }
 0x184   :  { %4403 = vst [vmem:[#allocation65_spill] sm:$0xff] %v2764_v4  ;;  %v2766_v0 = vpop.permute.xlu0 %1250 }
 0x185   :  { %4404 = vst [vmem:[#allocation66_spill] sm:$0xff] %v2766_v0  ;;  %568 = vperm.xlu1 %2312, %v2538_v25  }
 0x187   :  { %1478 = vperm.xlu0 %2318, %v2618_v49  }
 0x188   :  { %v2770_v24 = vpop.permute.xlu1 %348 }
 0x189   :  { %4405 = vst [vmem:[#allocation67_spill] sm:$0xff] %v2770_v24  ;;  %v2772_v61 = vpop.permute.xlu0 %376  ;;  %576 = vperm.xlu1 %2312, %v2552_v29  }
 0x18a   :  { %4406 = vst [vmem:[#allocation68_spill] sm:$0xff] %v2772_v61 }
 0x18b   :  { %2320 = vset.pattern.permute.xlu0 %v4277_v12 }
 0x18c   :  { %560 = vperm.xlu0 %2320, %v2525_v20  }
 0x18d   :  { %v2777_v59 = vpop.permute.xlu0 %388  ;;  %v2779_v13 = vpop.permute.xlu1 %464  ;;  %584 = vperm.xlu1 %2312, %v2564_v33  }
 0x18e   :  { %4407 = vst [vmem:[#allocation69_spill] sm:$0xff] %v2779_v13 }
 0x190   :  { %572 = vperm.xlu0 %2320, %v2545_v27  }
 0x191   :  { %v2783_v0 = vpop.permute.xlu0 %1306  ;;  %592 = vperm.xlu1 %2312, %v2578_v37  }
 0x192   :  { %4408 = vst [vmem:[#allocation70_spill] sm:$0xff] %v2783_v0  ;;  %v2786_v4 = vpop.permute.xlu1 %227 }
 0x193   :  { %4409 = vst [vmem:[#allocation71_spill] sm:$0xff] %v2786_v4 }
 0x194   :  { %580 = vperm.xlu0 %2320, %v2558_v31  }
 0x195   :  { %v2789_v24 = vpop.permute.xlu0 %1310  ;;  %600 = vperm.xlu1 %2312, %v2591_v41  }
 0x196   :  { %4410 = vst [vmem:[#allocation72_spill] sm:$0xff] %v2789_v24 }
 0x197   :  { %v2792_v12 = vpop.permute.xlu1 %352 }
 0x198   :  { %4411 = vst [vmem:[#allocation73_spill] sm:$0xff] %v2792_v12  ;;  %588 = vperm.xlu0 %2320, %v2571_v35  }
 0x199   :  { %v2795_v13 = vpop.permute.xlu0 %1314  ;;  %608 = vperm.xlu1 %2312, %v2608_v46  }
 0x19a   :  { %4412 = vst [vmem:[#allocation74_spill] sm:$0xff] %v2795_v13 }
 0x19c   :  { %596 = vperm.xlu0 %2320, %v2585_v39   ;;  %v2799_v0 = vpop.permute.xlu1 %232 }
 0x19d   :  { %v2801_v5 = vpop.permute.xlu0 %1318  ;;  %616 = vperm.xlu1 %2312, %v2626_v51  }
 0x19e   :  { %4413 = vst [vmem:[#allocation75_spill] sm:$0xff] %v2801_v5 }
 0x1a0   :  { %604 = vperm.xlu0 %2320, %v2597_v43  }
 0x1a1   :  { %v2805_v3 = vpop.permute.xlu0 %1322  ;;  %v2807_v7 = vpop.permute.xlu1 %356  ;;  %2313 = vset.pattern.permute.xlu1 %v4278_v62 }
 0x1a2   :  { %4414 = vst [vmem:[#allocation76_spill] sm:$0xff] %v2805_v3  ;;  %676 = vperm.xlu1 %2313, %v2525_v20   ;;  %v4280_v3 = vmov 5  }
 0x1a4   :  { %612 = vperm.xlu0 %2320, %v2616_v48  }
 0x1a5   :  { %v2812_v13 = vpop.permute.xlu0 %1326 }
 0x1a6   :  { %4415 = vst [vmem:[#allocation77_spill] sm:$0xff] %v2812_v13  ;;  %v2814_v1 = vpop.permute.xlu1 %237  ;;  %684 = vperm.xlu1 %2313, %v2538_v25  }
 0x1a7   :  { %4416 = vst [vmem:[#allocation78_spill] sm:$0xff] %v2814_v1 }
 0x1a8   :  { %620 = vperm.xlu0 %2320, %v2632_v52  }
 0x1a9   :  { %v2818_v5 = vpop.permute.xlu0 %1330 }
 0x1aa   :  { %4417 = vst [vmem:[#allocation79_spill] sm:$0xff] %v2818_v5  ;;  %688 = vperm.xlu1 %2313, %v2545_v27  }
 0x1ab   :  { %v2821_v55 = vpop.permute.xlu1 %360 }
 0x1ac   :  { %4418 = vst [vmem:[#allocation80_spill] sm:$0xff] %v2821_v55  ;;  %1538 = vperm.xlu0 %2320, %v2527_v21  }
 0x1ad   :  { %v2824_v62 = vpop.permute.xlu0 %1334 }
 0x1ae   :  { %4419 = vst [vmem:[#allocation81_spill] sm:$0xff] %v2824_v62  ;;  %696 = vperm.xlu1 %2313, %v2558_v31  }
 0x1b0   :  { %1550 = vperm.xlu0 %2320, %v2547_v28   ;;  %v2828_v13 = vpop.permute.xlu1 %242 }
 0x1b1   :  { %v2830_v56 = vpop.permute.xlu0 %1338 }
 0x1b2   :  { %4420 = vst [vmem:[#allocation82_spill] sm:$0xff] %v2830_v56  ;;  %704 = vperm.xlu1 %2313, %v2571_v35  }
 0x1b4   :  { %1558 = vperm.xlu0 %2320, %v2560_v32  }
 0x1b5   :  { %v2834_v54 = vpop.permute.xlu0 %1342  ;;  %v2836_v53 = vpop.permute.xlu1 %364 }
 0x1b6   :  { %4421 = vst [vmem:[#allocation83_spill] sm:$0xff] %v2834_v54  ;;  %712 = vperm.xlu1 %2313, %v2585_v39  }
 0x1b8   :  { %1566 = vperm.xlu0 %2320, %v2573_v36  }
 0x1b9   :  { %v2840_v62 = vpop.permute.xlu0 %1346 }
 0x1ba   :  { %4422 = vst [vmem:[#allocation84_spill] sm:$0xff] %v2840_v62  ;;  %v2842_v5 = vpop.permute.xlu1 %247  ;;  %720 = vperm.xlu1 %2313, %v2597_v43  }
 0x1bb   :  { %4423 = vst [vmem:[#allocation85_spill] sm:$0xff] %v2842_v5 }
 0x1bc   :  { %1574 = vperm.xlu0 %2320, %v2587_v40  }
 0x1bd   :  { %v2846_v56 = vpop.permute.xlu0 %1350 }
 0x1be   :  { %4424 = vst [vmem:[#allocation86_spill] sm:$0xff] %v2846_v56  ;;  %728 = vperm.xlu1 %2313, %v2616_v48  }
 0x1bf   :  { %v2849_v1 = vpop.permute.xlu1 %368 }
 0x1c0   :  { %4425 = vst [vmem:[#allocation87_spill] sm:$0xff] %v2849_v1  ;;  %1582 = vperm.xlu0 %2320, %v2599_v44  }
 0x1c1   :  { %v2852_v54 = vpop.permute.xlu0 %1354 }
 0x1c2   :  { %4426 = vst [vmem:[#allocation88_spill] sm:$0xff] %v2852_v54  ;;  %736 = vperm.xlu1 %2313, %v2632_v52   ;;  %v4429_v54 = vmov 4  }
 0x1c4   :  { %1590 = vperm.xlu0 %2320, %v2611_v47   ;;  %v2856_v62 = vpop.permute.xlu1 %252 }
 0x1c5   :  { %v2858_v5 = vpop.permute.xlu0 %1358 }
 0x1c6   :  { %4427 = vst [vmem:[#allocation89_spill] sm:$0xff] %v2858_v5  ;;  %2314 = vset.pattern.permute.xlu1 %v4280_v3 }
 0x1c7   :  { %796 = vperm.xlu1 %2314, %v2531_v22  }
 0x1c8   :  { %1598 = vperm.xlu0 %2320, %v2622_v50  }
 0x1c9   :  { %v2863_v56 = vpop.permute.xlu0 %1362  ;;  %v2865_v1 = vpop.permute.xlu1 %372 }
 0x1ca   :  { %4428 = vst [vmem:[#allocation90_spill] sm:$0xff] %v2863_v56 }
 0x1cb   :  { %800 = vperm.xlu1 %2314, %v2538_v25  }
 0x1cc   :  { %2322 = vset.pattern.permute.xlu0 %v4429_v54 }
 0x1cd   :  { %680 = vperm.xlu0 %2322, %v2531_v22   ;;  %v2870_v24 = vpop.permute.xlu0 %1366 }
 0x1ce   :  { %4430 = vst [vmem:[#allocation91_spill] sm:$0xff] %v2870_v24  ;;  %v2872_v5 = vpop.permute.xlu1 %257 }
 0x1cf   :  { %4431 = vst [vmem:[#allocation92_spill] sm:$0xff] %v2872_v5  ;;  %808 = vperm.xlu1 %2314, %v2552_v29  }
 0x1d1   :  { %692 = vperm.xlu0 %2322, %v2552_v29  }
 0x1d2   :  { %v2876_v3 = vpop.permute.xlu0 %448  ;;  %v2878_v55 = vpop.permute.xlu1 %262 }
 0x1d3   :  { %4432 = vst [vmem:[#allocation93_spill] sm:$0xff] %v2876_v3  ;;  %816 = vperm.xlu1 %2314, %v2564_v33  }
 0x1d5   :  { %700 = vperm.xlu0 %2322, %v2564_v33  }
 0x1d6   :  { %v2882_v56 = vpop.permute.xlu0 %460 }
 0x1d7   :  { %4433 = vst [vmem:[#allocation94_spill] sm:$0xff] %v2882_v56  ;;  %v2884_v12 = vpop.permute.xlu1 %380  ;;  %824 = vperm.xlu1 %2314, %v2578_v37  }
 0x1d9   :  { %708 = vperm.xlu0 %2322, %v2578_v37  }
 0x1da   :  { %v2888_v24 = vpop.permute.xlu0 %468 }
 0x1db   :  { %4434 = vst [vmem:[#allocation95_spill] sm:$0xff] %v2888_v24  ;;  %832 = vperm.xlu1 %2314, %v2591_v41  }
 0x1dc   :  { %v2891_v5 = vpop.permute.xlu1 %267 }
 0x1dd   :  { %4435 = vst [vmem:[#allocation96_spill] sm:$0xff] %v2891_v5  ;;  %716 = vperm.xlu0 %2322, %v2591_v41   ;;  %v4283_v5 = vmov 7  }
 0x1de   :  { %v2894_v3 = vpop.permute.xlu0 %476 }
 0x1df   :  { %4436 = vst [vmem:[#allocation97_spill] sm:$0xff] %v2894_v3  ;;  %840 = vperm.xlu1 %2314, %v2608_v46  }
 0x1e1   :  { %724 = vperm.xlu0 %2322, %v2608_v46   ;;  %v2898_v56 = vpop.permute.xlu1 %384 }
 0x1e2   :  { %4437 = vst [vmem:[#allocation98_spill] sm:$0xff] %v2898_v56  ;;  %v2900_v4 = vpop.permute.xlu0 %484 }
 0x1e3   :  { %4438 = vst [vmem:[#allocation99_spill] sm:$0xff] %v2900_v4  ;;  %848 = vperm.xlu1 %2314, %v2626_v51  }
 0x1e5   :  { %732 = vperm.xlu0 %2322, %v2626_v51  }
 0x1e6   :  { %v2904_v24 = vpop.permute.xlu0 %492  ;;  %v2906_v61 = vpop.permute.xlu1 %272 }
 0x1e7   :  { %4439 = vst [vmem:[#allocation100_spill] sm:$0xff] %v2904_v24  ;;  %2315 = vset.pattern.permute.xlu1 %v4283_v5 }
 0x1e8   :  { %1028 = vperm.xlu1 %2315, %v2531_v22  }
 0x1e9   :  { %1658 = vperm.xlu0 %2322, %v2533_v23  }
 0x1ea   :  { %v2911_v3 = vpop.permute.xlu0 %500 }
 0x1eb   :  { %4440 = vst [vmem:[#allocation101_spill] sm:$0xff] %v2911_v3  ;;  %v2913_v56 = vpop.permute.xlu1 %472 }
 0x1ec   :  { %1032 = vperm.xlu1 %2315, %v2538_v25  }
 0x1ed   :  { %1670 = vperm.xlu0 %2322, %v2554_v30  }
 0x1ee   :  { %v2917_v4 = vpop.permute.xlu0 %1426 }
 0x1ef   :  { %4441 = vst [vmem:[#allocation102_spill] sm:$0xff] %v2917_v4  ;;  %v2919_v24 = vpop.permute.xlu1 %480 }
 0x1f0   :  { %1040 = vperm.xlu1 %2315, %v2552_v29  }
 0x1f1   :  { %1678 = vperm.xlu0 %2322, %v2566_v34  }
 0x1f2   :  { %v2923_v5 = vpop.permute.xlu0 %1438 }
 0x1f3   :  { %4442 = vst [vmem:[#allocation103_spill] sm:$0xff] %v2923_v5  ;;  %v2925_v14 = vpop.permute.xlu1 %488 }
 0x1f4   :  { %1048 = vperm.xlu1 %2315, %v2564_v33  }
 0x1f5   :  { %1686 = vperm.xlu0 %2322, %v2580_v38  }
 0x1f6   :  { %v2929_v3 = vpop.permute.xlu0 %1446 }
 0x1f7   :  { %4443 = vst [vmem:[#allocation104_spill] sm:$0xff] %v2929_v3  ;;  %v2931_v25 = vpop.permute.xlu1 %496 }
 0x1f8   :  { %1056 = vperm.xlu1 %2315, %v2578_v37  }
 0x1f9   :  { %1694 = vperm.xlu0 %2322, %v2593_v42  }
 0x1fa   :  { %v2935_v4 = vpop.permute.xlu0 %1454 }
 0x1fb   :  { %4444 = vst [vmem:[#allocation105_spill] sm:$0xff] %v2935_v4  ;;  %v2937_v9 = vpop.permute.xlu1 %504  ;;  %v4450_v4 = vmov 5  }
 0x1fc   :  { %4445 = vst [vmem:[#allocation106_spill] sm:$0xff] %v2937_v9  ;;  %1064 = vperm.xlu1 %2315, %v2591_v41   ;;  %v4456_v9 = vmov 2  }
 0x1fd   :  { %1702 = vperm.xlu0 %2322, %v2604_v45  }
 0x1fe   :  { %v2941_v5 = vpop.permute.xlu0 %1462 }
 0x1ff   :  { %4446 = vst [vmem:[#allocation107_spill] sm:$0xff] %v2941_v5 }
 0x200   :  { %1072 = vperm.xlu1 %2315, %v2608_v46   ;;  %v2944_v8 = vpop.permute.xlu1 %564 }
 0x201   :  { %4447 = vst [vmem:[#allocation108_spill] sm:$0xff] %v2944_v8  ;;  %1710 = vperm.xlu0 %2322, %v2618_v49  }
 0x202   :  { %v2947_v3 = vpop.permute.xlu0 %1470 }
 0x203   :  { %4448 = vst [vmem:[#allocation109_spill] sm:$0xff] %v2947_v3 }
 0x204   :  { %1080 = vperm.xlu1 %2315, %v2626_v51   ;;  %v2950_v19 = vpop.permute.xlu1 %568 }
 0x205   :  { %4449 = vst [vmem:[#allocation110_spill] sm:$0xff] %v2950_v19  ;;  %2324 = vset.pattern.permute.xlu0 %v4450_v4 }
 0x206   :  { %792 = vperm.xlu0 %2324, %v2525_v20   ;;  %v2954_v18 = vpop.permute.xlu0 %1478 }
 0x207   :  { %4451 = vst [vmem:[#allocation111_spill] sm:$0xff] %v2954_v18 }
 0x208   :  { %2316 = vset.pattern.permute.xlu1 %v4452_v11  ;;  %v2957_v5 = vpop.permute.xlu1 %576 }
 0x209   :  { %4453 = vst [vmem:[#allocation112_spill] sm:$0xff] %v2957_v5  ;;  %1225 = vperm.xlu1 %2316, %v2593_v42  }
 0x20a   :  { %804 = vperm.xlu0 %2324, %v2545_v27   ;;  %v4305_v27 = vmov 6  }
 0x20b   :  { %v2961_v8 = vpop.permute.xlu0 %560 }
 0x20c   :  { %4454 = vst [vmem:[#allocation113_spill] sm:$0xff] %v2961_v8  ;;  %v2963_v3 = vpop.permute.xlu1 %584 }
 0x20d   :  { %4455 = vst [vmem:[#allocation114_spill] sm:$0xff] %v2963_v3  ;;  %2319 = vset.pattern.permute.xlu1 %v4456_v9 }
 0x20e   :  { %812 = vperm.xlu0 %2324, %v2558_v31   ;;  %1422 = vperm.xlu1 %2319, %v2527_v21  }
 0x20f   :  { %v2968_v19 = vpop.permute.xlu0 %572 }
 0x210   :  { %4457 = vst [vmem:[#allocation115_spill] sm:$0xff] %v2968_v19  ;;  %v2970_v18 = vpop.permute.xlu1 %592 }
 0x211   :  { %4458 = vst [vmem:[#allocation116_spill] sm:$0xff] %v2970_v18 }
 0x212   :  { %820 = vperm.xlu0 %2324, %v2571_v35   ;;  %1430 = vperm.xlu1 %2319, %v2540_v26  }
 0x213   :  { %v2974_v11 = vpop.permute.xlu0 %580 }
 0x214   :  { %4459 = vst [vmem:[#allocation117_spill] sm:$0xff] %v2974_v11  ;;  %v2976_v5 = vpop.permute.xlu1 %600 }
 0x215   :  { %4460 = vst [vmem:[#allocation118_spill] sm:$0xff] %v2976_v5 }
 0x216   :  { %828 = vperm.xlu0 %2324, %v2585_v39   ;;  %1434 = vperm.xlu1 %2319, %v2547_v28   ;;  %v4470_v39 = vmov 3  }
 0x217   :  { %v2980_v9 = vpop.permute.xlu0 %588 }
 0x218   :  { %v2982_v8 = vpop.permute.xlu1 %608 }
 0x219   :  { %4461 = vst [vmem:[#allocation119_spill] sm:$0xff] %v2982_v8 }
 0x21a   :  { %836 = vperm.xlu0 %2324, %v2597_v43   ;;  %1442 = vperm.xlu1 %2319, %v2560_v32  }
 0x21b   :  { %v2986_v19 = vpop.permute.xlu0 %596 }
 0x21c   :  { %v2988_v18 = vpop.permute.xlu1 %616 }
 0x21d   :  { %4462 = vst [vmem:[#allocation120_spill] sm:$0xff] %v2988_v18 }
 0x21e   :  { %844 = vperm.xlu0 %2324, %v2616_v48   ;;  %1450 = vperm.xlu1 %2319, %v2573_v36  }
 0x21f   :  { %v2992_v11 = vpop.permute.xlu0 %604 }
 0x221   :  { %v2994_v5 = vpop.permute.xlu1 %676 }
 0x222   :  { %4463 = vst [vmem:[#allocation121_spill] sm:$0xff] %v2994_v5  ;;  %852 = vperm.xlu0 %2324, %v2632_v52   ;;  %1458 = vperm.xlu1 %2319, %v2587_v40  }
 0x223   :  { %v2998_v8 = vpop.permute.xlu0 %612 }
 0x225   :  { %v3000_v3 = vpop.permute.xlu1 %684 }
 0x226   :  { %4464 = vst [vmem:[#allocation122_spill] sm:$0xff] %v3000_v3  ;;  %1770 = vperm.xlu0 %2324, %v2527_v21   ;;  %1466 = vperm.xlu1 %2319, %v2599_v44  }
 0x227   :  { %v3004_v18 = vpop.permute.xlu0 %620 }
 0x228   :  { %4465 = vst [vmem:[#allocation123_spill] sm:$0xff] %v3004_v18 }
 0x229   :  { %v3006_v48 = vpop.permute.xlu1 %688 }
 0x22a   :  { %4466 = vst [vmem:[#allocation124_spill] sm:$0xff] %v3006_v48  ;;  %1782 = vperm.xlu0 %2324, %v2547_v28   ;;  %1474 = vperm.xlu1 %2319, %v2611_v47  }
 0x22b   :  { %v3010_v5 = vpop.permute.xlu0 %1538 }
 0x22c   :  { %4467 = vst [vmem:[#allocation125_spill] sm:$0xff] %v3010_v5 }
 0x22d   :  { %v3012_v52 = vpop.permute.xlu1 %696 }
 0x22e   :  { %4468 = vst [vmem:[#allocation126_spill] sm:$0xff] %v3012_v52  ;;  %1790 = vperm.xlu0 %2324, %v2560_v32   ;;  %1482 = vperm.xlu1 %2319, %v2622_v50  }
 0x22f   :  { %v3016_v3 = vpop.permute.xlu0 %1550 }
 0x230   :  { %4469 = vst [vmem:[#allocation127_spill] sm:$0xff] %v3016_v3 }
 0x231   :  { %v3018_v43 = vpop.permute.xlu1 %704 }
 0x232   :  { %1798 = vperm.xlu0 %2324, %v2573_v36   ;;  %2321 = vset.pattern.permute.xlu1 %v4470_v39 }
 0x233   :  { %v3022_v48 = vpop.permute.xlu0 %1558  ;;  %1542 = vperm.xlu1 %2321, %v2533_v23  }
 0x234   :  { %4471 = vst [vmem:[#allocation128_spill] sm:$0xff] %v3022_v48 }
 0x235   :  { %v3025_v35 = vpop.permute.xlu1 %712 }
 0x236   :  { %1806 = vperm.xlu0 %2324, %v2587_v40  }
 0x237   :  { %v3028_v5 = vpop.permute.xlu0 %1566  ;;  %1546 = vperm.xlu1 %2321, %v2540_v26  }
 0x238   :  { %4472 = vst [vmem:[#allocation129_spill] sm:$0xff] %v3028_v5 }
 0x239   :  { %v3031_v52 = vpop.permute.xlu1 %720 }
 0x23a   :  { %1814 = vperm.xlu0 %2324, %v2599_v44  }
 0x23b   :  { %v3034_v3 = vpop.permute.xlu0 %1574  ;;  %1554 = vperm.xlu1 %2321, %v2554_v30  }
 0x23c   :  { %4473 = vst [vmem:[#allocation130_spill] sm:$0xff] %v3034_v3 }
 0x23d   :  { %v3037_v39 = vpop.permute.xlu1 %728 }
 0x23e   :  { %1822 = vperm.xlu0 %2324, %v2611_v47  }
 0x23f   :  { %v3040_v48 = vpop.permute.xlu0 %1582  ;;  %1562 = vperm.xlu1 %2321, %v2566_v34  }
 0x240   :  { %4474 = vst [vmem:[#allocation131_spill] sm:$0xff] %v3040_v48 }
 0x241   :  { %v3043_v31 = vpop.permute.xlu1 %736 }
 0x242   :  { %4475 = vst [vmem:[#allocation132_spill] sm:$0xff] %v3043_v31  ;;  %1830 = vperm.xlu0 %2324, %v2622_v50  }
 0x243   :  { %v3046_v5 = vpop.permute.xlu0 %1590  ;;  %1570 = vperm.xlu1 %2321, %v2580_v38  }
 0x244   :  { %4476 = vst [vmem:[#allocation133_spill] sm:$0xff] %v3046_v5 }
 0x246   :  { %2326 = vset.pattern.permute.xlu0 %v4305_v27  ;;  %v3050_v3 = vpop.permute.xlu1 %796 }
 0x247   :  { %4477 = vst [vmem:[#allocation134_spill] sm:$0xff] %v3050_v3  ;;  %912 = vperm.xlu0 %2326, %v2531_v22   ;;  %v3053_v18 = vpop.permute.xlu0 %1598  ;;  %1578 = vperm.xlu1 %2321, %v2593_v42  }
 0x248   :  { %4478 = vst [vmem:[#allocation135_spill] sm:$0xff] %v3053_v18 }
 0x24a   :  { %v3056_v48 = vpop.permute.xlu1 %800 }
 0x24b   :  { %4479 = vst [vmem:[#allocation136_spill] sm:$0xff] %v3056_v48  ;;  %924 = vperm.xlu0 %2326, %v2552_v29   ;;  %1586 = vperm.xlu1 %2321, %v2604_v45  }
 0x24c   :  { %v3060_v5 = vpop.permute.xlu0 %680 }
 0x24d   :  { %4480 = vst [vmem:[#allocation137_spill] sm:$0xff] %v3060_v5 }
 0x24e   :  { %v3062_v31 = vpop.permute.xlu1 %808 }
 0x24f   :  { %4481 = vst [vmem:[#allocation138_spill] sm:$0xff] %v3062_v31  ;;  %932 = vperm.xlu0 %2326, %v2564_v33   ;;  %1594 = vperm.xlu1 %2321, %v2618_v49  }
 0x250   :  { %v3066_v27 = vpop.permute.xlu0 %692 }
 0x251   :  { %4482 = vst [vmem:[#allocation139_spill] sm:$0xff] %v3066_v27 }
 0x252   :  { %v3068_v22 = vpop.permute.xlu1 %816 }
 0x253   :  { %4483 = vst [vmem:[#allocation140_spill] sm:$0xff] %v3068_v22  ;;  %940 = vperm.xlu0 %2326, %v2578_v37   ;;  %2323 = vset.pattern.permute.xlu1 %v4429_v54 }
 0x254   :  { %v3072_v18 = vpop.permute.xlu0 %700  ;;  %1654 = vperm.xlu1 %2323, %v2527_v21  }
 0x255   :  { %4484 = vst [vmem:[#allocation141_spill] sm:$0xff] %v3072_v18 }
 0x256   :  { %v3075_v29 = vpop.permute.xlu1 %824 }
 0x257   :  { %4485 = vst [vmem:[#allocation142_spill] sm:$0xff] %v3075_v29  ;;  %948 = vperm.xlu0 %2326, %v2591_v41  }
 0x258   :  { %v3078_v48 = vpop.permute.xlu0 %708  ;;  %1662 = vperm.xlu1 %2323, %v2540_v26  }
 0x259   :  { %4486 = vst [vmem:[#allocation143_spill] sm:$0xff] %v3078_v48 }
 0x25a   :  { %v3081_v33 = vpop.permute.xlu1 %832 }
 0x25b   :  { %4487 = vst [vmem:[#allocation144_spill] sm:$0xff] %v3081_v33  ;;  %956 = vperm.xlu0 %2326, %v2608_v46  }
 0x25c   :  { %v3084_v22 = vpop.permute.xlu0 %716  ;;  %1666 = vperm.xlu1 %2323, %v2547_v28  }
 0x25d   :  { %4488 = vst [vmem:[#allocation145_spill] sm:$0xff] %v3084_v22 }
 0x25e   :  { %v3087_v37 = vpop.permute.xlu1 %840 }
 0x25f   :  { %4489 = vst [vmem:[#allocation146_spill] sm:$0xff] %v3087_v37  ;;  %964 = vperm.xlu0 %2326, %v2626_v51  }
 0x260   :  { %v3090_v54 = vpop.permute.xlu0 %724  ;;  %1674 = vperm.xlu1 %2323, %v2560_v32  }
 0x261   :  { %4490 = vst [vmem:[#allocation147_spill] sm:$0xff] %v3090_v54 }
 0x262   :  { %v3093_v41 = vpop.permute.xlu1 %848 }
 0x263   :  { %4491 = vst [vmem:[#allocation148_spill] sm:$0xff] %v3093_v41  ;;  %1890 = vperm.xlu0 %2326, %v2533_v23  }
 0x264   :  { %v3096_v29 = vpop.permute.xlu0 %732  ;;  %1682 = vperm.xlu1 %2323, %v2573_v36  }
 0x265   :  { %4492 = vst [vmem:[#allocation149_spill] sm:$0xff] %v3096_v29 }
 0x267   :  { %1898 = vperm.xlu0 %2326, %v2547_v28   ;;  %v3100_v46 = vpop.permute.xlu1 %1028 }
 0x268   :  { %4493 = vst [vmem:[#allocation150_spill] sm:$0xff] %v3100_v46  ;;  %v3102_v33 = vpop.permute.xlu0 %1658  ;;  %1690 = vperm.xlu1 %2323, %v2587_v40  }
 0x269   :  { %4494 = vst [vmem:[#allocation151_spill] sm:$0xff] %v3102_v33 }
 0x26b   :  { %1902 = vperm.xlu0 %2326, %v2554_v30   ;;  %v3106_v51 = vpop.permute.xlu1 %1032 }
 0x26c   :  { %4495 = vst [vmem:[#allocation152_spill] sm:$0xff] %v3106_v51  ;;  %v3108_v37 = vpop.permute.xlu0 %1670  ;;  %1698 = vperm.xlu1 %2323, %v2599_v44   ;;  %v191_v51 = vlaneseq }
 0x26d   :  { %4496 = vst [vmem:[#allocation153_spill] sm:$0xff] %v3108_v37 }
 0x26f   :  { %1906 = vperm.xlu0 %2326, %v2560_v32   ;;  %v3112_v41 = vpop.permute.xlu1 %1040 }
 0x270   :  { %4497 = vst [vmem:[#allocation154_spill] sm:$0xff] %v3112_v41  ;;  %v3114_v29 = vpop.permute.xlu0 %1678  ;;  %1706 = vperm.xlu1 %2323, %v2611_v47  }
 0x271   :  { %4498 = vst [vmem:[#allocation155_spill] sm:$0xff] %v3114_v29  ;;  %v3129_v29 = vshrl.u32 %v191_v51, 7 }
 0x273   :  { %1910 = vperm.xlu0 %2326, %v2566_v34   ;;  %v3118_v33 = vpop.permute.xlu1 %1048  ;;  %4503 = vst [vmem:[#allocation160_spill] sm:$0xff] %v3129_v29  ;;  %v325_v41 = vsub.s32 1, %v3129_v29  ;;  %v557_v51 = vsub.s32 3, %v3129_v29  ;;  %v789_v22 = vsub.s32 5, %v3129_v29 }
 0x274   :  { %4499 = vst [vmem:[#allocation156_spill] sm:$0xff] %v3118_v33  ;;  %v3120_v54 = vpop.permute.xlu0 %1686  ;;  %1714 = vperm.xlu1 %2323, %v2622_v50  }
 0x275   :  { %4500 = vst [vmem:[#allocation157_spill] sm:$0xff] %v3120_v54  ;;  %v3176_v48 = vrot.slane %v2517_v16, %v789_v22  ;;  %v3192_v27 = vrot.slane %v2519_v17, %v325_v41 }
 0x277   :  { %1914 = vperm.xlu0 %2326, %v2573_v36   ;;  %v3124_v37 = vpop.permute.xlu1 %1056  ;;  %4516 = vst [vmem:[#allocation172_spill] sm:$0xff] %v3192_v27 }
 0x278   :  { %4501 = vst [vmem:[#allocation158_spill] sm:$0xff] %v3124_v37  ;;  %v3126_v46 = vpop.permute.xlu0 %1694  ;;  %2325 = vset.pattern.permute.xlu1 %v4450_v4  ;;  %v193_v37 = vsub.s32 0, %v3129_v29  ;;  %v441_v4 = vsub.s32 2, %v3129_v29 }
 0x279   :  { %4502 = vst [vmem:[#allocation159_spill] sm:$0xff] %v3126_v46  ;;  %1774 = vperm.xlu1 %2325, %v2533_v23  }
 0x27a   :  { %v3159_v36 = vrot.slane %v2517_v16, %v193_v37  ;;  %v3167_v3 = vrot.slane %v2517_v16, %v441_v4 }
 0x27b   :  { %1918 = vperm.xlu0 %2326, %v2580_v38   ;;  %v3133_v33 = vpop.permute.xlu1 %1064 }
 0x27c   :  { %4504 = vst [vmem:[#allocation161_spill] sm:$0xff] %v3133_v33  ;;  %v3135_v54 = vpop.permute.xlu0 %1702  ;;  %v3148_v33 = vrot.slane %v2517_v16, %v325_v41  ;;  %4509 = vst [vmem:[#allocation166_spill] sm:$0xff] %v3159_v36  ;;  %v514_v41 = vsub.f32 %v3167_v3, %v2913_v56 }
 0x27d   :  { %4505 = vst [vmem:[#allocation162_spill] sm:$0xff] %v3135_v54  ;;  %1778 = vperm.xlu1 %2325, %v2540_v26   ;;  %v673_v54 = vsub.s32 4, %v3129_v29  ;;  %v905_v26 = vsub.s32 6, %v3129_v29  ;;  %4511 = vst [vmem:[#allocation168_spill] sm:$0xff] %v3167_v3 }
 0x27e   :  { %4508 = vst [vmem:[#allocation165_spill] sm:$0xff] %v3148_v33  ;;  %v402_v56 = vsub.f32 %v3148_v33, %v2865_v1  ;;  %v530_v1 = vmax.f32 %v514_v41, 0.0 }
 0x27f   :  { %1922 = vperm.xlu0 %2326, %v2587_v40   ;;  %v3141_v46 = vpop.permute.xlu1 %1072  ;;  %v3173_v40 = vrot.slane %v2517_v16, %v673_v54 }
 0x280   :  { %4506 = vst [vmem:[#allocation163_spill] sm:$0xff] %v3141_v46  ;;  %v3145_v23 = vpop.permute.xlu0 %1710  ;;  %v3156_v46 = vrot.slane %v2519_v17, %v193_v37  ;;  %v3179_v37 = vrot.slane %v2517_v16, %v905_v26 }
 0x281   :  { %4507 = vst [vmem:[#allocation164_spill] sm:$0xff] %v3145_v23  ;;  %1786 = vperm.xlu1 %2325, %v2554_v30   ;;  %v392_v23 = vsub.f32 %v3148_v33, %v2696_v60  ;;  %v3170_v30 = vrot.slane %v2517_v16, %v557_v51  ;;  %v276_v60 = vsub.f32 %v3159_v36, %v2689_v58 }
 0x282   :  { %4513 = vst [vmem:[#allocation170_spill] sm:$0xff] %v3179_v37  ;;  %v1254_v5 = vsub.f32 %v3156_v46, %v2687_v57  ;;  %v398_v37 = vsub.f32 %v3148_v33, %v2807_v7  ;;  %v3199_v58 = vrot.slane %v2519_v17, %v441_v4  ;;  %v3211_v57 = vrot.slane %v2519_v17, %v789_v22 }
 0x283   :  { %1926 = vperm.xlu0 %2326, %v2593_v42   ;;  %v3164_v31 = vpop.permute.xlu1 %1080  ;;  %4512 = vst [vmem:[#allocation169_spill] sm:$0xff] %v3170_v30  ;;  %v282_v7 = vsub.f32 %v3159_v36, %v2799_v0 }
 0x284   :  { %4510 = vst [vmem:[#allocation167_spill] sm:$0xff] %v3164_v31  ;;  %v4515_v31 = vsub.s32 7, %v3129_v29  ;;  %4517 = vst [vmem:[#allocation173_spill] sm:$0xff] %v3199_v58  ;;  %v3229_v0 = vmax.f32 %v1254_v5, 0.0  ;;  %v414_v29 = vmax.f32 %v398_v37, 0.0  ;;  %v286_v37 = vsub.f32 %v3159_v36, %v2856_v62 }
 0x285   :  { %v3183_v32 = vpop.permute.xlu0 %792  ;;  %1794 = vperm.xlu1 %2325, %v2566_v34   ;;  %v408_v34 = vmax.f32 %v392_v23, 0.0  ;;  %4518 = vst [vmem:[#allocation174_spill] sm:$0xff] %v3211_v57  ;;  %v3220_v23 = vrot.slane %v2519_v17, %v905_v26  ;;  %v630_v26 = vsub.f32 %v3170_v30, %v2980_v9  ;;  %v298_v5 = vmax.f32 %v282_v7, 0.0 }
 0x286   :  { %4514 = vst [vmem:[#allocation171_spill] sm:$0xff] %v3183_v32  ;;  %v3189_v18 = vrot.slane %v2517_v16, %v4515_v31  ;;  %v3202_v32 = vrot.slane %v2519_v17, %v557_v51  ;;  %v1257_v16 = vsub.f32 %v3156_v46, %v2706_v63  ;;  %v3208_v31 = vrot.slane %v2519_v17, %v673_v54 }
 0x287   :  { %1930 = vperm.xlu0 %2326, %v2599_v44   ;;  %4519 = vst [vmem:[#allocation175_spill] sm:$0xff] %v3220_v23  ;;  %v292_v63 = vmax.f32 %v276_v60, 0.0  ;;  %v1259_v51 = vsub.f32 %v3156_v46, %v2718_v2  ;;  %v400_v54 = vsub.f32 %v3148_v33, %v2836_v53  ;;  %v284_v53 = vsub.f32 %v3159_v36, %v2828_v13 }
 0x288   :  { %v3217_v4 = vpop.permute.xlu1 %1225  ;;  %v3237_v17 = vmax.f32 %v1257_v16, 0.0  ;;  %v516_v2 = vsub.f32 %v3167_v3, %v2919_v24  ;;  %v746_v9 = vsub.f32 %v3173_v40, %v3018_v43  ;;  %v632_v13 = vsub.f32 %v3170_v30, %v2986_v19 }
 0x289   :  { %v3226_v22 = vpop.permute.xlu0 %804  ;;  %1802 = vperm.xlu1 %2325, %v2580_v38   ;;  %v3235_v60 = vadd.f32 %v408_v34, %v292_v63  ;;  %v3248_v34 = vmax.f32 %v1259_v51, 0.0  ;;  %v416_v63 = vmax.f32 %v400_v54, 0.0  ;;  %v1265_v62 = vsub.f32 %v3156_v46, %v2748_v15  ;;  %v4546_v15 = vld [vmem:[#allocation71_spill] sm:$0xff] }
 0x28a   :  { %4520 = vst [vmem:[#allocation176_spill] sm:$0xff] %v3226_v22  ;;  %v430_v41 = vadd.f32 %v414_v29, %v298_v5  ;;  %v418_v43 = vmax.f32 %v402_v56, 0.0  ;;  %v646_v51 = vmax.f32 %v630_v26, 0.0  ;;  %v300_v22 = vmax.f32 %v284_v53, 0.0 }
 0x28b   :  { %1938 = vperm.xlu0 %2326, %v2611_v47   ;;  %v288_v16 = vsub.f32 %v3159_v36, %v2878_v55  ;;  %v532_v54 = vmax.f32 %v516_v2, 0.0  ;;  %v518_v19 = vsub.f32 %v3167_v3, %v2925_v14  ;;  %v762_v38 = vmax.f32 %v746_v9, 0.0 }
 0x28c   :  { %v406_v29 = vsub.f32 %v3148_v33, %v2777_v59  ;;  %v432_v56 = vadd.f32 %v416_v63, %v300_v22  ;;  %v404_v26 = vsub.f32 %v3148_v33, %v2884_v12  ;;  %v648_v55 = vmax.f32 %v632_v13, 0.0 }
 0x28d   :  { %v3254_v24 = vpop.permute.xlu0 %812  ;;  %1810 = vperm.xlu1 %2325, %v2593_v42   ;;  %v3257_v7 = vpop.permute.xlu1 %1422  ;;  %v546_v42 = vadd.f32 %v530_v1, %v430_v41  ;;  %v304_v1 = vmax.f32 %v288_v16, 0.0  ;;  %v534_v59 = vmax.f32 %v518_v19, 0.0  ;;  %v520_v22 = vsub.f32 %v3167_v3, %v2931_v25  ;;  %v4526_v19 = vld [vmem:[#allocation106_spill] sm:$0xff] }
 0x28e   :  { %4521 = vst [vmem:[#allocation177_spill] sm:$0xff] %v3254_v24  ;;  %4522 = vst [vmem:[#allocation178_spill] sm:$0xff] %v3257_v7  ;;  %v302_v24 = vmax.f32 %v286_v37, 0.0  ;;  %v748_v7 = vsub.f32 %v3173_v40, %v3025_v35  ;;  %v634_v37 = vsub.f32 %v3170_v30, %v2992_v11  ;;  %v548_v9 = vadd.f32 %v532_v54, %v432_v56 }
 0x28f   :  { %1942 = vperm.xlu0 %2326, %v2618_v49   ;;  %v662_v5 = vadd.f32 %v646_v51, %v546_v42  ;;  %v750_v13 = vsub.f32 %v3173_v40, %v3031_v52  ;;  %v420_v42 = vmax.f32 %v404_v26, 0.0  ;;  %v290_v11 = vsub.f32 %v3159_v36, %v2906_v61 }
 0x290   :  { %v434_v2 = vadd.f32 %v418_v43, %v302_v24  ;;  %v764_v63 = vmax.f32 %v748_v7, 0.0  ;;  %v664_v41 = vadd.f32 %v648_v55, %v548_v9  ;;  %v636_v16 = vsub.f32 %v3170_v30, %v2998_v8  ;;  %v4528_v8 = vld [vmem:[#allocation23_spill] sm:$0xff] }
 0x291   :  { %v821_v53 = vpop.permute.xlu0 %820  ;;  %1818 = vperm.xlu1 %2325, %v2604_v45   ;;  %v3273_v14 = vpop.permute.xlu1 %1430  ;;  %v778_v12 = vadd.f32 %v762_v38, %v662_v5  ;;  %v650_v51 = vmax.f32 %v634_v37, 0.0  ;;  %v536_v54 = vmax.f32 %v520_v22, 0.0  ;;  %v522_v61 = vsub.f32 %v3167_v3, %v4526_v19  ;;  %v4529_v37 = vld [vmem:[#allocation61_spill] sm:$0xff] }
 0x292   :  { %4523 = vst [vmem:[#allocation179_spill] sm:$0xff] %v3273_v14  ;;  %v862_v35 = vsub.f32 %v3176_v48, %v821_v53  ;;  %v550_v52 = vadd.f32 %v534_v59, %v434_v2  ;;  %v4527_v56 = vmov 7   ;;  %2340 = vlog2.f32 %v4528_v8  ;;  %v4535_v8 = vld [vmem:[#allocation132_spill] sm:$0xff] }
 0x293   :  { %1946 = vperm.xlu0 %2326, %v2622_v50   ;;  %v780_v26 = vadd.f32 %v764_v63, %v664_v41  ;;  %v766_v55 = vmax.f32 %v750_v13, 0.0  ;;  %v752_v53 = vsub.f32 %v3173_v40, %v3037_v39  ;;  %v279_v10 = vsub.f32 %v3159_v36, %v4529_v37  ;;  %v4532_v63 = vld [vmem:[#allocation123_spill] sm:$0xff] }
 0x294   :  { %v878_v24 = vmax.f32 %v862_v35, 0.0  ;;  %v436_v2 = vadd.f32 %v420_v42, %v304_v1  ;;  %v306_v35 = vmax.f32 %v290_v11, 0.0  ;;  %v652_v9 = vmax.f32 %v636_v16, 0.0 }
 0x295   :  { %v829_v43 = vpop.permute.xlu0 %828  ;;  %1826 = vperm.xlu1 %2325, %v2618_v49   ;;  %v3288_v25 = vpop.permute.xlu1 %1434  ;;  %v638_v13 = vsub.f32 %v3170_v30, %v4532_v63  ;;  %v422_v19 = vmax.f32 %v406_v29, 0.0  ;;  %v538_v42 = vmax.f32 %v522_v61, 0.0  ;;  %v768_v16 = vmax.f32 %v752_v53, 0.0  ;;  %v4539_v29 = vld [vmem:[#allocation21_spill] sm:$0xff] }
 0x296   :  { %4524 = vst [vmem:[#allocation180_spill] sm:$0xff] %v3288_v25  ;;  %v3290_v38 = vadd.f32 %v878_v24, %v778_v12  ;;  %v864_v7 = vsub.f32 %v3176_v48, %v829_v43  ;;  %v4531_v12 = vmov 6   ;;  %v666_v24 = vadd.f32 %v650_v51, %v550_v52  ;;  %v4534_v43 = vld [vmem:[#allocation63_spill] sm:$0xff]  ;;  %v4536_v51 = vld [vmem:[#allocation29_spill] sm:$0xff]  ;;  %v2342_v25 = vld [vmem:[#allocation7] sm:$0xff] }
 0x297   :  { %2328 = vset.pattern.permute.xlu0 %v4527_v56  ;;  %v552_v1 = vadd.f32 %v536_v54, %v436_v2  ;;  %v754_v37 = vsub.f32 %v3173_v40, %v4535_v8  ;;  %v4537_v52 = vsub.f32 %v3156_v46, %v2731_v6  ;;  %v109_v54 = vmul.f32 -0.5, %v4539_v29  ;;  %v4541_v2 = vld [vmem:[#allocation22_spill] sm:$0xff] }
 0x298   :  { %4525 = vst [vmem:[#allocation181_spill] sm:$0xff] %v3290_v38  ;;  %v880_v5 = vmax.f32 %v864_v7, 0.0  ;;  %1024 = vperm.xlu0 %2328, %v2525_v20   ;;  %v395_v7 = vsub.f32 %v3148_v33, %v4534_v43  ;;  %v782_v11 = vadd.f32 %v766_v55, %v666_v24  ;;  %v654_v61 = vmax.f32 %v638_v13, 0.0  ;;  %v4551_v56 = vld [vmem:[#allocation34_spill] sm:$0xff] }
 0x299   :  { %v837_v59 = vpop.permute.xlu0 %836  ;;  %v3303_v22 = vpop.permute.xlu1 %1442  ;;  %2327 = vset.pattern.permute.xlu1 %v4531_v12  ;;  %v118_v24 = vmul.f32 -0.5, %v4541_v2  ;;  %v3331_v6 = vmax.f32 %v1265_v62, 0.0  ;;  %v281_v62 = vsub.f32 %v3159_v36, %v4546_v15  ;;  %v100_v15 = vmax.f32 %v2342_v25, 0.0 }
 0x29a   :  { %4530 = vst [vmem:[#allocation106_spill] sm:$0xff] %v3303_v22  ;;  %v3308_v41 = vadd.f32 %v880_v5, %v780_v26  ;;  %v866_v39 = vsub.f32 %v3176_v48, %v837_v59  ;;  %v3319_v26 = vmax.f32 %v4537_v52, 0.0  ;;  %v438_v5 = vadd.f32 %v422_v19, %v306_v35  ;;  %v4544_v52 = vld [vmem:[#allocation31_spill] sm:$0xff]  ;;  %v4550_v22 = vld [vmem:[#allocation80_spill] sm:$0xff] }
 0x29b   :  { %v668_v59 = vadd.f32 %v652_v9, %v552_v1  ;;  %4542 = vst [vmem:[#allocation63_spill] sm:$0xff] %v3331_v6  ;;  %v411_v35 = vmax.f32 %v395_v7, 0.0  ;;  %v4543_v9 = vld [vmem:[#allocation64_spill] sm:$0xff]  ;;  %v2339_v1 = vpop.eup %2338  ;;  %v112_v14 = vand.u32 2147483647, %v4539_v29 }
 0x29c   :  { %4533 = vst [vmem:[#allocation23_spill] sm:$0xff] %v3308_v41  ;;  %v882_v12 = vmax.f32 %v866_v39, 0.0  ;;  %1036 = vperm.xlu0 %2328, %v4536_v51   ;;  %v3333_v39 = vmax.f32 %v279_v10, 0.0  ;;  %v1267_v19 = vsub.f32 %v3156_v46, %v4543_v9  ;;  %v554_v8 = vadd.f32 %v538_v42, %v438_v5  ;;  %v4547_v10 = vld [vmem:[#allocation73_spill] sm:$0xff]  ;;  %v90_v9 = vld [vmem:[#allocation10] sm:$0xff] }
 0x29d   :  { %v845_v63 = vpop.permute.xlu0 %844  ;;  %v3321_v43 = vpop.permute.xlu1 %1450  ;;  %v784_v13 = vadd.f32 %v768_v16, %v668_v59  ;;  %v397_v7 = vsub.f32 %v3148_v33, %v4547_v10  ;;  %v110_v42 = vadd.f32 1.0, %v109_v54  ;;  %v91_v59 = vld [vmem:[#allocation10 + $0x8] sm:$0xff]  ;;  %v121_v10 = vand.u32 2147483647, %v4541_v2  ;;  %v2343_v54 = vld [vmem:[#allocation7 + $0x8] sm:$0xff] }
 0x29e   :  { %4538 = vst [vmem:[#allocation61_spill] sm:$0xff] %v3321_v43  ;;  %v3324_v55 = vadd.f32 %v882_v12, %v782_v11  ;;  %v868_v53 = vsub.f32 %v3176_v48, %v845_v63  ;;  %v770_v11 = vmax.f32 %v754_v37, 0.0  ;;  %v2341_v63 = vpop.eup %2340  ;;  %v670_v16 = vadd.f32 %v654_v61, %v554_v8 }
 0x29f   :  { %v101_v61 = vmax.f32 %v2343_v54, 0.0  ;;  %v102_v8 = vmul.f32 %v2342_v25, %v90_v9  ;;  %v297_v25 = vmax.f32 %v281_v62, 0.0  ;;  %v4555_v9 = vld [vmem:[#allocation72_spill] sm:$0xff]  ;;  %vm3368_vm2 = vcmp.lt.f32.partialorder %v112_v14, 0.0004427343 }
 0x2a0   :  { %4540 = vst [vmem:[#allocation123_spill] sm:$0xff] %v3324_v55  ;;  %v884_v12 = vmax.f32 %v868_v53, 0.0  ;;  %1044 = vperm.xlu0 %2328, %v4544_v52   ;;  %v4545_v55 = vld [vmem:[#allocation68_spill] sm:$0xff]  ;;  %v119_v53 = vadd.f32 1.0, %v118_v24  ;;  %v786_v49 = vadd.f32 %v770_v11, %v670_v16  ;;  %v103_v24 = vmul.f32 %v2343_v54, %v91_v59  ;;  %v4564_v54 = vld [vmem:[#allocation82_spill] sm:$0xff] }
 0x2a1   :  { %v403_v41 = vsub.f32 %v3148_v33, %v4545_v55  ;;  %v853_v38 = vpop.permute.xlu0 %852  ;;  %v3344_v43 = vpop.permute.xlu1 %1458  ;;  %v399_v55 = vsub.f32 %v3148_v33, %v4550_v22  ;;  %v111_v22 = vmul.f32 %v4539_v29, %v110_v42  ;;  %v1370_v23 = vsub.f32 %v3192_v27, %v4555_v9 }
 0x2a2   :  { %4548 = vst [vmem:[#allocation132_spill] sm:$0xff] %v3344_v43  ;;  %v3346_v37 = vadd.f32 %v884_v12, %v784_v13  ;;  %v870_v5 = vsub.f32 %v3176_v48, %v853_v38  ;;  %v108_v12 = vmul.f32 0.6931472, %v2339_v1  ;;  %vm3372_vm3 = vcmp.lt.f32.partialorder %v121_v10, 0.0004427343 }
 0x2a3   :  { %v415_v14 = vmax.f32 %v399_v55, 0.0  ;;  %v1377_v9 = vsub.f32 %v3192_v27, %v4564_v54  ;;  %v105_v11 = vsub.f32 %v101_v61, %v103_v24  ;;  %v3398_v54 = vadd.f32 %v411_v35, %v3333_v39  ;;  %v4569_v61 = vld [vmem:[#allocation87_spill] sm:$0xff] }
 0x2a4   :  { %4549 = vst [vmem:[#allocation29_spill] sm:$0xff] %v3346_v37  ;;  %v886_v43 = vmax.f32 %v870_v5, 0.0  ;;  %1052 = vperm.xlu0 %2328, %v4551_v56   ;;  %v117_v37 = vmul.f32 0.6931472, %v2341_v63  ;;  %v120_v5 = vmul.f32 %v4541_v2, %v119_v53  ;;  %v4561_v63 = vld [vmem:[#allocation78_spill] sm:$0xff]  ;;  %v4562_v2 = vld [vmem:[#allocation79_spill] sm:$0xff] }
 0x2a5   :  { %v3354_v13 = vpop.permute.xlu0 %1770  ;;  %v3356_v38 = vpop.permute.xlu1 %1466  ;;  %v283_v42 = vsub.f32 %v3159_v36, %v4561_v63  ;;  %v1375_v62 = vsub.f32 %v3192_v27, %v4562_v2  ;;  %v4563_v53 = vld [vmem:[#allocation37_spill] sm:$0xff]  ;;  %v114_v2 = vsel %vm3368_vm2, %v111_v22, %v108_v12  ;;  %v419_v24 = vmax.f32 %v403_v41, 0.0  ;;  %v4570_v12 = vld [vmem:[#allocation40_spill] sm:$0xff]  ;;  %v4579_v41 = vld [vmem:[#allocation42_spill] sm:$0xff] }
 0x2a6   :  { %4552 = vst [vmem:[#allocation21_spill] sm:$0xff] %v3354_v13  ;;  %4553 = vst [vmem:[#allocation22_spill] sm:$0xff] %v3356_v38  ;;  %v3359_v45 = vadd.f32 %v886_v43, %v786_v49  ;;  %v413_v49 = vmax.f32 %v397_v7, 0.0  ;;  %v4560_v43 = vld [vmem:[#allocation76_spill] sm:$0xff]  ;;  %v104_v7 = vsub.f32 %v100_v15, %v102_v8  ;;  %v123_v55 = vsel %vm3372_vm3, %v120_v5, %v117_v37  ;;  %v4568_v38 = vld [vmem:[#allocation85_spill] sm:$0xff] }
 0x2a7   :  { %v1373_v1 = vsub.f32 %v3192_v27, %v4560_v43  ;;  %v285_v15 = vsub.f32 %v3159_v36, %v4568_v38  ;;  %v401_v8 = vsub.f32 %v3148_v33, %v4569_v61  ;;  %v3406_v43 = vmax.f32 %v1370_v23, 0.0  ;;  %v4582_v23 = vld [vmem:[#allocation99_spill] sm:$0xff]  ;;  %v4586_v13 = vld [vmem:[#allocation101_spill] sm:$0xff] }
 0x2a8   :  { %4554 = vst [vmem:[#allocation64_spill] sm:$0xff] %v3359_v45  ;;  %1060 = vperm.xlu0 %2328, %v4563_v53   ;;  %v3400_v45 = vmax.f32 %v1267_v19, 0.0  ;;  %v429_v63 = vadd.f32 %v413_v49, %v297_v25  ;;  %v299_v59 = vmax.f32 %v283_v42, 0.0  ;;  %v3411_v37 = vmax.f32 %v1375_v62, 0.0  ;;  %v4573_v25 = vld [vmem:[#allocation84_spill] sm:$0xff] }
 0x2a9   :  { %v3385_v10 = vpop.permute.xlu0 %1782  ;;  %v3387_v16 = vpop.permute.xlu1 %1474  ;;  %v3409_v22 = vmax.f32 %v1373_v1, 0.0  ;;  %v124_v19 = vadd.f32 %v114_v2, %v104_v7  ;;  %v125_v38 = vadd.f32 %v123_v55, %v105_v11  ;;  %v3417_v29 = vmax.f32 %v1377_v9, 0.0  ;;  %v4574_v62 = vld [vmem:[#allocation92_spill] sm:$0xff]  ;;  %v4577_v7 = vld [vmem:[#allocation94_spill] sm:$0xff] }
 0x2aa   :  { %4565 = vst [vmem:[#allocation31_spill] sm:$0xff] %v3385_v10  ;;  %4566 = vst [vmem:[#allocation68_spill] sm:$0xff] %v3387_v16  ;;  %v431_v5 = vadd.f32 %v415_v14, %v299_v59  ;;  %v1379_v49 = vsub.f32 %v3192_v27, %v4573_v25  ;;  %v301_v1 = vmax.f32 %v285_v15, 0.0  ;;  %v417_v42 = vmax.f32 %v401_v8, 0.0  ;;  %v4575_v16 = vld [vmem:[#allocation88_spill] sm:$0xff]  ;;  %v4576_v14 = vld [vmem:[#allocation93_spill] sm:$0xff] }
 0x2ab   :  { %4567 = vst [vmem:[#allocation71_spill] sm:$0xff] %v3400_v45  ;;  %v287_v61 = vsub.f32 %v3159_v36, %v4574_v62  ;;  %v1381_v11 = vsub.f32 %v3192_v27, %v4575_v16  ;;  %v508_v9 = vsub.f32 %v3167_v3, %v4576_v14  ;;  %v511_v2 = vsub.f32 %v3167_v3, %v4577_v7  ;;  %v4578_v55 = vld [vmem:[#allocation98_spill] sm:$0xff]  ;;  %v4580_v25 = vld [vmem:[#allocation95_spill] sm:$0xff]  ;;  %v4581_v8 = vld [vmem:[#allocation97_spill] sm:$0xff] }
 0x2ac   :  { %1068 = vperm.xlu0 %2328, %v4570_v12   ;;  %v405_v59 = vsub.f32 %v3148_v33, %v4578_v55  ;;  %v513_v15 = vsub.f32 %v3167_v3, %v4580_v25  ;;  %v515_v62 = vsub.f32 %v3167_v3, %v4581_v8  ;;  %v517_v16 = vsub.f32 %v3167_v3, %v4582_v23  ;;  %v4585_v10 = vld [vmem:[#allocation100_spill] sm:$0xff] }
 0x2ad   :  { %v3413_v39 = vpop.permute.xlu0 %1790  ;;  %v3415_v35 = vpop.permute.xlu1 %1482  ;;  %v127_v14 = vadd.f32 %v125_v38, %v124_v19  ;;  %v519_v55 = vsub.f32 %v3167_v3, %v4585_v10  ;;  %v521_v33 = vsub.f32 %v3167_v3, %v4586_v13  ;;  %v2257_v23 = vld [vmem:[%s4272_s2] ss:$0 sm:$0xff]  ;;  %v3457_v8 = vmax.f32 %v1379_v49, 0.0  ;;  %s2452_s2 = smov [#allocation5]  }
 0x2ae   :  { %4571 = vst [vmem:[#allocation73_spill] sm:$0xff] %v3413_v39  ;;  %4572 = vst [vmem:[#allocation80_spill] sm:$0xff] %v3415_v35  ;;  %v4584_v39 = vld [vmem:[#allocation96_spill] sm:$0xff]  ;;  %v433_v19 = vadd.f32 %v417_v42, %v301_v1  ;;  %v303_v38 = vmax.f32 %v287_v61, 0.0  ;;  %v3461_v10 = vmax.f32 %v1381_v11, 0.0  ;;  %v527_v13 = vmax.f32 %v511_v2, 0.0 }
 0x2af   :  { %v289_v7 = vsub.f32 %v3159_v36, %v4584_v39  ;;  %4587 = vst [vmem:[#allocation72_spill] sm:$0xff] %v3457_v8  ;;  %v524_v36 = vmax.f32 %v508_v9, 0.0  ;;  %v421_v3 = vmax.f32 %v405_v59, 0.0  ;;  %v529_v25 = vmax.f32 %v513_v15, 0.0  ;;  %v4593_v59 = vld [vmem:[#allocation102_spill] sm:$0xff]  ;;  %s84_s15 = sshll.u32 %s2452_s2, 4  ;;  %s85_s15 = int_to_ptr.vmem [resolvable:$true] %s84_s15 }
 0x2b0   :  { %1076 = vperm.xlu0 %2328, %v4579_v41   ;;  %4588 = vst [vmem:[#allocation76_spill] sm:$0xff] %v3461_v10  ;;  %v4589_v41 = vld [vmem:[#allocation44_spill] sm:$0xff]  ;;  %v533_v6 = vmax.f32 %v517_v16, 0.0  ;;  %v2140_v53 = vmul.f32 %v2257_v23, %v127_v14  ;;  %v535_v8 = vmax.f32 %v519_v55, 0.0  ;;  %v537_v1 = vmax.f32 %v521_v33, 0.0  ;;  %v4613_v10 = vld [vmem:[#allocation143_spill] sm:$0xff] }
 0x2b1   :  { %v3442_v35 = vpop.permute.xlu0 %1798  ;;  %v305_v49 = vmax.f32 %v289_v7, 0.0  ;;  %v435_v2 = vadd.f32 %v419_v24, %v303_v38  ;;  %v1486_v15 = vsub.f32 %v3199_v58, %v4593_v59  ;;  %v540_v16 = vadd.f32 %v524_v36, %v3235_v60  ;;  %v4594_v7 = vld [vmem:[#allocation103_spill] sm:$0xff]  ;;  %v4595_v24 = vld [vmem:[#allocation108_spill] sm:$0xff] }
 0x2b2   :  { %4583 = vst [vmem:[#allocation34_spill] sm:$0xff] %v3442_v35  ;;  %v3452_v45 = vpop.permute.xlu1 %1542  ;;  %v531_v35 = vmax.f32 %v515_v62, 0.0  ;;  %v543_v14 = vadd.f32 %v527_v13, %v3398_v54  ;;  %v1489_v55 = vsub.f32 %v3199_v58, %v4594_v7  ;;  %v545_v23 = vadd.f32 %v529_v25, %v429_v63  ;;  %v4597_v36 = vld [vmem:[#allocation104_spill] sm:$0xff]  ;;  %v4598_v63 = vld [vmem:[#allocation105_spill] sm:$0xff]  ;;  %v4603_v7 = vld [vmem:[#allocation118_spill] sm:$0xff] }
 0x2b3   :  { %v437_v33 = vadd.f32 %v421_v3, %v305_v49  ;;  %v549_v9 = vadd.f32 %v533_v6, %v433_v19  ;;  %v624_v38 = vsub.f32 %v3170_v30, %v4595_v24  ;;  %v551_v62 = vadd.f32 %v535_v8, %v435_v2  ;;  %v4600_v8 = vld [vmem:[#allocation107_spill] sm:$0xff]  ;;  %v4601_v49 = vld [vmem:[#allocation114_spill] sm:$0xff]  ;;  %v4602_v2 = vld [vmem:[#allocation116_spill] sm:$0xff] }
 0x2b4   :  { %1084 = vperm.xlu0 %2328, %v4589_v41   ;;  %v547_v42 = vadd.f32 %v531_v35, %v431_v5  ;;  %v1491_v60 = vsub.f32 %v3199_v58, %v4597_v36  ;;  %v3491_v13 = vmax.f32 %v1486_v15, 0.0  ;;  %v1493_v6 = vsub.f32 %v3199_v58, %v4598_v63  ;;  %v4599_v35 = vld [vmem:[#allocation112_spill] sm:$0xff]  ;;  %v4604_v36 = vld [vmem:[#allocation119_spill] sm:$0xff] }
 0x2b5   :  { %v3464_v12 = vpop.permute.xlu0 %1806  ;;  %v553_v39 = vadd.f32 %v537_v1, %v437_v33  ;;  %v627_v5 = vsub.f32 %v3170_v30, %v4599_v35  ;;  %v3499_v25 = vmax.f32 %v1489_v55, 0.0  ;;  %v1495_v19 = vsub.f32 %v3199_v58, %v4600_v8  ;;  %v4605_v55 = vld [vmem:[#allocation137_spill] sm:$0xff]  ;;  %v4611_v41 = vld [vmem:[#allocation32_spill] sm:$0xff] }
 0x2b6   :  { %4590 = vst [vmem:[#allocation78_spill] sm:$0xff] %v3464_v12  ;;  %v3468_v61 = vpop.permute.xlu1 %1546  ;;  %v629_v1 = vsub.f32 %v3170_v30, %v4601_v49  ;;  %v631_v15 = vsub.f32 %v3170_v30, %v4602_v2  ;;  %v640_v33 = vmax.f32 %v624_v38, 0.0  ;;  %v633_v24 = vsub.f32 %v3170_v30, %v4603_v7  ;;  %v4607_v49 = vld [vmem:[#allocation120_spill] sm:$0xff]  ;;  %v4608_v2 = vld [vmem:[#allocation139_spill] sm:$0xff] }
 0x2b7   :  { %4591 = vst [vmem:[#allocation79_spill] sm:$0xff] %v3468_v61  ;;  %v635_v63 = vsub.f32 %v3170_v30, %v4604_v36  ;;  %v740_v35 = vsub.f32 %v3173_v40, %v4605_v55  ;;  %v3516_v8 = vmax.f32 %v1491_v60, 0.0  ;;  %v4609_v36 = vld [vmem:[#allocation109_spill] sm:$0xff]  ;;  %v643_v61 = vmax.f32 %v627_v5, 0.0 }
 0x2b8   :  { %2002 = vperm.xlu0 %2328, %v2527_v21   ;;  %v1497_v55 = vsub.f32 %v3199_v58, %v4609_v36  ;;  %v3532_v12 = vmax.f32 %v1495_v19, 0.0  ;;  %v4610_v21 = vld [vmem:[#allocation141_spill] sm:$0xff]  ;;  %v656_v38 = vadd.f32 %v640_v33, %v540_v16  ;;  %v747_v60 = vsub.f32 %v3173_v40, %v4613_v10  ;;  %v4626_v58 = vld [vmem:[#allocation154_spill] sm:$0xff] }
 0x2b9   :  { %v3483_v59 = vpop.permute.xlu0 %1814  ;;  %2141 = vadd.xlane.f32.xlu1 %v2140_v53  ;;  %v637_v53 = vsub.f32 %v3170_v30, %v4607_v49  ;;  %v645_v49 = vmax.f32 %v629_v1, 0.0  ;;  %v647_v30 = vmax.f32 %v631_v15, 0.0  ;;  %v756_v11 = vmax.f32 %v740_v35, 0.0 }
 0x2ba   :  { %4596 = vst [vmem:[#allocation82_spill] sm:$0xff] %v3483_v59  ;;  %v3489_v54 = vpop.permute.xlu1 %1554  ;;  %v3526_v59 = vmax.f32 %v1493_v6, 0.0  ;;  %v651_v6 = vmax.f32 %v635_v63, 0.0  ;;  %v3545_v15 = vmax.f32 %v1497_v55, 0.0  ;;  %v4616_v63 = vld [vmem:[#allocation138_spill] sm:$0xff]  ;;  %v4618_v55 = vld [vmem:[#allocation145_spill] sm:$0xff] }
 0x2bb   :  { %v653_v36 = vmax.f32 %v637_v53, 0.0  ;;  %v663_v53 = vadd.f32 %v647_v30, %v547_v42  ;;  %v859_v35 = vsub.f32 %v3176_v48, %v4616_v63  ;;  %v772_v57 = vadd.f32 %v756_v11, %v656_v38  ;;  %v4622_v38 = vld [vmem:[#allocation142_spill] sm:$0xff] }
 0x2bc   :  { %2014 = vperm.xlu0 %2328, %v2547_v28   ;;  %v743_v28 = vsub.f32 %v3173_v40, %v4608_v2  ;;  %v745_v2 = vsub.f32 %v3173_v40, %v4610_v21  ;;  %4614 = vst [vmem:[#allocation84_spill] sm:$0xff] %v3545_v15  ;;  %v659_v21 = vadd.f32 %v643_v61, %v543_v14  ;;  %v4619_v15 = vld [vmem:[#allocation140_spill] sm:$0xff] }
 0x2bd   :  { %v3514_v3 = vpop.permute.xlu0 %1822  ;;  %v749_v61 = vsub.f32 %v3173_v40, %v4618_v55  ;;  %v3556_v14 = vadd.f32 %v653_v36, %v553_v39  ;;  %v861_v33 = vsub.f32 %v3176_v48, %v4619_v15  ;;  %v4623_v36 = vld [vmem:[#allocation147_spill] sm:$0xff]  ;;  %v4625_v15 = vld [vmem:[#allocation144_spill] sm:$0xff] }
 0x2be   :  { %4606 = vst [vmem:[#allocation85_spill] sm:$0xff] %v3514_v3  ;;  %v3524_v7 = vpop.permute.xlu1 %1562  ;;  %v649_v3 = vmax.f32 %v633_v24, 0.0  ;;  %v759_v5 = vmax.f32 %v743_v28, 0.0  ;;  %v661_v24 = vadd.f32 %v645_v49, %v545_v23  ;;  %v761_v10 = vmax.f32 %v745_v2, 0.0  ;;  %v4617_v28 = vld [vmem:[#allocation35_spill] sm:$0xff]  ;;  %v4620_v2 = vld [vmem:[#allocation150_spill] sm:$0xff] }
 0x2bf   :  { %v763_v23 = vmax.f32 %v747_v60, 0.0  ;;  %v1088_v63 = vsub.f32 %v3189_v18, %v4620_v2  ;;  %v751_v60 = vsub.f32 %v3173_v40, %v4623_v36 }
 0x2c0   :  { %2022 = vperm.xlu0 %2328, %v4611_v41   ;;  %v4615_v41 = vld [vmem:[#allocation134_spill] sm:$0xff]  ;;  %v665_v19 = vadd.f32 %v649_v3, %v549_v9  ;;  %v875_v3 = vmax.f32 %v859_v35, 0.0  ;;  %v777_v39 = vadd.f32 %v761_v10, %v661_v24  ;;  %v1091_v35 = vsub.f32 %v3189_v18, %v4626_v58 }
 0x2c1   :  { %v3537_v27 = vpop.permute.xlu0 %1830  ;;  %v856_v16 = vsub.f32 %v3176_v48, %v4615_v41  ;;  %v775_v41 = vadd.f32 %v759_v5, %v659_v21  ;;  %v4621_v9 = vld [vmem:[#allocation170_spill] sm:$0xff]  ;;  %v865_v21 = vsub.f32 %v3176_v48, %v4625_v15  ;;  %v779_v2 = vadd.f32 %v763_v23, %v663_v53 }
 0x2c2   :  { %4612 = vst [vmem:[#allocation87_spill] sm:$0xff] %v3537_v27  ;;  %v3543_v1 = vpop.permute.xlu1 %1570  ;;  %v667_v27 = vadd.f32 %v651_v6, %v551_v62  ;;  %v863_v6 = vsub.f32 %v3176_v48, %v4622_v38  ;;  %v4624_v5 = vld [vmem:[#allocation38_spill] sm:$0xff]  ;;  %v1104_v38 = vmax.f32 %v1088_v63, 0.0  ;;  %v767_v53 = vmax.f32 %v751_v60, 0.0 }
 0x2c3   :  { %v872_v49 = vmax.f32 %v856_v16, 0.0  ;;  %v765_v16 = vmax.f32 %v749_v61, 0.0  ;;  %v891_v10 = vadd.f32 %v875_v3, %v775_v41  ;;  %v881_v41 = vmax.f32 %v865_v21, 0.0  ;;  %v4630_v61 = vld [vmem:[#allocation27_spill] sm:$0xff] }
 0x2c4   :  { %2030 = vperm.xlu0 %2328, %v4617_v28   ;;  %v1107_v15 = vmax.f32 %v1091_v35, 0.0  ;;  %v4631_v35 = vld [vmem:[#allocation148_spill] sm:$0xff] }
 0x2c5   :  { %v888_v28 = vadd.f32 %v872_v49, %v772_v57  ;;  %v879_v57 = vmax.f32 %v863_v6, 0.0  ;;  %v4627_v49 = vld [vmem:[#allocation146_spill] sm:$0xff]  ;;  %v781_v23 = vadd.f32 %v765_v16, %v665_v19 }
 0x2c6   :  { %v913_v30 = vpop.permute.xlu0 %912  ;;  %v3560_v42 = vpop.permute.xlu1 %1578 }
 0x2c7   :  { %v972_v62 = vsub.f32 %v4621_v9, %v913_v30  ;;  %v877_v30 = vmax.f32 %v861_v33, 0.0  ;;  %v867_v33 = vsub.f32 %v3176_v48, %v4627_v49  ;;  %v895_v60 = vadd.f32 %v879_v57, %v779_v2 }
 0x2c8   :  { %2038 = vperm.xlu0 %2328, %v4624_v5  }
 0x2c9   :  { %v988_v55 = vmax.f32 %v972_v62, 0.0  ;;  %v893_v58 = vadd.f32 %v877_v30, %v777_v39  ;;  %v883_v16 = vmax.f32 %v867_v33, 0.0  ;;  %v783_v30 = vadd.f32 %v767_v53, %v667_v27 }
 0x2ca   :  { %v925_v24 = vpop.permute.xlu0 %924  ;;  %v3576_v11 = vpop.permute.xlu1 %1586  ;;  %908 = vperm.xlu1 %2327, %v2525_v20   ;;  %v4628_v20 = vld [vmem:[#allocation149_spill] sm:$0xff]  ;;  %v4634_v27 = vsub.f32 %v3202_v32, %v3452_v45 }
 0x2cb   :  { %v1004_v36 = vadd.f32 %v988_v55, %v888_v28  ;;  %v975_v5 = vsub.f32 %v4621_v9, %v925_v24  ;;  %v753_v63 = vsub.f32 %v3173_v40, %v4628_v20  ;;  %v4629_v28 = vld [vmem:[#allocation156_spill] sm:$0xff] }
 0x2cc   :  { %2046 = vperm.xlu0 %2328, %v2599_v44   ;;  %v1093_v55 = vsub.f32 %v3189_v18, %v4629_v28  ;;  %v1618_v33 = vmax.f32 %v4634_v27, 0.0 }
 0x2cd   :  { %v1120_v62 = vadd.f32 %v1104_v38, %v1004_v36  ;;  %v991_v3 = vmax.f32 %v975_v5, 0.0  ;;  %v869_v38 = vsub.f32 %v3176_v48, %v4631_v35  ;;  %v4632_v36 = vld [vmem:[#allocation151_spill] sm:$0xff]  ;;  %v769_v57 = vmax.f32 %v753_v63, 0.0  ;;  %v4635_v63 = vld [vmem:[#allocation153_spill] sm:$0xff] }
 0x2ce   :  { %v933_v24 = vpop.permute.xlu0 %932  ;;  %v3589_v6 = vpop.permute.xlu1 %1594  ;;  %916 = vperm.xlu1 %2327, %v4630_v61   ;;  %v1718_v5 = vsub.f32 %v3208_v31, %v4632_v36  ;;  %v1109_v49 = vmax.f32 %v1093_v55, 0.0  ;;  %v1721_v28 = vsub.f32 %v3208_v31, %v4635_v63  ;;  %v899_v55 = vadd.f32 %v883_v16, %v783_v30  ;;  %v4637_v36 = vld [vmem:[#allocation161_spill] sm:$0xff]  ;;  %v4644_v35 = vld [vmem:[#allocation159_spill] sm:$0xff] }
 0x2cf   :  { %v1286_v44 = vadd.f32 %v3229_v0, %v1120_v62  ;;  %v1007_v39 = vadd.f32 %v991_v3, %v891_v10  ;;  %v977_v19 = vsub.f32 %v4621_v9, %v933_v24  ;;  %v1615_v21 = vsub.f32 %v3202_v32, %v3589_v6  ;;  %v4633_v62 = vld [vmem:[#allocation158_spill] sm:$0xff] }
 0x2d0   :  { %2054 = vperm.xlu0 %2328, %v2611_v47   ;;  %v897_v10 = vadd.f32 %v881_v41, %v781_v23  ;;  %v1095_v3 = vsub.f32 %v3189_v18, %v4633_v62  ;;  %v1734_v23 = vmax.f32 %v1718_v5, 0.0  ;;  %v1097_v5 = vsub.f32 %v3189_v18, %v4637_v36 }
 0x2d1   :  { %v1402_v2 = vadd.f32 %v3406_v43, %v1286_v44  ;;  %v1123_v61 = vadd.f32 %v1107_v15, %v1007_v39  ;;  %v993_v0 = vmax.f32 %v977_v19, 0.0  ;;  %v785_v44 = vadd.f32 %v769_v57, %v3556_v14  ;;  %v4636_v39 = vld [vmem:[#allocation155_spill] sm:$0xff] }
 0x2d2   :  { %v941_v53 = vpop.permute.xlu0 %940  ;;  %920 = vperm.xlu1 %2327, %v4536_v51   ;;  %v1111_v19 = vmax.f32 %v1095_v3, 0.0  ;;  %v1263_v14 = vsub.f32 %v3156_v46, %v3217_v4  ;;  %v1113_v27 = vmax.f32 %v1097_v5, 0.0  ;;  %v4640_v4 = vsub.f32 %v3202_v32, %v3524_v7  ;;  %v4643_v5 = vld [vmem:[#allocation37_spill] sm:$0xff] }
 0x2d3   :  { %v1289_v20 = vadd.f32 %v3237_v17, %v1123_v61  ;;  %v1009_v47 = vadd.f32 %v993_v0, %v893_v58  ;;  %v979_v43 = vsub.f32 %v4621_v9, %v941_v53  ;;  %v3610_v15 = vpop.permute.xlu1 %1654  ;;  %v1518_v41 = vadd.f32 %v3491_v13, %v1402_v2 }
 0x2d4   :  { %2062 = vperm.xlu0 %2328, %v2622_v50   ;;  %v1723_v13 = vsub.f32 %v3208_v31, %v4636_v39  ;;  %v4638_v0 = vsub.f32 %v3202_v32, %v3489_v54 }
 0x2d5   :  { %v1405_v51 = vadd.f32 %v3409_v22, %v1289_v20  ;;  %v1125_v17 = vadd.f32 %v1109_v49, %v1009_v47  ;;  %v995_v58 = vmax.f32 %v979_v43, 0.0  ;;  %v1634_v24 = vadd.f32 %v1618_v33, %v1518_v41  ;;  %v4639_v33 = vld [vmem:[#allocation163_spill] sm:$0xff] }
 0x2d6   :  { %v949_v2 = vpop.permute.xlu0 %948  ;;  %928 = vperm.xlu1 %2327, %v4544_v52   ;;  %v1621_v57 = vmax.f32 %v4638_v0, 0.0  ;;  %v1099_v53 = vsub.f32 %v3189_v18, %v4639_v33  ;;  %v1623_v20 = vmax.f32 %v4640_v4, 0.0  ;;  %v1739_v63 = vmax.f32 %v1723_v13, 0.0  ;;  %v4642_v13 = vld [vmem:[#allocation167_spill] sm:$0xff] }
 0x2d7   :  { %v1291_v50 = vadd.f32 %v3248_v34, %v1125_v17  ;;  %v1011_v16 = vadd.f32 %v995_v58, %v895_v60  ;;  %v981_v22 = vsub.f32 %v4621_v9, %v949_v2  ;;  %v3627_v30 = vpop.permute.xlu1 %1662  ;;  %v3629_v61 = vadd.f32 %v1734_v23, %v1634_v24 }
 0x2d8   :  { %v1521_v52 = vadd.f32 %v3499_v25, %v1405_v51  ;;  %v1737_v34 = vmax.f32 %v1721_v28, 0.0  ;;  %v1279_v28 = vmax.f32 %v1263_v14, 0.0  ;;  %v4645_v14 = vsub.f32 %v3202_v32, %v3543_v1  ;;  %v4648_v1 = vld [vmem:[#allocation40_spill] sm:$0xff] }
 0x2d9   :  { %v1407_v60 = vadd.f32 %v3411_v37, %v1291_v50  ;;  %v1127_v62 = vadd.f32 %v1111_v19, %v1011_v16  ;;  %v997_v3 = vmax.f32 %v981_v22, 0.0  ;;  %v1101_v19 = vsub.f32 %v3189_v18, %v4642_v13 }
 0x2da   :  { %v957_v54 = vpop.permute.xlu0 %956  ;;  %936 = vperm.xlu1 %2327, %v4551_v56   ;;  %v1637_v47 = vadd.f32 %v1621_v57, %v1521_v52  ;;  %v1625_v0 = vmax.f32 %v4645_v14, 0.0 }
 0x2db   :  { %v1293_v43 = vadd.f32 %v3319_v26, %v1127_v62  ;;  %v1013_v25 = vadd.f32 %v997_v3, %v897_v10  ;;  %v983_v41 = vsub.f32 %v4621_v9, %v957_v54  ;;  %v3648_v37 = vpop.permute.xlu1 %1666  ;;  %v1523_v23 = vadd.f32 %v3516_v8, %v1407_v60  ;;  %v4641_v10 = vld [vmem:[#allocation157_spill] sm:$0xff] }
 0x2dc   :  { %v3653_v7 = vadd.f32 %v1737_v34, %v1637_v47  ;;  %v885_v26 = vmax.f32 %v869_v38, 0.0  ;;  %v1725_v39 = vsub.f32 %v3208_v31, %v4641_v10  ;;  %v1115_v8 = vmax.f32 %v1099_v53, 0.0  ;;  %v4646_v34 = vld [vmem:[#allocation72_spill] sm:$0xff]  ;;  %v4649_v47 = vld [vmem:[#allocation63_spill] sm:$0xff] }
 0x2dd   :  { %v1409_v17 = vadd.f32 %v3417_v29, %v1293_v43  ;;  %v1129_v56 = vadd.f32 %v1113_v27, %v1013_v25  ;;  %v999_v58 = vmax.f32 %v983_v41, 0.0  ;;  %v1639_v24 = vadd.f32 %v1623_v20, %v1523_v23  ;;  %v4654_v10 = vld [vmem:[#allocation76_spill] sm:$0xff] }
 0x2de   :  { %v965_v36 = vpop.permute.xlu0 %964  ;;  %944 = vperm.xlu1 %2327, %v4643_v5   ;;  %v1727_v38 = vsub.f32 %v3208_v31, %v4644_v35  ;;  %v901_v62 = vadd.f32 %v885_v26, %v785_v44  ;;  %v1741_v27 = vmax.f32 %v1725_v39, 0.0  ;;  %v1117_v33 = vmax.f32 %v1101_v19, 0.0  ;;  %v4655_v19 = vld [vmem:[#allocation172_spill] sm:$0xff]  ;;  %v4659_v35 = vld [vmem:[#allocation42_spill] sm:$0xff] }
 0x2df   :  { %v1295_v2 = vadd.f32 %v1279_v28, %v1129_v56  ;;  %v1015_v50 = vadd.f32 %v999_v58, %v899_v55  ;;  %v985_v29 = vsub.f32 %v4621_v9, %v965_v36  ;;  %v3665_v16 = vpop.permute.xlu1 %1674  ;;  %v3667_v22 = vadd.f32 %v1739_v63, %v1639_v24  ;;  %v4651_v63 = vld [vmem:[#allocation111_spill] sm:$0xff]  ;;  %v4652_v28 = vld [vmem:[#allocation173_spill] sm:$0xff]  ;;  %v4653_v24 = vld [vmem:[#allocation162_spill] sm:$0xff] }
 0x2e0   :  { %v1525_v52 = vadd.f32 %v3526_v59, %v1409_v17  ;;  %v4647_v53 = vsub.f32 %v3202_v32, %v3560_v42  ;;  %v4650_v59 = vld [vmem:[#allocation175_spill] sm:$0xff]  ;;  %v1499_v17 = vsub.f32 %v4652_v28, %v4651_v63  ;;  %v1743_v42 = vmax.f32 %v1727_v38, 0.0  ;;  %v4656_v36 = vld [vmem:[#allocation90_spill] sm:$0xff] }
 0x2e1   :  { %v1411_v55 = vadd.f32 %v4646_v34, %v1295_v2  ;;  %v1131_v60 = vadd.f32 %v1115_v8, %v1015_v50  ;;  %v1001_v3 = vmax.f32 %v985_v29, 0.0  ;;  %v1729_v26 = vsub.f32 %v3208_v31, %v4653_v24  ;;  %v4660_v38 = vld [vmem:[#allocation71_spill] sm:$0xff] }
 0x2e2   :  { %v1627_v4 = vmax.f32 %v4647_v53, 0.0  ;;  %v3681_v20 = vpop.permute.xlu0 %1890  ;;  %952 = vperm.xlu1 %2327, %v4648_v1   ;;  %v1641_v54 = vadd.f32 %v1625_v0, %v1525_v52  ;;  %v4657_v5 = vsub.f32 %v4655_v19, %v4656_v36  ;;  %v4658_v2 = vsub.f32 %v3202_v32, %v3576_v11  ;;  %v4663_v1 = vld [vmem:[#allocation44_spill] sm:$0xff] }
 0x2e3   :  { %v1297_v43 = vadd.f32 %v4649_v47, %v1131_v60  ;;  %v1017_v25 = vadd.f32 %v1001_v3, %v901_v62  ;;  %v1950_v41 = vsub.f32 %v4650_v59, %v3681_v20  ;;  %v3687_v23 = vpop.permute.xlu1 %1682  ;;  %v1527_v44 = vadd.f32 %v3532_v12, %v1411_v55  ;;  %v4661_v55 = vld [vmem:[#allocation84_spill] sm:$0xff] }
 0x2e4   :  { %v3694_v58 = vadd.f32 %v1741_v27, %v1641_v54  ;;  %v1399_v12 = vmax.f32 %v4657_v5, 0.0  ;;  %v1629_v50 = vmax.f32 %v4658_v2, 0.0  ;;  %v1515_v62 = vmax.f32 %v1499_v17, 0.0  ;;  %v4662_v27 = vld [vmem:[#allocation164_spill] sm:$0xff] }
 0x2e5   :  { %v1413_v39 = vadd.f32 %v4654_v10, %v1297_v43  ;;  %v1133_v8 = vadd.f32 %v1117_v33, %v1017_v25  ;;  %v1643_v13 = vadd.f32 %v1627_v4, %v1527_v44  ;;  %v1745_v3 = vmax.f32 %v1729_v26, 0.0  ;;  %v4666_v26 = vld [vmem:[#allocation25_spill] sm:$0xff] }
 0x2e6   :  { %v3705_v29 = vpop.permute.xlu0 %1898  ;;  %960 = vperm.xlu1 %2327, %v4659_v35   ;;  %v1731_v33 = vsub.f32 %v3208_v31, %v4662_v27  ;;  %v1631_v54 = vmax.f32 %v1615_v21, 0.0 }
 0x2e7   :  { %v1299_v14 = vadd.f32 %v4660_v38, %v1133_v8  ;;  %v3711_v52 = vpop.permute.xlu1 %1690  ;;  %v3713_v34 = vadd.f32 %v1743_v42, %v1643_v13  ;;  %v1529_v60 = vadd.f32 %v4661_v55, %v1413_v39  ;;  %v4668_v13 = vld [vmem:[#allocation28_spill] sm:$0xff] }
 0x2e8   :  { %v1747_v17 = vmax.f32 %v1731_v33, 0.0  ;;  %v4674_v33 = vld [vmem:[#allocation26_spill] sm:$0xff] }
 0x2e9   :  { %v1415_v53 = vadd.f32 %v1399_v12, %v1299_v14  ;;  %v1645_v4 = vadd.f32 %v1629_v50, %v1529_v60  ;;  %v4671_v50 = vld [vmem:[#allocation41_spill] sm:$0xff]  ;;  %v4672_v14 = vld [vmem:[#allocation174_spill] sm:$0xff] }
 0x2ea   :  { %v1903_v20 = vpop.permute.xlu0 %1902  ;;  %968 = vperm.xlu1 %2327, %v4663_v1  }
 0x2eb   :  { %v1953_v47 = vsub.f32 %v4650_v59, %v1903_v20  ;;  %v3725_v43 = vpop.permute.xlu1 %1698  ;;  %v3727_v25 = vadd.f32 %v1745_v3, %v1645_v4  ;;  %v1531_v44 = vadd.f32 %v1515_v62, %v1415_v53  ;;  %v4673_v62 = vmov 7  }
 0x2ec   :  { %4664 = vst [vmem:[#allocation92_spill] sm:$0xff] %v3725_v43  ;;  %v1966_v4 = vmax.f32 %v1950_v41, 0.0 }
 0x2ed   :  { %v1647_v42 = vadd.f32 %v1631_v54, %v1531_v44 }
 0x2ee   :  { %v3731_v24 = vpop.permute.xlu0 %1906  ;;  %1886 = vperm.xlu1 %2327, %v4666_v26  }
 0x2ef   :  { %4665 = vst [vmem:[#allocation88_spill] sm:$0xff] %v3731_v24  ;;  %v3736_v21 = vpop.permute.xlu1 %1706  ;;  %v3738_v10 = vadd.f32 %v1747_v17, %v1647_v42 }
 0x2f0   :  { %4667 = vst [vmem:[#allocation93_spill] sm:$0xff] %v3736_v21 }
 0x2f2   :  { %v1911_v8 = vpop.permute.xlu0 %1910  ;;  %1894 = vperm.xlu1 %2327, %v4668_v13  }
 0x2f3   :  { %v1955_v36 = vsub.f32 %v4650_v59, %v1911_v8  ;;  %v3744_v5 = vpop.permute.xlu1 %1714 }
 0x2f4   :  { %4669 = vst [vmem:[#allocation94_spill] sm:$0xff] %v3744_v5 }
 0x2f6   :  { %v3748_v2 = vpop.permute.xlu0 %1914  ;;  %1934 = vperm.xlu1 %2327, %v4671_v50  }
 0x2f7   :  { %4670 = vst [vmem:[#allocation98_spill] sm:$0xff] %v3748_v2 }
 0x2f8   :  { %v1775_v38 = vpop.permute.xlu1 %1774 }
 0x2f9   :  { %v1834_v55 = vsub.f32 %v4672_v14, %v1775_v38 }
 0x2fa   :  { %v1919_v60 = vpop.permute.xlu0 %1918  ;;  %2329 = vset.pattern.permute.xlu1 %v4673_v62 }
 0x2fb   :  { %v1850_v3 = vmax.f32 %v1834_v55, 0.0  ;;  %v1957_v27 = vsub.f32 %v4650_v59, %v1919_v60  ;;  %2006 = vperm.xlu1 %2329, %v4674_v33   ;;  %v1969_v60 = vmax.f32 %v1953_v47, 0.0 }
 0x2fc   :  { %v3757_v53 = vpop.permute.xlu1 %1778 }
 0x2fd   :  { %v1866_v20 = vadd.f32 %v1850_v3, %v3629_v61  ;;  %v4677_v61 = vld [vmem:[#allocation30_spill] sm:$0xff] }
 0x2fe   :  { %v3762_v54 = vpop.permute.xlu0 %1922 }
 0x2ff   :  { %4675 = vst [vmem:[#allocation95_spill] sm:$0xff] %v3762_v54  ;;  %2010 = vperm.xlu1 %2329, %v4668_v13   ;;  %v3767_v17 = vadd.f32 %v1966_v4, %v1866_v20  ;;  %v4679_v20 = vld [vmem:[#allocation33_spill] sm:$0xff] }
 0x300   :  { %v1787_v42 = vpop.permute.xlu1 %1786 }
 0x301   :  { %4676 = vst [vmem:[#allocation97_spill] sm:$0xff] %v3767_v17  ;;  %v1837_v26 = vsub.f32 %v4672_v14, %v1787_v42 }
 0x302   :  { %v1927_v8 = vpop.permute.xlu0 %1926 }
 0x303   :  { %v1853_v38 = vmax.f32 %v1837_v26, 0.0  ;;  %v1959_v41 = vsub.f32 %v4650_v59, %v1927_v8  ;;  %2018 = vperm.xlu1 %2329, %v4677_v61   ;;  %v1971_v8 = vmax.f32 %v1955_v36, 0.0 }
 0x304   :  { %v1795_v55 = vpop.permute.xlu1 %1794 }
 0x305   :  { %v1869_v62 = vadd.f32 %v1853_v38, %v3653_v7  ;;  %v1839_v3 = vsub.f32 %v4672_v14, %v1795_v55  ;;  %v4682_v55 = vld [vmem:[#allocation36_spill] sm:$0xff]  ;;  %v1975_v38 = vmax.f32 %v1959_v41, 0.0 }
 0x306   :  { %v3774_v33 = vpop.permute.xlu0 %1930 }
 0x307   :  { %4678 = vst [vmem:[#allocation99_spill] sm:$0xff] %v3774_v33  ;;  %v1855_v13 = vmax.f32 %v1839_v3, 0.0  ;;  %2026 = vperm.xlu1 %2329, %v4679_v20   ;;  %v3779_v42 = vadd.f32 %v1969_v60, %v1869_v62  ;;  %v1973_v20 = vmax.f32 %v1957_v27, 0.0 }
 0x308   :  { %v1803_v26 = vpop.permute.xlu1 %1802 }
 0x309   :  { %4680 = vst [vmem:[#allocation96_spill] sm:$0xff] %v3779_v42  ;;  %v1871_v61 = vadd.f32 %v1855_v13, %v3667_v22  ;;  %v1841_v47 = vsub.f32 %v4672_v14, %v1803_v26  ;;  %v4684_v26 = vld [vmem:[#allocation39_spill] sm:$0xff] }
 0x30a   :  { %v3783_v12 = vpop.permute.xlu0 %1938 }
 0x30b   :  { %4681 = vst [vmem:[#allocation100_spill] sm:$0xff] %v3783_v12  ;;  %v1857_v7 = vmax.f32 %v1841_v47, 0.0  ;;  %2034 = vperm.xlu1 %2329, %v4682_v55   ;;  %v3788_v3 = vadd.f32 %v1971_v8, %v1871_v61 }
 0x30c   :  { %v1811_v4 = vpop.permute.xlu1 %1810 }
 0x30d   :  { %4683 = vst [vmem:[#allocation101_spill] sm:$0xff] %v3788_v3  ;;  %v1873_v60 = vadd.f32 %v1857_v7, %v3694_v58  ;;  %v1843_v36 = vsub.f32 %v4672_v14, %v1811_v4 }
 0x30e   :  { %v1943_v62 = vpop.permute.xlu0 %1942 }
 0x30f   :  { %v1859_v22 = vmax.f32 %v1843_v36, 0.0  ;;  %v1963_v13 = vsub.f32 %v4650_v59, %v1943_v62  ;;  %2042 = vperm.xlu1 %2329, %v4684_v26   ;;  %v3794_v47 = vadd.f32 %v1973_v20, %v1873_v60  ;;  %v4688_v20 = vld [vmem:[#allocation43_spill] sm:$0xff] }
 0x310   :  { %v1819_v39 = vpop.permute.xlu1 %1818 }
 0x311   :  { %4685 = vst [vmem:[#allocation102_spill] sm:$0xff] %v3794_v47  ;;  %v1875_v55 = vadd.f32 %v1859_v22, %v3713_v34  ;;  %v1845_v8 = vsub.f32 %v4672_v14, %v1819_v39  ;;  %v1979_v41 = vmax.f32 %v1963_v13, 0.0 }
 0x312   :  { %v3806_v60 = vpop.permute.xlu0 %1946 }
 0x313   :  { %v1861_v61 = vmax.f32 %v1845_v8, 0.0  ;;  %2050 = vperm.xlu1 %2329, %v4671_v50   ;;  %v3799_v58 = vadd.f32 %v1975_v38, %v1875_v55  ;;  %4689 = vst [vmem:[#allocation104_spill] sm:$0xff] %v3806_v60 }
 0x314   :  { %v1827_v27 = vpop.permute.xlu1 %1826 }
 0x315   :  { %4686 = vst [vmem:[#allocation103_spill] sm:$0xff] %v3799_v58  ;;  %v3802_v4 = vadd.f32 %v1861_v61, %v3727_v25  ;;  %v1847_v7 = vsub.f32 %v4672_v14, %v1827_v27 }
 0x317   :  { %4687 = vst [vmem:[#allocation108_spill] sm:$0xff] %v3802_v4  ;;  %v1863_v36 = vmax.f32 %v1847_v7, 0.0  ;;  %2058 = vperm.xlu1 %2329, %v4688_v20  }
 0x319   :  { %v1879_v34 = vadd.f32 %v1863_v36, %v3738_v10 }
 0x31b   :  { %v3809_v39 = vadd.f32 %v1979_v41, %v1879_v34 }
 0x31d   :  { %4690 = vst [vmem:[#allocation105_spill] sm:$0xff] %v3809_v39 }
 0x31e   :  { %2397 = shalt.err (!%p2394_p4)  }
 0x31f   :  { %s2398_s23 = scalar_lea.vmem %s85_s15, 2048  ;;  %p2403_p6 = scmp.lt.s32.totalorder %s85_s15, %s85_s15 }
 0x320   :  { %p2399_p5 = scmp.ne.s32.totalorder %s85_s15, %s2398_s23  ;;  %p2404_p7 = scmp.lt.s32.totalorder %s2398_s23, %s2398_s23 }
 0x322   :  { %p2405_p8 = por %p2404_p7, %p2403_p6 }
 0x324   :  { %p2406_p9 = pnand %p2405_p8, %p2399_p5 }
 0x326   :  { %2409 = shalt.err (!%p2406_p9)  }
 0x327   :  { %87 = dma.hbm_to_vmem [thread:$0]  %s4273_s3, 2048, %s85_s15, [#allocation6]  ;;  %v3823_v25 = vpop.permute.xlu0 %1024  ;;  %v4691_v50 = vld [vmem:[#allocation45_spill] sm:$0xff]  ;;  %v4693_v22 = vld [vmem:[#allocation46_spill] sm:$0xff]  ;;  %v4695_v55 = vld [vmem:[#allocation48_spill] sm:$0xff] }
 0x328   :  { %v4692_v38 = vld [vmem:[#allocation165_spill] sm:$0xff]  ;;  %v4694_v13 = vld [vmem:[#allocation166_spill] sm:$0xff]  ;;  %v4696_v8 = vld [vmem:[#allocation168_spill] sm:$0xff] }
 0x329   :  { %v391_v62 = vsub.f32 %v4692_v38, %v4691_v50  ;;  %v275_v26 = vsub.f32 %v4694_v13, %v4693_v22  ;;  %v507_v61 = vsub.f32 %v4696_v8, %v4695_v55  ;;  %v4697_v41 = vld [vmem:[#allocation47_spill] sm:$0xff]  ;;  %v4698_v44 = vld [vmem:[#allocation53_spill] sm:$0xff]  ;;  %v4701_v55 = vld [vmem:[#allocation54_spill] sm:$0xff] }
 0x32a   :  { %v1253_v34 = vsub.f32 %v3156_v46, %v4697_v41  ;;  %v393_v63 = vsub.f32 %v4692_v38, %v4698_v44  ;;  %v4699_v6 = vld [vmem:[#allocation51_spill] sm:$0xff]  ;;  %v4700_v1 = vld [vmem:[#allocation57_spill] sm:$0xff]  ;;  %v4704_v56 = vld [vmem:[#allocation160_spill] sm:$0xff] }
 0x32b   :  { %v3825_v10 = vpop.permute.xlu0 %1036  ;;  %v407_v7 = vmax.f32 %v391_v62, 0.0  ;;  %v291_v36 = vmax.f32 %v275_v26, 0.0  ;;  %v523_v20 = vmax.f32 %v507_v61, 0.0  ;;  %v277_v50 = vsub.f32 %v4694_v13, %v4699_v6  ;;  %v4702_v26 = vld [vmem:[#allocation56_spill] sm:$0xff]  ;;  %v4703_v0 = vld [vmem:[#allocation67_spill] sm:$0xff]  ;;  %v4708_v49 = vld [vmem:[#allocation49_spill] sm:$0xff] }
 0x32c   :  { %v394_v22 = vsub.f32 %v4692_v38, %v4700_v1  ;;  %v509_v62 = vsub.f32 %v4696_v8, %v4701_v55  ;;  %v278_v61 = vsub.f32 %v4694_v13, %v4702_v26  ;;  %v396_v41 = vsub.f32 %v4692_v38, %v4703_v0  ;;  %v4707_v1 = vld [vmem:[#allocation59_spill] sm:$0xff]  ;;  %v4709_v26 = vld [vmem:[#allocation65_spill] sm:$0xff]  ;;  %v4711_v38 = vld [vmem:[#allocation50_spill] sm:$0xff] }
 0x32d   :  { %v423_v35 = vadd.f32 %v407_v7, %v291_v36  ;;  %v4705_v44 = vsub.s32 7, %v4704_v56  ;;  %v4706_v7 = vld [vmem:[#allocation24_spill] sm:$0xff]  ;;  %v3858_v57 = vmax.f32 %v1253_v34, 0.0  ;;  %v510_v51 = vsub.f32 %v4696_v8, %v4707_v1  ;;  %v4710_v0 = vld [vmem:[#allocation69_spill] sm:$0xff]  ;;  %v4713_v1 = vld [vmem:[#allocation55_spill] sm:$0xff] }
 0x32e   :  { %v1255_v55 = vsub.f32 %v3156_v46, %v4708_v49  ;;  %v409_v45 = vmax.f32 %v393_v63, 0.0  ;;  %v280_v39 = vsub.f32 %v4694_v13, %v4709_v26  ;;  %v512_v56 = vsub.f32 %v4696_v8, %v4710_v0  ;;  %v4714_v3 = vld [vmem:[#allocation58_spill] sm:$0xff]  ;;  %v4715_v42 = vld [vmem:[#allocation60_spill] sm:$0xff]  ;;  %v4735_v5 = vld [vmem:[#allocation89_spill] sm:$0xff] }
 0x32f   :  { %v3833_v27 = vpop.permute.xlu0 %1044  ;;  %v3854_v36 = vrot.slane %v4706_v7, %v4705_v44  ;;  %v3856_v6 = vadd.f32 %v523_v20, %v423_v35  ;;  %v1256_v44 = vsub.f32 %v3156_v46, %v4711_v38  ;;  %v293_v35 = vmax.f32 %v277_v50, 0.0  ;;  %v4712_v20 = vld [vmem:[#allocation52_spill] sm:$0xff]  ;;  %v4716_v0 = vld [vmem:[#allocation62_spill] sm:$0xff] }
 0x330   :  { %v1258_v34 = vsub.f32 %v3156_v46, %v4712_v20  ;;  %v410_v7 = vmax.f32 %v394_v22, 0.0  ;;  %v525_v58 = vmax.f32 %v509_v62, 0.0  ;;  %v1260_v47 = vsub.f32 %v3156_v46, %v4713_v1  ;;  %v4717_v62 = vld [vmem:[#allocation66_spill] sm:$0xff] }
 0x331   :  { %v294_v49 = vmax.f32 %v278_v61, 0.0  ;;  %v412_v63 = vmax.f32 %v396_v41, 0.0  ;;  %v1262_v13 = vsub.f32 %v3156_v46, %v4714_v3  ;;  %v526_v26 = vmax.f32 %v510_v51, 0.0  ;;  %v4718_v51 = vld [vmem:[#allocation70_spill] sm:$0xff] }
 0x332   :  { %v1264_v8 = vsub.f32 %v3156_v46, %v4715_v42  ;;  %v1266_v50 = vsub.f32 %v3156_v46, %v4716_v0  ;;  %v425_v20 = vadd.f32 %v409_v45, %v293_v35  ;;  %v296_v22 = vmax.f32 %v280_v39, 0.0  ;;  %v4736_v21 = vld [vmem:[#allocation122_spill] sm:$0xff] }
 0x333   :  { %v3843_v11 = vpop.permute.xlu0 %1052  ;;  %v1268_v17 = vsub.f32 %v3156_v46, %v4717_v62  ;;  %v528_v1 = vmax.f32 %v512_v56, 0.0  ;;  %v3884_v61 = vmax.f32 %v1255_v55, 0.0  ;;  %v3886_v41 = vmax.f32 %v1256_v44, 0.0  ;;  %v4723_v44 = vld [vmem:[#allocation74_spill] sm:$0xff] }
 0x334   :  { %v426_v3 = vadd.f32 %v410_v7, %v294_v49  ;;  %v1369_v4 = vsub.f32 %v4655_v19, %v4718_v51  ;;  %v3890_v42 = vmax.f32 %v1258_v34, 0.0  ;;  %v541_v12 = vadd.f32 %v525_v58, %v425_v20  ;;  %v4724_v49 = vld [vmem:[#allocation113_spill] sm:$0xff] }
 0x335   :  { %v3892_v0 = vmax.f32 %v1260_v47, 0.0  ;;  %v428_v60 = vadd.f32 %v412_v63, %v296_v22  ;;  %v3894_v45 = vmax.f32 %v1262_v13, 0.0  ;;  %v3896_v35 = vmax.f32 %v1264_v8, 0.0  ;;  %v4725_v34 = vld [vmem:[#allocation169_spill] sm:$0xff]  ;;  %v4726_v47 = vld [vmem:[#allocation75_spill] sm:$0xff]  ;;  %v4727_v13 = vld [vmem:[#allocation110_spill] sm:$0xff] }
 0x336   :  { %v542_v39 = vadd.f32 %v526_v26, %v426_v3  ;;  %v3898_v46 = vmax.f32 %v1266_v50, 0.0  ;;  %v3900_v55 = vmax.f32 %v1268_v17, 0.0  ;;  %v1371_v7 = vsub.f32 %v4655_v19, %v4723_v44  ;;  %v4728_v8 = vld [vmem:[#allocation115_spill] sm:$0xff]  ;;  %v4730_v22 = vld [vmem:[#allocation81_spill] sm:$0xff] }
 0x337   :  { %v3880_v38 = vpop.permute.xlu0 %1060  ;;  %4719 = vst [vmem:[#allocation112_spill] sm:$0xff] %v3894_v45  ;;  %4720 = vst [vmem:[#allocation107_spill] sm:$0xff] %v3896_v35  ;;  %v544_v56 = vadd.f32 %v528_v1, %v428_v60  ;;  %v623_v62 = vsub.f32 %v4725_v34, %v4724_v49  ;;  %v3906_v58 = vmax.f32 %v1369_v4, 0.0  ;;  %v1372_v63 = vsub.f32 %v4655_v19, %v4726_v47  ;;  %v4729_v60 = vld [vmem:[#allocation77_spill] sm:$0xff]  ;;  %v4733_v49 = vld [vmem:[#allocation83_spill] sm:$0xff] }
 0x338   :  { %4721 = vst [vmem:[#allocation114_spill] sm:$0xff] %v3898_v46  ;;  %4722 = vst [vmem:[#allocation116_spill] sm:$0xff] %v3900_v55  ;;  %v625_v26 = vsub.f32 %v4725_v34, %v4727_v13  ;;  %v626_v50 = vsub.f32 %v4725_v34, %v4728_v8  ;;  %v1374_v20 = vsub.f32 %v4655_v19, %v4729_v60  ;;  %v4731_v3 = vld [vmem:[#allocation117_spill] sm:$0xff]  ;;  %v4734_v13 = vld [vmem:[#allocation86_spill] sm:$0xff]  ;;  %v3932_v55 = vmax.f32 %v1371_v7, 0.0 }
 0x339   :  { %v1376_v1 = vsub.f32 %v4655_v19, %v4730_v22  ;;  %v628_v4 = vsub.f32 %v4725_v34, %v4731_v3  ;;  %v4732_v51 = vld [vmem:[#allocation121_spill] sm:$0xff]  ;;  %v1378_v47 = vsub.f32 %v4655_v19, %v4733_v49  ;;  %v1380_v8 = vsub.f32 %v4655_v19, %v4734_v13  ;;  %v4737_v22 = vld [vmem:[#allocation91_spill] sm:$0xff]  ;;  %v4738_v46 = vld [vmem:[#allocation124_spill] sm:$0xff] }
 0x33a   :  { %v739_v44 = vsub.f32 %v3173_v40, %v4732_v51  ;;  %v1382_v33 = vsub.f32 %v4655_v19, %v4735_v5  ;;  %v741_v60 = vsub.f32 %v3173_v40, %v4736_v21  ;;  %v1384_v34 = vsub.f32 %v4655_v19, %v4737_v22  ;;  %v4739_v13 = vld [vmem:[#allocation126_spill] sm:$0xff] }
 0x33b   :  { %v3914_v17 = vpop.permute.xlu0 %1068  ;;  %v639_v3 = vmax.f32 %v623_v62, 0.0  ;;  %v742_v51 = vsub.f32 %v3173_v40, %v4738_v46  ;;  %v3938_v54 = vmax.f32 %v1372_v63, 0.0  ;;  %v641_v49 = vmax.f32 %v625_v26, 0.0 }
 0x33c   :  { %v642_v43 = vmax.f32 %v626_v50, 0.0  ;;  %v744_v35 = vsub.f32 %v3173_v40, %v4739_v13  ;;  %v3942_v5 = vmax.f32 %v1374_v20, 0.0  ;;  %v3944_v45 = vmax.f32 %v1376_v1, 0.0  ;;  %v4746_v20 = vld [vmem:[#allocation125_spill] sm:$0xff] }
 0x33d   :  { %v644_v21 = vmax.f32 %v628_v4, 0.0  ;;  %v755_v7 = vmax.f32 %v739_v44, 0.0  ;;  %v3946_v2 = vmax.f32 %v1378_v47, 0.0  ;;  %v3948_v19 = vmax.f32 %v1380_v8, 0.0  ;;  %v4747_v47 = vld [vmem:[#allocation136_spill] sm:$0xff] }
 0x33e   :  { %4740 = vst [vmem:[#allocation118_spill] sm:$0xff] %v3944_v45  ;;  %v3950_v62 = vmax.f32 %v1382_v33, 0.0  ;;  %v757_v46 = vmax.f32 %v741_v60, 0.0  ;;  %v3954_v26 = vmax.f32 %v1384_v34, 0.0  ;;  %v655_v50 = vadd.f32 %v639_v3, %v3856_v6  ;;  %v4750_v6 = vld [vmem:[#allocation128_spill] sm:$0xff] }
 0x33f   :  { %4741 = vst [vmem:[#allocation119_spill] sm:$0xff] %v3946_v2  ;;  %4742 = vst [vmem:[#allocation137_spill] sm:$0xff] %v3948_v19  ;;  %v3952_v63 = vpop.permute.xlu0 %1076  ;;  %v758_v40 = vmax.f32 %v742_v51, 0.0  ;;  %v1601_v1 = vsub.f32 %v3202_v32, %v4746_v20  ;;  %v657_v22 = vadd.f32 %v641_v49, %v541_v12  ;;  %v658_v4 = vadd.f32 %v642_v43, %v542_v39  ;;  %v4749_v19 = vld [vmem:[#allocation171_spill] sm:$0xff]  ;;  %v4751_v51 = vld [vmem:[#allocation129_spill] sm:$0xff] }
 0x340   :  { %4743 = vst [vmem:[#allocation120_spill] sm:$0xff] %v3950_v62  ;;  %4744 = vst [vmem:[#allocation139_spill] sm:$0xff] %v3952_v63  ;;  %v760_v44 = vmax.f32 %v744_v35, 0.0  ;;  %v857_v8 = vsub.f32 %v3176_v48, %v4747_v47  ;;  %v660_v13 = vadd.f32 %v644_v21, %v544_v56  ;;  %v771_v33 = vadd.f32 %v755_v7, %v655_v50  ;;  %v4748_v62 = vld [vmem:[#allocation127_spill] sm:$0xff]  ;;  %v4752_v43 = vld [vmem:[#allocation130_spill] sm:$0xff] }
 0x341   :  { %4745 = vst [vmem:[#allocation109_spill] sm:$0xff] %v3954_v26  ;;  %v1604_v60 = vsub.f32 %v3202_v32, %v4748_v62  ;;  %v855_v34 = vsub.f32 %v3176_v48, %v4749_v19  ;;  %v773_v26 = vadd.f32 %v757_v46, %v657_v22  ;;  %v1606_v3 = vsub.f32 %v3202_v32, %v4750_v6  ;;  %v4753_v21 = vld [vmem:[#allocation131_spill] sm:$0xff]  ;;  %v4754_v19 = vld [vmem:[#allocation133_spill] sm:$0xff] }
 0x342   :  { %v1608_v12 = vsub.f32 %v3202_v32, %v4751_v51  ;;  %v1610_v39 = vsub.f32 %v3202_v32, %v4752_v43  ;;  %v774_v49 = vadd.f32 %v758_v40, %v658_v4  ;;  %v3971_v56 = vmax.f32 %v1601_v1, 0.0  ;;  %v4755_v20 = vld [vmem:[#allocation135_spill] sm:$0xff]  ;;  %v4757_v40 = vld [vmem:[#allocation176_spill] sm:$0xff] }
 0x343   :  { %v1612_v7 = vsub.f32 %v3202_v32, %v4753_v21  ;;  %v776_v50 = vadd.f32 %v760_v44, %v660_v13  ;;  %v1614_v46 = vsub.f32 %v3202_v32, %v4754_v19  ;;  %v1616_v22 = vsub.f32 %v3202_v32, %v4755_v20  ;;  %v3979_v6 = vpop.permute.xlu0 %1084  ;;  %v4761_v13 = vld [vmem:[#allocation177_spill] sm:$0xff] }
 0x344   :  { %v873_v47 = vmax.f32 %v857_v8, 0.0  ;;  %4756 = vst [vmem:[#allocation141_spill] sm:$0xff] %v3979_v6  ;;  %v3981_v51 = vmax.f32 %v1604_v60, 0.0  ;;  %v871_v43 = vmax.f32 %v855_v34, 0.0  ;;  %v858_v1 = vsub.f32 %v3176_v48, %v4757_v40 }
 0x345   :  { %v3985_v2 = vmax.f32 %v1606_v3, 0.0  ;;  %v3987_v21 = vmax.f32 %v1608_v12, 0.0  ;;  %v3989_v44 = vmax.f32 %v1610_v39, 0.0  ;;  %v860_v19 = vsub.f32 %v3176_v48, %v4761_v13 }
 0x346   :  { %v2142_v35 = vpop.xlane.xlu1 %2141  ;;  %v3993_v8 = vmax.f32 %v1612_v7, 0.0  ;;  %v1087_v60 = vsub.f32 %v3189_v18, %v3823_v25  ;;  %v3998_v40 = vmax.f32 %v1614_v46, 0.0  ;;  %v4000_v3 = vmax.f32 %v1616_v22, 0.0  ;;  %v4767_v25 = vld [vmem:[#allocation179_spill] sm:$0xff] }
 0x347   :  { %v2143_v62 = vrot.slane %v2142_v35, 4  ;;  %4758 = vst [vmem:[#allocation32_spill] sm:$0xff] %v3985_v2  ;;  %4759 = vst [vmem:[#allocation143_spill] sm:$0xff] %v3987_v21  ;;  %v889_v12 = vadd.f32 %v873_v47, %v773_v26  ;;  %v876_v7 = vmax.f32 %v860_v19, 0.0  ;;  %v1487_v45 = vsub.f32 %v4652_v28, %v4767_v25  ;;  %v4010_v22 = vpop.permute.xlu0 %2002  ;;  %v4771_v19 = vld [vmem:[#allocation61_spill] sm:$0xff] }
 0x348   :  { %4760 = vst [vmem:[#allocation134_spill] sm:$0xff] %v3989_v44  ;;  %4762 = vst [vmem:[#allocation138_spill] sm:$0xff] %v3993_v8  ;;  %v874_v44 = vmax.f32 %v858_v1, 0.0  ;;  %v4766_v8 = vld [vmem:[#allocation178_spill] sm:$0xff]  ;;  %v1103_v47 = vmax.f32 %v1087_v60, 0.0 }
 0x349   :  { %v2144_v4 = vadd.f32 %v2143_v62, %v2142_v35  ;;  %4763 = vst [vmem:[#allocation35_spill] sm:$0xff] %v3998_v40  ;;  %4764 = vst [vmem:[#allocation145_spill] sm:$0xff] %v4000_v3  ;;  %v4765_v35 = vld [vmem:[#allocation152_spill] sm:$0xff]  ;;  %v887_v62 = vadd.f32 %v871_v43, %v771_v33  ;;  %v1485_v21 = vsub.f32 %v4652_v28, %v4766_v8  ;;  %v4770_v1 = vld [vmem:[#allocation106_spill] sm:$0xff] }
 0x34a   :  { %v909_v20 = vpop.permute.xlu1 %908  ;;  %v1089_v39 = vsub.f32 %v3189_v18, %v4765_v35  ;;  %4769 = vst [vmem:[#allocation140_spill] sm:$0xff] %v4010_v22  ;;  %v1492_v8 = vsub.f32 %v4652_v28, %v4771_v19  ;;  %v890_v25 = vadd.f32 %v874_v44, %v774_v49  ;;  %v892_v2 = vadd.f32 %v876_v7, %v776_v50  ;;  %v4773_v50 = vld [vmem:[#allocation21_spill] sm:$0xff] }
 0x34b   :  { %v2145_v34 = vrot.slane %v2144_v4, 2  ;;  %v971_v6 = vsub.f32 %v4621_v9, %v909_v20  ;;  %v4768_v20 = vld [vmem:[#allocation180_spill] sm:$0xff]  ;;  %v1501_v60 = vmax.f32 %v1485_v21, 0.0 }
 0x34c   :  { %v1488_v46 = vsub.f32 %v4652_v28, %v4768_v20  ;;  %v4025_v49 = vmax.f32 %v1492_v8, 0.0 }
 0x34d   :  { %v987_v48 = vmax.f32 %v971_v6, 0.0  ;;  %v2146_v13 = vadd.f32 %v2145_v34, %v2144_v4  ;;  %v1105_v6 = vmax.f32 %v1089_v39, 0.0  ;;  %v1490_v4 = vsub.f32 %v4652_v28, %v4770_v1  ;;  %v4772_v34 = vld [vmem:[#allocation132_spill] sm:$0xff] }
 0x34e   :  { %v917_v26 = vpop.permute.xlu1 %916  ;;  %v1494_v35 = vsub.f32 %v4652_v28, %v4772_v34  ;;  %v1092_v34 = vsub.f32 %v3189_v18, %v3833_v27 }
 0x34f   :  { %v1003_v3 = vadd.f32 %v987_v48, %v887_v62  ;;  %v973_v33 = vsub.f32 %v4621_v9, %v917_v26  ;;  %v2147_v43 = vrot.slane %v2146_v13, 1  ;;  %v1503_v62 = vmax.f32 %v1487_v45, 0.0 }
 0x350   :  { %v1090_v48 = vsub.f32 %v3189_v18, %v3825_v10  ;;  %v1504_v26 = vmax.f32 %v1488_v46, 0.0  ;;  %v4023_v24 = vmax.f32 %v1490_v4, 0.0  ;;  %v4027_v44 = vmax.f32 %v1494_v35, 0.0  ;;  %v4775_v10 = vld [vmem:[#allocation22_spill] sm:$0xff]  ;;  %v4777_v46 = vld [vmem:[#allocation31_spill] sm:$0xff] }
 0x351   :  { %v1119_v20 = vadd.f32 %v1103_v47, %v1003_v3  ;;  %v989_v40 = vmax.f32 %v973_v33, 0.0  ;;  %v2148_v22 = vadd.f32 %v2147_v43, %v2146_v13  ;;  %v4774_v45 = vsub.f32 %v4672_v14, %v4773_v50  ;;  %v4032_v3 = vpop.permute.xlu0 %2014  ;;  %v4779_v33 = vld [vmem:[#allocation68_spill] sm:$0xff] }
 0x352   :  { %v921_v39 = vpop.permute.xlu1 %920  ;;  %v4776_v13 = vsub.f32 %v4652_v28, %v4775_v10  ;;  %v4780_v43 = vsub.f32 %v4652_v28, %v4779_v33  ;;  %v1106_v8 = vmax.f32 %v1090_v48, 0.0  ;;  %v4783_v50 = vld [vmem:[#allocation80_spill] sm:$0xff]  ;;  %v4785_v48 = vld [vmem:[#allocation34_spill] sm:$0xff]  ;;  %v4790_v33 = vld [vmem:[#allocation79_spill] sm:$0xff] }
 0x353   :  { %v1285_v1 = vadd.f32 %v3858_v57, %v1119_v20  ;;  %v1005_v63 = vadd.f32 %v989_v40, %v889_v12  ;;  %v974_v19 = vsub.f32 %v4621_v9, %v921_v39  ;;  %2259 = vpush %v2148_v22  ;;  %v1849_v21 = vmax.f32 %v4774_v45, 0.0  ;;  %v4781_v39 = vld [vmem:[#allocation73_spill] sm:$0xff] }
 0x354   :  { %v4037_v57 = vmax.f32 %v4776_v13, 0.0  ;;  %v4778_v22 = vsub.f32 %v4672_v14, %v4777_v46  ;;  %v4048_v4 = vmax.f32 %v4780_v43, 0.0  ;;  %v4784_v45 = vsub.f32 %v4652_v28, %v4783_v50  ;;  %v4788_v46 = vld [vmem:[#allocation78_spill] sm:$0xff] }
 0x355   :  { %v1401_v40 = vadd.f32 %v3906_v58, %v1285_v1  ;;  %v1121_v12 = vadd.f32 %v1105_v6, %v1005_v63  ;;  %v990_v7 = vmax.f32 %v974_v19, 0.0  ;;  %v4782_v1 = vsub.f32 %v4672_v14, %v4781_v39 }
 0x356   :  { %v4043_v47 = vmax.f32 %v4778_v22, 0.0  ;;  %v929_v35 = vpop.permute.xlu1 %928  ;;  %v4062_v10 = vmax.f32 %v4784_v45, 0.0  ;;  %v4786_v27 = vsub.f32 %v4672_v14, %v4785_v48  ;;  %v4789_v28 = vsub.f32 %v4672_v14, %v4788_v46 }
 0x357   :  { %v1287_v20 = vadd.f32 %v3884_v61, %v1121_v12  ;;  %v1006_v58 = vadd.f32 %v990_v7, %v890_v25  ;;  %v976_v63 = vsub.f32 %v4621_v9, %v929_v35  ;;  %v1517_v6 = vadd.f32 %v1501_v60, %v1401_v40 }
 0x358   :  { %v4057_v19 = vmax.f32 %v4782_v1, 0.0  ;;  %v4067_v13 = vmax.f32 %v4786_v27, 0.0  ;;  %v4787_v61 = vsub.f32 %v3208_v31, %v3610_v15  ;;  %v4077_v22 = vmax.f32 %v4789_v28, 0.0  ;;  %v4084_v1 = vpop.permute.xlu0 %2022 }
 0x359   :  { %v1403_v60 = vadd.f32 %v3932_v55, %v1287_v20  ;;  %v1122_v40 = vadd.f32 %v1106_v8, %v1006_v58  ;;  %v992_v12 = vmax.f32 %v976_v63, 0.0  ;;  %v1633_v7 = vadd.f32 %v3971_v56, %v1517_v6 }
 0x35a   :  { %v1733_v25 = vmax.f32 %v4787_v61, 0.0  ;;  %v4791_v43 = vsub.f32 %v3202_v32, %v4790_v33  ;;  %v1108_v39 = vmax.f32 %v1092_v34, 0.0  ;;  %v1094_v15 = vsub.f32 %v3189_v18, %v3843_v11  ;;  %v937_v55 = vpop.permute.xlu1 %936 }
 0x35b   :  { %v1288_v8 = vadd.f32 %v3886_v41, %v1122_v40  ;;  %v1008_v20 = vadd.f32 %v992_v12, %v892_v2  ;;  %v978_v56 = vsub.f32 %v4621_v9, %v937_v55  ;;  %v4792_v63 = vsub.f32 %v3208_v31, %v3627_v30 }
 0x35c   :  { %v1619_v35 = vmax.f32 %v4791_v43, 0.0  ;;  %v1749_v58 = vadd.f32 %v1733_v25, %v1633_v7  ;;  %v4793_v32 = vsub.f32 %v3208_v31, %v3648_v37  ;;  %v4794_v11 = vsub.f32 %v3208_v31, %v3665_v16 }
 0x35d   :  { %v1735_v6 = vmax.f32 %v4792_v63, 0.0  ;;  %v1519_v45 = vadd.f32 %v1503_v62, %v1403_v60  ;;  %v1404_v48 = vadd.f32 %v3938_v54, %v1288_v8  ;;  %v1124_v41 = vadd.f32 %v1108_v39, %v1008_v20  ;;  %v4796_v62 = vld [vmem:[#allocation181_spill] sm:$0xff] }
 0x35e   :  { %v1736_v34 = vmax.f32 %v4793_v32, 0.0  ;;  %v1738_v50 = vmax.f32 %v4794_v11, 0.0  ;;  %v994_v2 = vmax.f32 %v978_v56, 0.0  ;;  %v4098_v27 = vadd.f32 %v1849_v21, %v1749_v58  ;;  %v945_v40 = vpop.permute.xlu1 %944  ;;  %v4803_v11 = vld [vmem:[#allocation98_spill] sm:$0xff] }
 0x35f   :  { %v4795_v61 = vsub.f32 %v3208_v31, %v3687_v23  ;;  %v1110_v25 = vmax.f32 %v1094_v15, 0.0  ;;  %v1096_v37 = vsub.f32 %v3189_v18, %v3880_v38  ;;  %v1635_v12 = vadd.f32 %v1619_v35, %v1519_v45 }
 0x360   :  { %v1520_v7 = vadd.f32 %v1504_v26, %v1404_v48  ;;  %v1290_v16 = vadd.f32 %v3890_v42, %v1124_v41  ;;  %v1010_v60 = vadd.f32 %v994_v2, %v4796_v62  ;;  %v980_v54 = vsub.f32 %v4621_v9, %v945_v40  ;;  %v2031_v26 = vpop.permute.xlu0 %2030  ;;  %v4805_v48 = vld [vmem:[#allocation139_spill] sm:$0xff] }
 0x361   :  { %v1740_v30 = vmax.f32 %v4795_v61, 0.0  ;;  %v4797_v21 = vsub.f32 %v4650_v59, %v3705_v29  ;;  %v4798_v23 = vsub.f32 %v3208_v31, %v3711_v52  ;;  %v4799_v38 = vsub.f32 %v4672_v14, %v3757_v53 }
 0x362   :  { %v1751_v43 = vadd.f32 %v1735_v6, %v1635_v12  ;;  %v1636_v42 = vadd.f32 %v3981_v51, %v1520_v7  ;;  %v1406_v35 = vadd.f32 %v3942_v5, %v1290_v16  ;;  %v1126_v39 = vadd.f32 %v1110_v25, %v1010_v60  ;;  %v953_v8 = vpop.permute.xlu1 %952  ;;  %v4800_v51 = vld [vmem:[#allocation23_spill] sm:$0xff]  ;;  %v4801_v5 = vld [vmem:[#allocation88_spill] sm:$0xff] }
 0x363   :  { %v1968_v46 = vmax.f32 %v4797_v21, 0.0  ;;  %v4114_v28 = vmax.f32 %v4798_v23, 0.0  ;;  %v1851_v33 = vmax.f32 %v4799_v38, 0.0  ;;  %v996_v15 = vmax.f32 %v980_v54, 0.0  ;;  %v4808_v23 = vld [vmem:[#allocation112_spill] sm:$0xff] }
 0x364   :  { %v1112_v55 = vmax.f32 %v1096_v37, 0.0  ;;  %v1098_v29 = vsub.f32 %v3189_v18, %v3914_v17  ;;  %v2068_v52 = vsub.f32 %v3854_v36, %v4032_v3  ;;  %v1752_v53 = vadd.f32 %v1736_v34, %v1636_v42  ;;  %v2039_v7 = vpop.permute.xlu0 %2038  ;;  %v4810_v42 = vld [vmem:[#allocation123_spill] sm:$0xff] }
 0x365   :  { %v4125_v20 = vadd.f32 %v1851_v33, %v1751_v43  ;;  %v1522_v56 = vadd.f32 %v4023_v24, %v1406_v35  ;;  %v1292_v58 = vadd.f32 %v3892_v0, %v1126_v39  ;;  %v1012_v63 = vadd.f32 %v996_v15, %v4800_v51  ;;  %v4806_v24 = vld [vmem:[#allocation32_spill] sm:$0xff]  ;;  %v4807_v0 = vld [vmem:[#allocation118_spill] sm:$0xff]  ;;  %v4809_v33 = vld [vmem:[#allocation141_spill] sm:$0xff] }
 0x366   :  { %v4802_v6 = vsub.f32 %v4650_v59, %v4801_v5  ;;  %v4804_v17 = vsub.f32 %v4650_v59, %v4803_v11  ;;  %v1100_v3 = vsub.f32 %v3189_v18, %v4805_v48  ;;  %v982_v41 = vsub.f32 %v4621_v9, %v953_v8  ;;  %v961_v62 = vpop.permute.xlu1 %960 }
 0x367   :  { %v1868_v34 = vadd.f32 %v4043_v47, %v1752_v53  ;;  %v1638_v2 = vadd.f32 %v4806_v24, %v1522_v56  ;;  %v1408_v61 = vadd.f32 %v4807_v0, %v1292_v58  ;;  %v1128_v25 = vadd.f32 %v1112_v55, %v1012_v63  ;;  %v4811_v55 = vld [vmem:[#allocation143_spill] sm:$0xff]  ;;  %v4816_v24 = vld [vmem:[#allocation134_spill] sm:$0xff] }
 0x368   :  { %v1970_v32 = vmax.f32 %v4802_v6, 0.0  ;;  %v1972_v45 = vmax.f32 %v4804_v17, 0.0  ;;  %v1114_v37 = vmax.f32 %v1098_v29, 0.0  ;;  %v2084_v40 = vmax.f32 %v2068_v52, 0.0  ;;  %v4813_v6 = vld [vmem:[#allocation140_spill] sm:$0xff]  ;;  %v2047_v11 = vpop.permute.xlu0 %2046  ;;  %v4814_v17 = vld [vmem:[#allocation107_spill] sm:$0xff] }
 0x369   :  { %v2070_v12 = vsub.f32 %v3854_v36, %v4084_v1  ;;  %v998_v16 = vmax.f32 %v982_v41, 0.0  ;;  %v1984_v60 = vadd.f32 %v1968_v46, %v1868_v34  ;;  %v1754_v54 = vadd.f32 %v1738_v50, %v1638_v2  ;;  %v4812_v46 = vld [vmem:[#allocation119_spill] sm:$0xff] }
 0x36a   :  { %v1524_v21 = vadd.f32 %v4025_v49, %v1408_v61  ;;  %v1294_v38 = vadd.f32 %v4808_v23, %v1128_v25  ;;  %v1116_v47 = vmax.f32 %v1100_v3, 0.0  ;;  %v1102_v43 = vsub.f32 %v3189_v18, %v4809_v33  ;;  %v969_v56 = vpop.permute.xlu1 %968  ;;  %v4815_v3 = vld [vmem:[#allocation29_spill] sm:$0xff]  ;;  %v4823_v33 = vld [vmem:[#allocation114_spill] sm:$0xff] }
 0x36b   :  { %v1014_v35 = vadd.f32 %v998_v16, %v4810_v42  ;;  %v984_v39 = vsub.f32 %v4621_v9, %v961_v62  ;;  %v4150_v15 = vadd.f32 %v2084_v40, %v1984_v60  ;;  %v1870_v1 = vadd.f32 %v4057_v19, %v1754_v54  ;;  %v4819_v60 = vld [vmem:[#allocation92_spill] sm:$0xff] }
 0x36c   :  { %v1640_v29 = vadd.f32 %v4811_v55, %v1524_v21  ;;  %v1410_v50 = vadd.f32 %v4812_v46, %v1294_v38  ;;  %v2086_v52 = vmax.f32 %v2070_v12, 0.0  ;;  %v2072_v49 = vsub.f32 %v3854_v36, %v2031_v26  ;;  %v4818_v12 = vld [vmem:[#allocation64_spill] sm:$0xff]  ;;  %v4821_v21 = vld [vmem:[#allocation95_spill] sm:$0xff]  ;;  %v4824_v55 = vld [vmem:[#allocation138_spill] sm:$0xff] }
 0x36d   :  { %v1130_v8 = vadd.f32 %v1114_v37, %v1014_v35  ;;  %v1000_v53 = vmax.f32 %v984_v39, 0.0  ;;  %v1986_v58 = vadd.f32 %v1970_v32, %v1870_v1  ;;  %v986_v63 = vsub.f32 %v4621_v9, %v969_v56  ;;  %v4817_v9 = vld [vmem:[#allocation137_spill] sm:$0xff]  ;;  %v2055_v1 = vpop.permute.xlu0 %2054  ;;  %v4825_v46 = vld [vmem:[#allocation120_spill] sm:$0xff] }
 0x36e   :  { %v1756_v18 = vadd.f32 %v1740_v30, %v1640_v29  ;;  %v1526_v51 = vadd.f32 %v4027_v44, %v1410_v50  ;;  %v1118_v5 = vmax.f32 %v1102_v43, 0.0  ;;  %v2065_v19 = vsub.f32 %v3854_v36, %v4813_v6  ;;  %v1887_v25 = vpop.permute.xlu1 %1886 }
 0x36f   :  { %v1296_v48 = vadd.f32 %v4814_v17, %v1130_v8  ;;  %v1016_v41 = vadd.f32 %v1000_v53, %v4815_v3  ;;  %v4162_v34 = vadd.f32 %v2086_v52, %v1986_v58  ;;  %v1002_v30 = vmax.f32 %v986_v63, 0.0  ;;  %v4826_v8 = vld [vmem:[#allocation116_spill] sm:$0xff]  ;;  %v4827_v58 = vld [vmem:[#allocation82_spill] sm:$0xff] }
 0x370   :  { %v1872_v26 = vadd.f32 %v4067_v13, %v1756_v18  ;;  %v1642_v32 = vadd.f32 %v4816_v24, %v1526_v51  ;;  %v2088_v2 = vmax.f32 %v2072_v49, 0.0  ;;  %v2074_v44 = vsub.f32 %v3854_v36, %v2039_v7  ;;  %v4832_v24 = vld [vmem:[#allocation99_spill] sm:$0xff] }
 0x371   :  { %v1412_v0 = vadd.f32 %v4817_v9, %v1296_v48  ;;  %v1132_v61 = vadd.f32 %v1116_v47, %v1016_v41  ;;  %v1018_v16 = vadd.f32 %v1002_v30, %v4818_v12  ;;  %v1949_v62 = vsub.f32 %v4650_v59, %v1887_v25 }
 0x372   :  { %v1988_v37 = vadd.f32 %v1972_v45, %v1872_v26  ;;  %v1758_v40 = vadd.f32 %v4114_v28, %v1642_v32  ;;  %v4820_v13 = vsub.f32 %v3208_v31, %v4819_v60  ;;  %v4822_v23 = vsub.f32 %v4650_v59, %v4821_v21  ;;  %v1895_v52 = vpop.permute.xlu1 %1894 }
 0x373   :  { %v1528_v7 = vadd.f32 %v4037_v57, %v1412_v0  ;;  %v1298_v47 = vadd.f32 %v4823_v33, %v1132_v61  ;;  %v1134_v45 = vadd.f32 %v1118_v5, %v1018_v16  ;;  %v1965_v42 = vmax.f32 %v1949_v62, 0.0  ;;  %v2063_v62 = vpop.permute.xlu0 %2062  ;;  %v4840_v33 = vld [vmem:[#allocation145_spill] sm:$0xff] }
 0x374   :  { %v1744_v54 = vmax.f32 %v4820_v13, 0.0  ;;  %v1974_v38 = vmax.f32 %v4822_v23, 0.0  ;;  %v4179_v43 = vadd.f32 %v2088_v2, %v1988_v37  ;;  %v1874_v28 = vadd.f32 %v4077_v22, %v1758_v40 }
 0x375   :  { %v2081_v35 = vmax.f32 %v2065_v19, 0.0  ;;  %v2090_v39 = vmax.f32 %v2074_v44, 0.0  ;;  %v1644_v29 = vadd.f32 %v4824_v55, %v1528_v7  ;;  %v1414_v50 = vadd.f32 %v4825_v46, %v1298_v47  ;;  %v4829_v19 = vld [vmem:[#allocation109_spill] sm:$0xff] }
 0x376   :  { %v1990_v49 = vadd.f32 %v1974_v38, %v1874_v28  ;;  %v1300_v53 = vadd.f32 %v4826_v8, %v1134_v45  ;;  %v1981_v57 = vadd.f32 %v1965_v42, %v4098_v27  ;;  %v1951_v56 = vsub.f32 %v4650_v59, %v1895_v52  ;;  %v4830_v27 = vld [vmem:[#allocation93_spill] sm:$0xff]  ;;  %v1935_v9 = vpop.permute.xlu1 %1934  ;;  %v4839_v38 = vld [vmem:[#allocation104_spill] sm:$0xff] }
 0x377   :  { %v4828_v22 = vsub.f32 %v4672_v14, %v4827_v58  ;;  %v2076_v51 = vsub.f32 %v3854_v36, %v2047_v11  ;;  %v1760_v63 = vadd.f32 %v1744_v54, %v1644_v29  ;;  %v1530_v5 = vadd.f32 %v4048_v4, %v1414_v50  ;;  %v4834_v11 = vld [vmem:[#allocation35_spill] sm:$0xff]  ;;  %v4835_v4 = vld [vmem:[#allocation85_spill] sm:$0xff]  ;;  %v4837_v54 = vld [vmem:[#allocation94_spill] sm:$0xff] }
 0x378   :  { %v4192_v6 = vadd.f32 %v2090_v39, %v1990_v49  ;;  %v1416_v17 = vadd.f32 %v4829_v19, %v1300_v53  ;;  %v4195_v48 = vadd.f32 %v2081_v35, %v1981_v57  ;;  %v1967_v3 = vmax.f32 %v1951_v56, 0.0  ;;  %v4843_v42 = vld [vmem:[#allocation100_spill] sm:$0xff] }
 0x379   :  { %v1860_v18 = vmax.f32 %v4828_v22, 0.0  ;;  %v4831_v41 = vsub.f32 %v3208_v31, %v4830_v27  ;;  %v4833_v32 = vsub.f32 %v4650_v59, %v4832_v24  ;;  %v1646_v44 = vadd.f32 %v4834_v11, %v1530_v5  ;;  %v4845_v50 = vld [vmem:[#allocation108_spill] sm:$0xff] }
 0x37a   :  { %v4836_v0 = vsub.f32 %v4672_v14, %v4835_v4  ;;  %v1532_v25 = vadd.f32 %v4062_v10, %v1416_v17  ;;  %v1983_v37 = vadd.f32 %v1967_v3, %v4125_v20  ;;  %v1961_v40 = vsub.f32 %v4650_v59, %v1935_v9  ;;  %v4841_v20 = vld [vmem:[#allocation87_spill] sm:$0xff]  ;;  %v2007_v29 = vpop.permute.xlu1 %2006  ;;  %v4848_v9 = vld [vmem:[#allocation101_spill] sm:$0xff] }
 0x37b   :  { %v1746_v26 = vmax.f32 %v4831_v41, 0.0  ;;  %v1976_v30 = vmax.f32 %v4833_v32, 0.0  ;;  %v1876_v2 = vadd.f32 %v1860_v18, %v1760_v63  ;;  %v2092_v12 = vmax.f32 %v2076_v51, 0.0  ;;  %v4846_v51 = vld [vmem:[#allocation97_spill] sm:$0xff]  ;;  %v4847_v32 = vld [vmem:[#allocation96_spill] sm:$0xff] }
 0x37c   :  { %v1862_v61 = vmax.f32 %v4836_v0, 0.0  ;;  %v2078_v16 = vsub.f32 %v3854_v36, %v2055_v1  ;;  %v4838_v21 = vsub.f32 %v3208_v31, %v4837_v54  ;;  %v1964_v7 = vsub.f32 %v4650_v59, %v4839_v38 }
 0x37d   :  { %v1992_v60 = vadd.f32 %v1976_v30, %v1876_v2  ;;  %v1762_v13 = vadd.f32 %v1746_v26, %v1646_v44  ;;  %v1648_v47 = vadd.f32 %v4840_v33, %v1532_v25  ;;  %v1977_v10 = vmax.f32 %v1961_v40, 0.0 }
 0x37e   :  { %v1748_v23 = vmax.f32 %v4838_v21, 0.0  ;;  %v4842_v28 = vsub.f32 %v4672_v14, %v4841_v20  ;;  %v4844_v35 = vsub.f32 %v4650_v59, %v4843_v42  ;;  %v2080_v31 = vsub.f32 %v3854_v36, %v2063_v62  ;;  %v2011_v59 = vpop.permute.xlu1 %2010 }
 0x37f   :  { %v4223_v1 = vadd.f32 %v2092_v12, %v1992_v60  ;;  %v1878_v55 = vadd.f32 %v1862_v61, %v1762_v13  ;;  %v1993_v52 = vadd.f32 %v1977_v10, %v4845_v50  ;;  %v2066_v49 = vsub.f32 %v3854_v36, %v2007_v29  ;;  %v4850_v60 = vld [vmem:[#allocation103_spill] sm:$0xff] }
 0x380   :  { %v1864_v45 = vmax.f32 %v4842_v28, 0.0  ;;  %v1978_v39 = vmax.f32 %v4844_v35, 0.0  ;;  %v1764_v46 = vadd.f32 %v1748_v23, %v1648_v47  ;;  %v2094_v8 = vmax.f32 %v2078_v16, 0.0  ;;  %v4851_v47 = vld [vmem:[#allocation105_spill] sm:$0xff] }
 0x381   :  { %v1980_v57 = vmax.f32 %v1964_v7, 0.0  ;;  %v2082_v56 = vmax.f32 %v2066_v49, 0.0  ;;  %v2096_v22 = vmax.f32 %v2080_v31, 0.0  ;;  %v2067_v5 = vsub.f32 %v3854_v36, %v2011_v59 }
 0x382   :  { %v1994_v53 = vadd.f32 %v1978_v39, %v1878_v55  ;;  %v1880_v14 = vadd.f32 %v1864_v45, %v1764_v46  ;;  %v2019_v3 = vpop.permute.xlu1 %2018 }
 0x383   :  { %v2098_v63 = vadd.f32 %v2082_v56, %v4846_v51  ;;  %v2083_v17 = vmax.f32 %v2067_v5, 0.0  ;;  %v2069_v41 = vsub.f32 %v3854_v36, %v2019_v3 }
 0x384   :  { %v4228_v58 = vadd.f32 %v2094_v8, %v1994_v53  ;;  %v1996_v18 = vadd.f32 %v1980_v57, %v1880_v14  ;;  %s4235_s3 = spop %2259 }
 0x385   :  { %v2099_v27 = vadd.f32 %v2083_v17, %v1983_v37  ;;  %v2085_v26 = vmax.f32 %v2069_v41, 0.0  ;;  %s2152_s26 = smul.f32 0.00048828125, %s4235_s3  ;;  %v4849_v37 = vld [vmem:[#allocation102_spill] sm:$0xff] }
 0x386   :  { %v4232_v19 = vadd.f32 %v2096_v22, %v1996_v18  ;;  %v2027_v24 = vpop.permute.xlu1 %2026 }
 0x387   :  { %v2101_v30 = vadd.f32 %v2085_v26, %v4847_v32  ;;  %v2071_v2 = vsub.f32 %v3854_v36, %v2027_v24 }
 0x389   :  { %v2087_v11 = vmax.f32 %v2071_v2, 0.0 }
 0x38a   :  { %v2035_v44 = vpop.permute.xlu1 %2034 }
 0x38b   :  { %v2103_v4 = vadd.f32 %v2087_v11, %v4848_v9  ;;  %v2073_v0 = vsub.f32 %v3854_v36, %v2035_v44 }
 0x38d   :  { %v2089_v61 = vmax.f32 %v2073_v0, 0.0 }
 0x38e   :  { %v2043_v25 = vpop.permute.xlu1 %2042 }
 0x38f   :  { %v2105_v40 = vadd.f32 %v2089_v61, %v4849_v37  ;;  %v2075_v12 = vsub.f32 %v3854_v36, %v2043_v25 }
 0x391   :  { %v2091_v16 = vmax.f32 %v2075_v12, 0.0 }
 0x392   :  { %v2051_v62 = vpop.permute.xlu1 %2050 }
 0x393   :  { %v2107_v13 = vadd.f32 %v2091_v16, %v4850_v60  ;;  %v2077_v54 = vsub.f32 %v3854_v36, %v2051_v62 }
 0x395   :  { %v2093_v21 = vmax.f32 %v2077_v54, 0.0 }
 0x396   :  { %v2059_v23 = vpop.permute.xlu1 %2058 }
 0x397   :  { %v2109_v38 = vadd.f32 %v2093_v21, %v1993_v52  ;;  %v2079_v7 = vsub.f32 %v3854_v36, %v2059_v23 }
 0x399   :  { %v2095_v33 = vmax.f32 %v2079_v7, 0.0 }
 0x39b   :  { %v2111_v10 = vadd.f32 %v2095_v33, %v4851_v47 }
 0x39c   :  { %2436 = dma.done.wait [#allocation6], 2048 }
 0x39d   :  { %2437 = vsyncadd [#allocation6], 4294965248  ;;  %v2172_v20 = vld [vmem:[#allocation5] sm:$0xff]  ;;  %v2173_v28 = vld [vmem:[#allocation5 + $0x8] sm:$0xff]  ;;  %s2453_s30 = smov [#allocation12]  }
 0x39e   :  { %v2174_v45 = vld [vmem:[#allocation5 + $0x10] sm:$0xff]  ;;  %v2175_v42 = vld [vmem:[#allocation5 + $0x18] sm:$0xff]  ;;  %v2188_v35 = vmul.f32 %v2172_v20, %v4195_v48  ;;  %v2189_v39 = vmul.f32 %v2173_v28, %v2098_v63  ;;  %v2176_v29 = vld [vmem:[#allocation5 + $0x20] sm:$0xff]  ;;  %s2241_s5 = sshll.u32 %s2453_s30, 4  ;;  %s2242_s5 = int_to_ptr.vmem [resolvable:$true] %s2241_s5 }
 0x39f   :  { %v2190_v55 = vmul.f32 %v2174_v45, %v2099_v27  ;;  %v2191_v31 = vmul.f32 %v2175_v42, %v4150_v15  ;;  %v2177_v50 = vld [vmem:[#allocation5 + $0x28] sm:$0xff]  ;;  %v2192_v52 = vmul.f32 %v2176_v29, %v2101_v30  ;;  %v2178_v49 = vld [vmem:[#allocation5 + $0x30] sm:$0xff]  ;;  %v2179_v57 = vld [vmem:[#allocation5 + $0x38] sm:$0xff]  ;;  %s2410_s7 = scalar_lea.vmem %s2242_s5, 128  ;;  %p2415_p11 = scmp.lt.s32.totalorder %s2242_s5, %s2242_s5 }
 0x3a0   :  { %v2204_v46 = vadd.f32 %v2189_v39, %v2188_v35  ;;  %v2193_v8 = vmul.f32 %v2177_v50, %v4162_v34  ;;  %v2194_v14 = vmul.f32 %v2178_v49, %v2103_v4  ;;  %v2180_v59 = vld [vmem:[#allocation5 + $0x40] sm:$0xff]  ;;  %v2195_v22 = vmul.f32 %v2179_v57, %v4179_v43  ;;  %v2181_v18 = vld [vmem:[#allocation5 + $0x48] sm:$0xff]  ;;  %v2182_v5 = vld [vmem:[#allocation5 + $0x50] sm:$0xff]  ;;  %p2411_p10 = scmp.ne.s32.totalorder %s2242_s5, %s2410_s7  ;;  %p2416_p12 = scmp.lt.s32.totalorder %s2410_s7, %s2410_s7 }
 0x3a1   :  { %v2196_v51 = vmul.f32 %v2180_v59, %v2105_v40  ;;  %v2197_v15 = vmul.f32 %v2181_v18, %v4192_v6  ;;  %v2183_v3 = vld [vmem:[#allocation5 + $0x58] sm:$0xff]  ;;  %v2198_v27 = vmul.f32 %v2182_v5, %v2107_v13  ;;  %v2184_v26 = vld [vmem:[#allocation5 + $0x60] sm:$0xff]  ;;  %v2185_v32 = vld [vmem:[#allocation5 + $0x68] sm:$0xff] }
 0x3a2   :  { %v2205_v36 = vadd.f32 %v2204_v46, %v2190_v55  ;;  %v2199_v34 = vmul.f32 %v2183_v3, %v4223_v1  ;;  %v2200_v30 = vmul.f32 %v2184_v26, %v2109_v38  ;;  %v2186_v11 = vld [vmem:[#allocation5 + $0x70] sm:$0xff]  ;;  %v2201_v43 = vmul.f32 %v2185_v32, %v4228_v58  ;;  %v2187_v9 = vld [vmem:[#allocation5 + $0x78] sm:$0xff]  ;;  %p2417_p13 = por %p2416_p12, %p2415_p11 }
 0x3a3   :  { %v2202_v4 = vmul.f32 %v2186_v11, %v2111_v10  ;;  %v2203_v6 = vmul.f32 %v2187_v9, %v4232_v19 }
 0x3a4   :  { %v2206_v53 = vadd.f32 %v2205_v36, %v2191_v31  ;;  %p2418_p0 = pnand %p2417_p13, %p2411_p10 }
 0x3a6   :  { %v2207_v56 = vadd.f32 %v2206_v53, %v2192_v52 }
 0x3a8   :  { %v2208_v48 = vadd.f32 %v2207_v56, %v2193_v8 }
 0x3aa   :  { %v2209_v63 = vadd.f32 %v2208_v48, %v2194_v14 }
 0x3ac   :  { %v2210_v17 = vadd.f32 %v2209_v63, %v2195_v22 }
 0x3ae   :  { %v2211_v41 = vadd.f32 %v2210_v17, %v2196_v51 }
 0x3b0   :  { %v2212_v24 = vadd.f32 %v2211_v41, %v2197_v15 }
 0x3b2   :  { %v2213_v2 = vadd.f32 %v2212_v24, %v2198_v27 }
 0x3b4   :  { %v2214_v44 = vadd.f32 %v2213_v2, %v2199_v34 }
 0x3b6   :  { %v2215_v0 = vadd.f32 %v2214_v44, %v2200_v30 }
 0x3b8   :  { %v2216_v61 = vadd.f32 %v2215_v0, %v2201_v43 }
 0x3ba   :  { %v2217_v25 = vadd.f32 %v2216_v61, %v2202_v4 }
 0x3bc   :  { %v2218_v37 = vadd.f32 %v2217_v25, %v2203_v6 }
 0x3be   :  { %2219 = vadd.xlane.f32.xlu0 %v2218_v37 }
 0x44b   :  { %v2220_v40 = vpop.xlane.xlu0 %2219 }
 0x44c   :  { %v2221_v1 = vrot.slane %v2220_v40, 4 }
 0x44e   :  { %v2222_v12 = vadd.f32 %v2221_v1, %v2220_v40 }
 0x450   :  { %v2223_v16 = vrot.slane %v2222_v12, 2 }
 0x452   :  { %v2224_v62 = vadd.f32 %v2223_v16, %v2222_v12 }
 0x454   :  { %v2225_v60 = vrot.slane %v2224_v62, 1 }
 0x456   :  { %v2226_v13 = vadd.f32 %v2225_v60, %v2224_v62 }
 0x458   :  { %2261 = vpush %v2226_v13 }
 0x489   :  { %s2262_s27 = spop %2261 }
 0x48a   :  { %s2230_s28 = smul.f32 0.0625, %s2262_s27 }
 0x48c   :  { %s2231_s29 = smul.f32 0.1, %s2230_s28 }
 0x48e   :  { %s2232_s6 = sadd.f32 %s2231_s29, %s2152_s26 }
 0x490   :  { %v2233_v58 = vstv %s2232_s6 }
 0x491   :  { %2234 = vst [vmem:[#allocation12] sm:$0xff] %v2233_v58 }
 0x492   :  { %2421 = shalt.err (!%p2418_p0)
}
 0x493   :  { %s2422_s10 = scalar_lea.hbm %s4274_s4, 128 }
 0x494   :  { %p2423_p1 = scmp.ne.s32.totalorder %s4274_s4, %s2422_s10  ;;  %p2426_p2 = scmp.lt.u32.totalorder %s2422_s10, %s4274_s4 }
 0x496   :  { %p2428_p3 = pnand %p2426_p2, %p2423_p1 }
 0x498   :  { %2431 = shalt.err (!%p2428_p3)
}
 0x499   :  { %2244 = dma.vmem_to_hbm [thread:$0]  %s2242_s5, 128, %s4274_s4, [#allocation9]  }
 0x49a   :  { %2438 = dma.done.wait [#allocation9], 128  }
 0x49b   :  { %2439 = vsyncadd [#allocation9], 4294967168 }
 0x49c   :  { %2248 = vsyncpa [#allocation8], 1 }
 0x49d   :  { %2249 = vsyncpa [#allocation11], 1 }
 0x49e   :  { %2250 = vsyncpa [#allocation9], 1 }
 0x49f   :  { %2251 = vsyncmov [#allocation6] }
 0x4a2   :  { %s2252_s2 = vpop.sfrf %2251 }
 0x4a3   :  { %p2258_p4 = scmp.ne.s32.totalorder %s2252_s2, 0 }
 0x4a5   :  { %2256 = shalt.err (%p2258_p4)  }

</bundles_post_ra>
